<compile_context>
chip_gen: v7x
topology: tpu7x:2x2x1
jax: 0.10.0
libtpu: 0.0.40
codegen_flags: <defaults>
</compile_context>

<pallas_src>
import functools

import jax
import jax.numpy as jnp
from jax.experimental import pallas as pl
from jax.experimental.pallas import tpu as pltpu

_LANES = 128


def _sphere_trace_kernel(params_ref, rays_ref, color_ref, *, max_iters, eps):
    """One block of rays.

    params_ref : SMEM f32[13] = [radius, W (9, row-major), b (3)]
    rays_ref   : VMEM (6, rows, 128) = [ox, oy, oz, dx, dy, dz] slabs
    color_ref  : VMEM (3, rows, 128) = [r, g, b] slabs (zero where ray missed)
    """
    # Dense (rows, 128) component slabs -- full-vreg VPU operands.
    ox = rays_ref[0]
    oy = rays_ref[1]
    oz = rays_ref[2]
    dx = rays_ref[3]
    dy = rays_ref[4]
    dz = rays_ref[5]

    # Hoist all SMEM scalar reads once per block.
    radius = params_ref[0]
    w = [[params_ref[1 + 3 * k + j] for j in range(3)] for k in range(3)]
    bias = [params_ref[10 + k] for k in range(3)]

    t = jnp.zeros_like(ox)
    f = t
    # Fully unrolled: max_iters is a static Python int, so the LLO scheduler can
    # interleave the EUP sqrt with the VPU mul/adds of neighbouring iterations.
    # Mirrors torch: f = sdf(p); mask = |f| <= eps; t += f; p = o + t*d
    for _ in range(max_iters):
        px = ox + t * dx
        py = oy + t * dy
        pz = oz + t * dz
        f = jnp.sqrt(px * px + py * py + pz * pz) - radius
        t = t + f

    mask = jnp.abs(f) <= eps          # from the last SDF evaluation, as in torch
    # Final intersection points p = o + t*d (with the final t), as in torch.
    px = ox + t * dx
    py = oy + t * dy
    pz = oz + t * dz

    zero = jnp.zeros_like(px)
    # get_color(p) = sigmoid(W @ p + b); scalar-weight FMAs on the VPU, one
    # dense full-width store per channel.  color[mask] = get_color(points[mask])
    # becomes a pointwise select because get_color is pointwise.
    for k in range(3):
        z = w[k][0] * px + w[k][1] * py + w[k][2] * pz + bias[k]
        color_ref[k] = jnp.where(mask, jax.nn.sigmoid(z), zero)


@functools.partial(jax.jit, static_argnames=("rays_per_block", "max_iters", "eps"))
def _render_impl(origins, directions, params, *, rays_per_block, max_iters, eps):
    N = origins.shape[0]
    rows_per_block = rays_per_block // _LANES
    n_pad = ((N + rays_per_block - 1) // rays_per_block) * rays_per_block
    n_rows = n_pad // _LANES

    # Pad + SoA repack, fused into this jit (no separately materialized
    # transpose round-trips around the pallas_call).
    o = jnp.zeros((n_pad, 3), jnp.float32).at[:N].set(origins.astype(jnp.float32))
    d = jnp.zeros((n_pad, 3), jnp.float32).at[:N].set(directions.astype(jnp.float32))
    rays = jnp.concatenate([o.T, d.T], axis=0).reshape(6, n_rows, _LANES)

    kernel = functools.partial(_sphere_trace_kernel, max_iters=max_iters, eps=eps)
    grid = (n_rows // rows_per_block,)   # one grid step per (large) ray chunk

    color = pl.pallas_call(
        kernel,
        out_shape=jax.ShapeDtypeStruct((3, n_rows, _LANES), jnp.float32),
        grid=grid,
        in_specs=[
            pl.BlockSpec(memory_space=pltpu.MemorySpace.SMEM),                 # params
            pl.BlockSpec((6, rows_per_block, _LANES), lambda i: (0, i, 0)),    # rays SoA
        ],
        out_specs=pl.BlockSpec((3, rows_per_block, _LANES), lambda i: (0, i, 0)),
        compiler_params=pltpu.CompilerParams(
            dimension_semantics=("parallel",),   # ray chunks are independent (v7x: 2 TCs)
        ),
    )(params, rays)

    # Un-pack SoA -> (N, 3) inside the same jit.
    return color.reshape(3, n_pad).T[:N]


def sphere_tracing_render(origins, directions, radius, W, b,
                          rays_per_block=8192, max_iters=8, eps=1.0):
    """Pallas equivalent of SphereTracingRenderer.forward -> out['color'] (N, 3).

    Note: the torch module's chunk loop only batches work; the concatenated
    result is identical for any chunking, so we use large lane-dense blocks.
    Padded rays are colored (they trivially 'hit' with eps=1) but sliced off.
    """
    params = jnp.concatenate([
        jnp.asarray([radius], jnp.float32),
        jnp.asarray(W, jnp.float32).reshape(-1),
        jnp.asarray(b, jnp.float32).reshape(-1),
    ])  # (13,)
    return _render_impl(origins, directions, params,
                        rays_per_block=int(rays_per_block),
                        max_iters=int(max_iters), eps=float(eps))


def _reference(origins, directions, radius, W, b, max_iters, eps):
    """Pure-JAX mirror of the PyTorch module (for correctness checking)."""
    N = origins.shape[0]
    t = jnp.zeros((N, 1), jnp.float32)
    p = origins
    mask = jnp.zeros((N, 1), bool)
    for _ in range(max_iters):
        f = jnp.sqrt(jnp.sum(p * p, axis=-1, keepdims=True)) - radius
        mask = jnp.abs(f) <= eps
        t = t + f
        p = origins + t * directions
    color = jax.nn.sigmoid(p @ W.T + b)
    return jnp.where(mask, color, 0.0)


if __name__ == "__main__":
    key = jax.random.PRNGKey(0)
    k_o, k_d = jax.random.split(key)

    N_RAYS = 256          # ray-bundle size B
    MAX_ITERS = 8         # cfg.max_iters
    EPS = 1.0             # self.eps = 1
    RADIUS = 1.0

    # Camera-ish rays: origins near (0, 0, -4), directions roughly toward the sphere.
    origins = jnp.array([0.0, 0.0, -4.0]) + 0.1 * jax.random.normal(k_o, (N_RAYS, 3))
    directions = jnp.array([0.0, 0.0, 1.0]) + 0.2 * jax.random.normal(k_d, (N_RAYS, 3))
    directions = directions / jnp.linalg.norm(directions, axis=-1, keepdims=True)
    origins = origins.astype(jnp.float32)
    directions = directions.astype(jnp.float32)

    # Deterministic synthetic get_color parameters.
    W = jnp.array([[0.50, -0.25, 0.10],
                   [0.20, 0.30, -0.40],
                   [-0.10, 0.20, 0.60]], jnp.float32)
    b = jnp.array([0.10, -0.20, 0.05], jnp.float32)

    color = sphere_tracing_render(origins, directions, RADIUS, W, b,
                                  rays_per_block=8192, max_iters=MAX_ITERS, eps=EPS)
    color = jax.block_until_ready(color)

    ref = _reference(origins, directions, RADIUS, W, b, MAX_ITERS, EPS)
    assert color.shape == (N_RAYS, 3)
    assert jnp.allclose(color, ref, atol=1e-4, rtol=1e-4)

    print("KERNEL_OK")
</pallas_src>

<mosaic_0001>
module attributes {stable_mosaic.version = 11 : i64} {
  func.func @_sphere_trace_kernel(%arg0: i32, %arg1: memref<13xf32, #tpu.memory_space<smem>>, %arg2: memref<6x64x128xf32, #tpu.memory_space<vmem>>, %arg3: memref<3x64x128xf32, #tpu.memory_space<vmem>>) attributes {dimension_semantics = [#tpu.dimension_semantics<parallel>], iteration_bounds = array<i64: 1>, scalar_prefetch = 0 : i64, scratch_operands = 0 : i64, tpu.core_type = #tpu.core_type<tc>, window_params = [{transform_indices = @transform_0, window_bounds = array<i64: 13>}, {transform_indices = @transform_1, window_bounds = array<i64: 6, 64, 128>}, {transform_indices = @transform_2, window_bounds = array<i64: 3, 64, 128>}]} {
    %c0 = arith.constant 0 : index
    %c0_0 = arith.constant 0 : index
    %c0_1 = arith.constant 0 : index
    %0 = vector.load %arg2[%c0, %c0_0, %c0_1] : memref<6x64x128xf32, #tpu.memory_space<vmem>>, vector<1x64x128xf32>
    %1 = vector.shape_cast %0 : vector<1x64x128xf32> to vector<64x128xf32>
    %c1 = arith.constant 1 : index
    %c0_2 = arith.constant 0 : index
    %c0_3 = arith.constant 0 : index
    %2 = vector.load %arg2[%c1, %c0_2, %c0_3] : memref<6x64x128xf32, #tpu.memory_space<vmem>>, vector<1x64x128xf32>
    %3 = vector.shape_cast %2 : vector<1x64x128xf32> to vector<64x128xf32>
    %c2 = arith.constant 2 : index
    %c0_4 = arith.constant 0 : index
    %c0_5 = arith.constant 0 : index
    %4 = vector.load %arg2[%c2, %c0_4, %c0_5] : memref<6x64x128xf32, #tpu.memory_space<vmem>>, vector<1x64x128xf32>
    %5 = vector.shape_cast %4 : vector<1x64x128xf32> to vector<64x128xf32>
    %c3 = arith.constant 3 : index
    %c0_6 = arith.constant 0 : index
    %c0_7 = arith.constant 0 : index
    %6 = vector.load %arg2[%c3, %c0_6, %c0_7] : memref<6x64x128xf32, #tpu.memory_space<vmem>>, vector<1x64x128xf32>
    %7 = vector.shape_cast %6 : vector<1x64x128xf32> to vector<64x128xf32>
    %c4 = arith.constant 4 : index
    %c0_8 = arith.constant 0 : index
    %c0_9 = arith.constant 0 : index
    %8 = vector.load %arg2[%c4, %c0_8, %c0_9] : memref<6x64x128xf32, #tpu.memory_space<vmem>>, vector<1x64x128xf32>
    %9 = vector.shape_cast %8 : vector<1x64x128xf32> to vector<64x128xf32>
    %c5 = arith.constant 5 : index
    %c0_10 = arith.constant 0 : index
    %c0_11 = arith.constant 0 : index
    %10 = vector.load %arg2[%c5, %c0_10, %c0_11] : memref<6x64x128xf32, #tpu.memory_space<vmem>>, vector<1x64x128xf32>
    %11 = vector.shape_cast %10 : vector<1x64x128xf32> to vector<64x128xf32>
    %c0_12 = arith.constant 0 : index
    %12 = memref.load %arg1[%c0_12] : memref<13xf32, #tpu.memory_space<smem>>
    %c1_13 = arith.constant 1 : index
    %13 = memref.load %arg1[%c1_13] : memref<13xf32, #tpu.memory_space<smem>>
    %c2_14 = arith.constant 2 : index
    %14 = memref.load %arg1[%c2_14] : memref<13xf32, #tpu.memory_space<smem>>
    %c3_15 = arith.constant 3 : index
    %15 = memref.load %arg1[%c3_15] : memref<13xf32, #tpu.memory_space<smem>>
    %c4_16 = arith.constant 4 : index
    %16 = memref.load %arg1[%c4_16] : memref<13xf32, #tpu.memory_space<smem>>
    %c5_17 = arith.constant 5 : index
    %17 = memref.load %arg1[%c5_17] : memref<13xf32, #tpu.memory_space<smem>>
    %c6 = arith.constant 6 : index
    %18 = memref.load %arg1[%c6] : memref<13xf32, #tpu.memory_space<smem>>
    %c7 = arith.constant 7 : index
    %19 = memref.load %arg1[%c7] : memref<13xf32, #tpu.memory_space<smem>>
    %c8 = arith.constant 8 : index
    %20 = memref.load %arg1[%c8] : memref<13xf32, #tpu.memory_space<smem>>
    %c9 = arith.constant 9 : index
    %21 = memref.load %arg1[%c9] : memref<13xf32, #tpu.memory_space<smem>>
    %c10 = arith.constant 10 : index
    %22 = memref.load %arg1[%c10] : memref<13xf32, #tpu.memory_space<smem>>
    %c11 = arith.constant 11 : index
    %23 = memref.load %arg1[%c11] : memref<13xf32, #tpu.memory_space<smem>>
    %c12 = arith.constant 12 : index
    %24 = memref.load %arg1[%c12] : memref<13xf32, #tpu.memory_space<smem>>
    %cst = arith.constant 0.000000e+00 : f32
    %25 = vector.broadcast %cst : f32 to vector<64x128xf32>
    %26 = arith.mulf %25, %7 : vector<64x128xf32>
    %27 = arith.addf %1, %26 : vector<64x128xf32>
    %28 = arith.mulf %25, %9 : vector<64x128xf32>
    %29 = arith.addf %3, %28 : vector<64x128xf32>
    %30 = arith.mulf %25, %11 : vector<64x128xf32>
    %31 = arith.addf %5, %30 : vector<64x128xf32>
    %32 = arith.mulf %27, %27 : vector<64x128xf32>
    %33 = arith.mulf %29, %29 : vector<64x128xf32>
    %34 = arith.addf %32, %33 : vector<64x128xf32>
    %35 = arith.mulf %31, %31 : vector<64x128xf32>
    %36 = arith.addf %34, %35 : vector<64x128xf32>
    %37 = math.sqrt %36 : vector<64x128xf32>
    %38 = vector.broadcast %12 : f32 to vector<64x128xf32>
    %39 = arith.subf %37, %38 : vector<64x128xf32>
    %40 = arith.addf %25, %39 : vector<64x128xf32>
    %41 = arith.mulf %40, %7 : vector<64x128xf32>
    %42 = arith.addf %1, %41 : vector<64x128xf32>
    %43 = arith.mulf %40, %9 : vector<64x128xf32>
    %44 = arith.addf %3, %43 : vector<64x128xf32>
    %45 = arith.mulf %40, %11 : vector<64x128xf32>
    %46 = arith.addf %5, %45 : vector<64x128xf32>
    %47 = arith.mulf %42, %42 : vector<64x128xf32>
    %48 = arith.mulf %44, %44 : vector<64x128xf32>
    %49 = arith.addf %47, %48 : vector<64x128xf32>
    %50 = arith.mulf %46, %46 : vector<64x128xf32>
    %51 = arith.addf %49, %50 : vector<64x128xf32>
    %52 = math.sqrt %51 : vector<64x128xf32>
    %53 = vector.broadcast %12 : f32 to vector<64x128xf32>
    %54 = arith.subf %52, %53 : vector<64x128xf32>
    %55 = arith.addf %40, %54 : vector<64x128xf32>
    %56 = arith.mulf %55, %7 : vector<64x128xf32>
    %57 = arith.addf %1, %56 : vector<64x128xf32>
    %58 = arith.mulf %55, %9 : vector<64x128xf32>
    %59 = arith.addf %3, %58 : vector<64x128xf32>
    %60 = arith.mulf %55, %11 : vector<64x128xf32>
    %61 = arith.addf %5, %60 : vector<64x128xf32>
    %62 = arith.mulf %57, %57 : vector<64x128xf32>
    %63 = arith.mulf %59, %59 : vector<64x128xf32>
    %64 = arith.addf %62, %63 : vector<64x128xf32>
    %65 = arith.mulf %61, %61 : vector<64x128xf32>
    %66 = arith.addf %64, %65 : vector<64x128xf32>
    %67 = math.sqrt %66 : vector<64x128xf32>
    %68 = vector.broadcast %12 : f32 to vector<64x128xf32>
    %69 = arith.subf %67, %68 : vector<64x128xf32>
    %70 = arith.addf %55, %69 : vector<64x128xf32>
    %71 = arith.mulf %70, %7 : vector<64x128xf32>
    %72 = arith.addf %1, %71 : vector<64x128xf32>
    %73 = arith.mulf %70, %9 : vector<64x128xf32>
    %74 = arith.addf %3, %73 : vector<64x128xf32>
    %75 = arith.mulf %70, %11 : vector<64x128xf32>
    %76 = arith.addf %5, %75 : vector<64x128xf32>
    %77 = arith.mulf %72, %72 : vector<64x128xf32>
    %78 = arith.mulf %74, %74 : vector<64x128xf32>
    %79 = arith.addf %77, %78 : vector<64x128xf32>
    %80 = arith.mulf %76, %76 : vector<64x128xf32>
    %81 = arith.addf %79, %80 : vector<64x128xf32>
    %82 = math.sqrt %81 : vector<64x128xf32>
    %83 = vector.broadcast %12 : f32 to vector<64x128xf32>
    %84 = arith.subf %82, %83 : vector<64x128xf32>
    %85 = arith.addf %70, %84 : vector<64x128xf32>
    %86 = arith.mulf %85, %7 : vector<64x128xf32>
    %87 = arith.addf %1, %86 : vector<64x128xf32>
    %88 = arith.mulf %85, %9 : vector<64x128xf32>
    %89 = arith.addf %3, %88 : vector<64x128xf32>
    %90 = arith.mulf %85, %11 : vector<64x128xf32>
    %91 = arith.addf %5, %90 : vector<64x128xf32>
    %92 = arith.mulf %87, %87 : vector<64x128xf32>
    %93 = arith.mulf %89, %89 : vector<64x128xf32>
    %94 = arith.addf %92, %93 : vector<64x128xf32>
    %95 = arith.mulf %91, %91 : vector<64x128xf32>
    %96 = arith.addf %94, %95 : vector<64x128xf32>
    %97 = math.sqrt %96 : vector<64x128xf32>
    %98 = vector.broadcast %12 : f32 to vector<64x128xf32>
    %99 = arith.subf %97, %98 : vector<64x128xf32>
    %100 = arith.addf %85, %99 : vector<64x128xf32>
    %101 = arith.mulf %100, %7 : vector<64x128xf32>
    %102 = arith.addf %1, %101 : vector<64x128xf32>
    %103 = arith.mulf %100, %9 : vector<64x128xf32>
    %104 = arith.addf %3, %103 : vector<64x128xf32>
    %105 = arith.mulf %100, %11 : vector<64x128xf32>
    %106 = arith.addf %5, %105 : vector<64x128xf32>
    %107 = arith.mulf %102, %102 : vector<64x128xf32>
    %108 = arith.mulf %104, %104 : vector<64x128xf32>
    %109 = arith.addf %107, %108 : vector<64x128xf32>
    %110 = arith.mulf %106, %106 : vector<64x128xf32>
    %111 = arith.addf %109, %110 : vector<64x128xf32>
    %112 = math.sqrt %111 : vector<64x128xf32>
    %113 = vector.broadcast %12 : f32 to vector<64x128xf32>
    %114 = arith.subf %112, %113 : vector<64x128xf32>
    %115 = arith.addf %100, %114 : vector<64x128xf32>
    %116 = arith.mulf %115, %7 : vector<64x128xf32>
    %117 = arith.addf %1, %116 : vector<64x128xf32>
    %118 = arith.mulf %115, %9 : vector<64x128xf32>
    %119 = arith.addf %3, %118 : vector<64x128xf32>
    %120 = arith.mulf %115, %11 : vector<64x128xf32>
    %121 = arith.addf %5, %120 : vector<64x128xf32>
    %122 = arith.mulf %117, %117 : vector<64x128xf32>
    %123 = arith.mulf %119, %119 : vector<64x128xf32>
    %124 = arith.addf %122, %123 : vector<64x128xf32>
    %125 = arith.mulf %121, %121 : vector<64x128xf32>
    %126 = arith.addf %124, %125 : vector<64x128xf32>
    %127 = math.sqrt %126 : vector<64x128xf32>
    %128 = vector.broadcast %12 : f32 to vector<64x128xf32>
    %129 = arith.subf %127, %128 : vector<64x128xf32>
    %130 = arith.addf %115, %129 : vector<64x128xf32>
    %131 = arith.mulf %130, %7 : vector<64x128xf32>
    %132 = arith.addf %1, %131 : vector<64x128xf32>
    %133 = arith.mulf %130, %9 : vector<64x128xf32>
    %134 = arith.addf %3, %133 : vector<64x128xf32>
    %135 = arith.mulf %130, %11 : vector<64x128xf32>
    %136 = arith.addf %5, %135 : vector<64x128xf32>
    %137 = arith.mulf %132, %132 : vector<64x128xf32>
    %138 = arith.mulf %134, %134 : vector<64x128xf32>
    %139 = arith.addf %137, %138 : vector<64x128xf32>
    %140 = arith.mulf %136, %136 : vector<64x128xf32>
    %141 = arith.addf %139, %140 : vector<64x128xf32>
    %142 = math.sqrt %141 : vector<64x128xf32>
    %143 = vector.broadcast %12 : f32 to vector<64x128xf32>
    %144 = arith.subf %142, %143 : vector<64x128xf32>
    %145 = arith.addf %130, %144 : vector<64x128xf32>
    %146 = math.absf %144 : vector<64x128xf32>
    %cst_18 = arith.constant 1.000000e+00 : f32
    %147 = vector.broadcast %cst_18 : f32 to vector<64x128xf32>
    %148 = arith.cmpf ole, %146, %147 : vector<64x128xf32>
    %149 = arith.mulf %145, %7 : vector<64x128xf32>
    %150 = arith.addf %1, %149 : vector<64x128xf32>
    %151 = arith.mulf %145, %9 : vector<64x128xf32>
    %152 = arith.addf %3, %151 : vector<64x128xf32>
    %153 = arith.mulf %145, %11 : vector<64x128xf32>
    %154 = arith.addf %5, %153 : vector<64x128xf32>
    %cst_19 = arith.constant 0.000000e+00 : f32
    %155 = vector.broadcast %cst_19 : f32 to vector<64x128xf32>
    %156 = vector.broadcast %13 : f32 to vector<64x128xf32>
    %157 = arith.mulf %156, %150 : vector<64x128xf32>
    %158 = vector.broadcast %14 : f32 to vector<64x128xf32>
    %159 = arith.mulf %158, %152 : vector<64x128xf32>
    %160 = arith.addf %157, %159 : vector<64x128xf32>
    %161 = vector.broadcast %15 : f32 to vector<64x128xf32>
    %162 = arith.mulf %161, %154 : vector<64x128xf32>
    %163 = arith.addf %160, %162 : vector<64x128xf32>
    %164 = vector.broadcast %22 : f32 to vector<64x128xf32>
    %165 = arith.addf %163, %164 : vector<64x128xf32>
    %166 = arith.negf %165 : vector<64x128xf32>
    %167 = math.exp %166 : vector<64x128xf32>
    %cst_20 = arith.constant 1.000000e+00 : f32
    %168 = vector.broadcast %cst_20 : f32 to vector<64x128xf32>
    %169 = arith.addf %168, %167 : vector<64x128xf32>
    %170 = arith.divf %168, %169 : vector<64x128xf32>
    %171 = arith.select %148, %170, %155 : vector<64x128xi1>, vector<64x128xf32>
    %c0_21 = arith.constant 0 : index
    %c0_22 = arith.constant 0 : index
    %c0_23 = arith.constant 0 : index
    %172 = vector.load %arg3[%c0_21, %c0_22, %c0_23] : memref<3x64x128xf32, #tpu.memory_space<vmem>>, vector<1x64x128xf32>
    %173 = vector.shape_cast %172 : vector<1x64x128xf32> to vector<64x128xf32>
    %174 = vector.shape_cast %171 : vector<64x128xf32> to vector<1x64x128xf32>
    tpu.vector_store %arg3[%c0_21, %c0_22, %c0_23], %174 {strides = array<i32>} : memref<3x64x128xf32, #tpu.memory_space<vmem>>, vector<1x64x128xf32>,
    %175 = vector.broadcast %16 : f32 to vector<64x128xf32>
    %176 = arith.mulf %175, %150 : vector<64x128xf32>
    %177 = vector.broadcast %17 : f32 to vector<64x128xf32>
    %178 = arith.mulf %177, %152 : vector<64x128xf32>
    %179 = arith.addf %176, %178 : vector<64x128xf32>
    %180 = vector.broadcast %18 : f32 to vector<64x128xf32>
    %181 = arith.mulf %180, %154 : vector<64x128xf32>
    %182 = arith.addf %179, %181 : vector<64x128xf32>
    %183 = vector.broadcast %23 : f32 to vector<64x128xf32>
    %184 = arith.addf %182, %183 : vector<64x128xf32>
    %185 = arith.negf %184 : vector<64x128xf32>
    %186 = math.exp %185 : vector<64x128xf32>
    %cst_24 = arith.constant 1.000000e+00 : f32
    %187 = vector.broadcast %cst_24 : f32 to vector<64x128xf32>
    %188 = arith.addf %187, %186 : vector<64x128xf32>
    %189 = arith.divf %187, %188 : vector<64x128xf32>
    %190 = arith.select %148, %189, %155 : vector<64x128xi1>, vector<64x128xf32>
    %c1_25 = arith.constant 1 : index
    %c0_26 = arith.constant 0 : index
    %c0_27 = arith.constant 0 : index
    %191 = vector.load %arg3[%c1_25, %c0_26, %c0_27] : memref<3x64x128xf32, #tpu.memory_space<vmem>>, vector<1x64x128xf32>
    %192 = vector.shape_cast %191 : vector<1x64x128xf32> to vector<64x128xf32>
    %193 = vector.shape_cast %190 : vector<64x128xf32> to vector<1x64x128xf32>
    tpu.vector_store %arg3[%c1_25, %c0_26, %c0_27], %193 {strides = array<i32>} : memref<3x64x128xf32, #tpu.memory_space<vmem>>, vector<1x64x128xf32>,
    %194 = vector.broadcast %19 : f32 to vector<64x128xf32>
    %195 = arith.mulf %194, %150 : vector<64x128xf32>
    %196 = vector.broadcast %20 : f32 to vector<64x128xf32>
    %197 = arith.mulf %196, %152 : vector<64x128xf32>
    %198 = arith.addf %195, %197 : vector<64x128xf32>
    %199 = vector.broadcast %21 : f32 to vector<64x128xf32>
    %200 = arith.mulf %199, %154 : vector<64x128xf32>
    %201 = arith.addf %198, %200 : vector<64x128xf32>
    %202 = vector.broadcast %24 : f32 to vector<64x128xf32>
    %203 = arith.addf %201, %202 : vector<64x128xf32>
    %204 = arith.negf %203 : vector<64x128xf32>
    %205 = math.exp %204 : vector<64x128xf32>
    %cst_28 = arith.constant 1.000000e+00 : f32
    %206 = vector.broadcast %cst_28 : f32 to vector<64x128xf32>
    %207 = arith.addf %206, %205 : vector<64x128xf32>
    %208 = arith.divf %206, %207 : vector<64x128xf32>
    %209 = arith.select %148, %208, %155 : vector<64x128xi1>, vector<64x128xf32>
    %c2_29 = arith.constant 2 : index
    %c0_30 = arith.constant 0 : index
    %c0_31 = arith.constant 0 : index
    %210 = vector.load %arg3[%c2_29, %c0_30, %c0_31] : memref<3x64x128xf32, #tpu.memory_space<vmem>>, vector<1x64x128xf32>
    %211 = vector.shape_cast %210 : vector<1x64x128xf32> to vector<64x128xf32>
    %212 = vector.shape_cast %209 : vector<64x128xf32> to vector<1x64x128xf32>
    tpu.vector_store %arg3[%c2_29, %c0_30, %c0_31], %212 {strides = array<i32>} : memref<3x64x128xf32, #tpu.memory_space<vmem>>, vector<1x64x128xf32>,
    return
  }
  func.func @transform_0(%arg0: i32) -> i32 {
    %c0_i32 = arith.constant 0 : i32
    %c0_i32_0 = arith.constant 0 : i32
    return %c0_i32 : i32
  }
  func.func @transform_1(%arg0: i32) -> (i32, i32, i32) {
    %c0_i32 = arith.constant 0 : i32
    %c0_i32_0 = arith.constant 0 : i32
    %c0_i32_1 = arith.constant 0 : i32
    return %c0_i32, %arg0, %c0_i32_0 : i32, i32, i32
  }
  func.func @transform_2(%arg0: i32) -> (i32, i32, i32) {
    %c0_i32 = arith.constant 0 : i32
    %c0_i32_0 = arith.constant 0 : i32
    %c0_i32_1 = arith.constant 0 : i32
    return %c0_i32, %arg0, %c0_i32_0 : i32, i32, i32
  }
}

</mosaic_0001>

<bundles_post_ra>
// kernel: _render_impl.1
= control target key start
LH: loop header
LB: loop body
LE: loop exit
PB: predicated region body
PF: predicated region fallthrough
CT: control target
= control target key end

     0   :  { %7 = vsyncpa [#allocation3], 0  ;;  %s4814_s0 = inlined_call_operand.vmem [shape: f32[13], index: 0, kind: input, shape index: {}]   ;;  %s4815_s1 = inlined_call_operand.vmem [shape: f32[6,64,128], index: 1, kind: input, shape index: {}]   ;;  %s4816_s2 = inlined_call_operand.vmem [shape: f32[3,64,128], index: 2, kind: output, shape index: {}]  }
   0x1   :  { %s14_s11 = sshll.u32 %s4814_s0, 4  ;;  %s15_s11 = int_to_ptr.vmem [resolvable:$true] %s14_s11 }
   0x2   :  { %s2203_s12 = scalar_lea.vmem %s15_s11, 16  ;;  %p2208_p1 = scmp.lt.s32.totalorder %s15_s11, %s15_s11 }
   0x3   :  { %p2204_p0 = scmp.ne.s32.totalorder %s15_s11, %s2203_s12  ;;  %p2209_p2 = scmp.lt.s32.totalorder %s2203_s12, %s2203_s12 }
   0x5   :  { %p2210_p3 = por %p2209_p2, %p2208_p1 }
   0x7   :  { %p2211_p4 = pnand %p2210_p3, %p2204_p0 }
   0x9   :  { %2214 = shalt.err (!%p2211_p4)
}
   0xa   :  { %s2217_s13 = smov [#allocation2]  }
   0xb   :  { %17 = dma.vmem_to_smem %s15_s11, 16, %s2217_s13, [#allocation3]  }
   0xc   :  { %2215 = dma.done.wait [#allocation3], 16  }
   0xd   :  { %2216 = vsyncadd [#allocation3], 4294967280 }
   0xe   :  { %23 = sfence }
   0xf   :  { %v2239_v0 = vld [vmem:[%s4815_s1 + $0xc0] sm:$0xff]  ;;  %v2244_v1 = vld [vmem:[%s4815_s1 + $0xc8] sm:$0xff]  ;;  %v2249_v2 = vld [vmem:[%s4815_s1 + $0xd0] sm:$0xff]  ;;  %s77_s22 = sld [smem:[#allocation2]]  ;;  %s1830_s13 = sld [smem:[#allocation2 + $0x1]] }
  0x10   :  { %v2254_v3 = vld [vmem:[%s4815_s1] sm:$0xff]  ;;  %v2259_v4 = vld [vmem:[%s4815_s1 + $0x8] sm:$0xff]  ;;  %v2264_v5 = vld [vmem:[%s4815_s1 + $0xd8] sm:$0xff]  ;;  %v90_v6 = vmul.f32 0.0, %v2239_v0  ;;  %v91_v13 = vmul.f32 0.0, %v2244_v1  ;;  %v92_v18 = vmul.f32 0.0, %v2249_v2 }
  0x11   :  { %v2270_v7 = vld [vmem:[%s4815_s1 + $0x10] sm:$0xff]  ;;  %v2275_v8 = vld [vmem:[%s4815_s1 + $0x18] sm:$0xff]  ;;  %v2280_v9 = vld [vmem:[%s4815_s1 + $0x20] sm:$0xff]  ;;  %v93_v22 = vmul.f32 0.0, %v2264_v5  ;;  %s1831_s14 = sld [smem:[#allocation2 + $0x2]]  ;;  %s1833_s16 = sld [smem:[#allocation2 + $0x4]] }
  0x12   :  { %4999 = vst [vmem:[#allocation5_spill] sm:$0xff] %v2270_v7  ;;  %5000 = vst [vmem:[#allocation6_spill] sm:$0xff] %v2275_v8  ;;  %v2285_v10 = vld [vmem:[%s4815_s1 + $0xe0] sm:$0xff]  ;;  %v2290_v11 = vld [vmem:[%s4815_s1 + $0xe8] sm:$0xff]  ;;  %v2364_v31 = vadd.f32 %v90_v6, %v2254_v3  ;;  %v99_v36 = vadd.f32 %v91_v13, %v2259_v4  ;;  %v100_v42 = vadd.f32 %v92_v18, %v2270_v7  ;;  %s1839_s15 = sld [smem:[#allocation2 + $0xa]]  ;;  %s1834_s0 = sld [smem:[#allocation2 + $0x5]] }
  0x13   :  { %5001 = vst [vmem:[#allocation7_spill] sm:$0xff] %v2280_v9  ;;  %v2295_v12 = vld [vmem:[%s4815_s1 + $0xf0] sm:$0xff]  ;;  %v2301_v14 = vld [vmem:[%s4815_s1 + $0x28] sm:$0xff]  ;;  %v2306_v15 = vld [vmem:[%s4815_s1 + $0xf8] sm:$0xff]  ;;  %v94_v28 = vmul.f32 0.0, %v2285_v10  ;;  %v95_v29 = vmul.f32 0.0, %v2290_v11  ;;  %v101_v43 = vadd.f32 %v93_v22, %v2275_v8 }
  0x14   :  { %5002 = vst [vmem:[#allocation8_spill] sm:$0xff] %v2301_v14  ;;  %5003 = vst [vmem:[#allocation9_spill] sm:$0xff] %v2306_v15  ;;  %v2311_v16 = vld [vmem:[%s4815_s1 + $0x100] sm:$0xff]  ;;  %v2316_v17 = vld [vmem:[%s4815_s1 + $0x108] sm:$0xff]  ;;  %v96_v30 = vmul.f32 0.0, %v2295_v12  ;;  %v97_v35 = vmul.f32 0.0, %v2306_v15 }
  0x15   :  { %5004 = vst [vmem:[#allocation10_spill] sm:$0xff] %v2311_v16  ;;  %5005 = vst [vmem:[#allocation11_spill] sm:$0xff] %v2316_v17  ;;  %v2322_v19 = vld [vmem:[%s4815_s1 + $0x30] sm:$0xff]  ;;  %v2327_v20 = vld [vmem:[%s4815_s1 + $0x38] sm:$0xff]  ;;  %v106_v37 = vmul.f32 0.0, %v2311_v16  ;;  %v107_v38 = vmul.f32 0.0, %v2316_v17  ;;  %v102_v44 = vadd.f32 %v94_v28, %v2280_v9  ;;  %v103_v51 = vadd.f32 %v95_v29, %v2301_v14 }
  0x16   :  { %5006 = vst [vmem:[#allocation12_spill] sm:$0xff] %v2322_v19  ;;  %5007 = vst [vmem:[#allocation13_spill] sm:$0xff] %v2327_v20  ;;  %v2332_v21 = vld [vmem:[%s4815_s1 + $0x110] sm:$0xff]  ;;  %v2338_v23 = vld [vmem:[%s4815_s1 + $0x40] sm:$0xff]  ;;  %v104_v58 = vadd.f32 %v96_v30, %v2322_v19  ;;  %v105_v59 = vadd.f32 %v97_v35, %v2327_v20  ;;  %s4249_s17 = sld [smem:[#allocation2 + $0x6]]  ;;  %s4255_s18 = sld [smem:[#allocation2 + $0x7]] }
  0x17   :  { %5008 = vst [vmem:[#allocation14_spill] sm:$0xff] %v2332_v21  ;;  %5009 = vst [vmem:[#allocation15_spill] sm:$0xff] %v2338_v23  ;;  %v2343_v24 = vld [vmem:[%s4815_s1 + $0x48] sm:$0xff]  ;;  %v2348_v25 = vld [vmem:[%s4815_s1 + $0x118] sm:$0xff]  ;;  %v108_v45 = vmul.f32 0.0, %v2332_v21  ;;  %v114_v13 = vadd.f32 %v2338_v23, %v106_v37  ;;  %s4257_s19 = sld [smem:[#allocation2 + $0xb]] }
  0x18   :  { %5010 = vst [vmem:[#allocation16_spill] sm:$0xff] %v2343_v24  ;;  %5011 = vst [vmem:[#allocation17_spill] sm:$0xff] %v2348_v25  ;;  %v2353_v26 = vld [vmem:[%s4815_s1 + $0x120] sm:$0xff]  ;;  %v2358_v27 = vld [vmem:[%s4815_s1 + $0x128] sm:$0xff]  ;;  %v109_v52 = vmul.f32 0.0, %v2348_v25  ;;  %v115_v18 = vadd.f32 %v2343_v24, %v107_v38  ;;  %s4265_s20 = sld [smem:[#allocation2 + $0x8]] }
  0x19   :  { %5012 = vst [vmem:[#allocation18_spill] sm:$0xff] %v2353_v26  ;;  %5013 = vst [vmem:[#allocation19_spill] sm:$0xff] %v2358_v27  ;;  %v2369_v32 = vld [vmem:[%s4815_s1 + $0x50] sm:$0xff]  ;;  %v2379_v34 = vld [vmem:[%s4815_s1 + $0x138] sm:$0xff]  ;;  %v110_v53 = vmul.f32 0.0, %v2353_v26  ;;  %v111_v54 = vmul.f32 0.0, %v2358_v27 }
  0x1a   :  { %5014 = vst [vmem:[#allocation20_spill] sm:$0xff] %v2369_v32  ;;  %v2374_v33 = vld [vmem:[%s4815_s1 + $0x130] sm:$0xff]  ;;  %5016 = vst [vmem:[#allocation22_spill] sm:$0xff] %v2379_v34  ;;  %v2388_v39 = vld [vmem:[%s4815_s1 + $0x58] sm:$0xff]  ;;  %v113_v61 = vmul.f32 0.0, %v2379_v34  ;;  %v116_v22 = vadd.f32 %v2369_v32, %v108_v45  ;;  %s4267_s21 = sld [smem:[#allocation2 + $0x9]] }
  0x1b   :  { %5015 = vst [vmem:[#allocation21_spill] sm:$0xff] %v2374_v33  ;;  %5017 = vst [vmem:[#allocation23_spill] sm:$0xff] %v2388_v39  ;;  %v2393_v40 = vld [vmem:[%s4815_s1 + $0x60] sm:$0xff]  ;;  %v2398_v41 = vld [vmem:[%s4815_s1 + $0x68] sm:$0xff]  ;;  %v112_v60 = vmul.f32 0.0, %v2374_v33  ;;  %v117_v28 = vadd.f32 %v2388_v39, %v109_v52 }
  0x1c   :  { %5018 = vst [vmem:[#allocation24_spill] sm:$0xff] %v2393_v40  ;;  %5019 = vst [vmem:[#allocation25_spill] sm:$0xff] %v2398_v41  ;;  %v2407_v46 = vld [vmem:[%s4815_s1 + $0x70] sm:$0xff]  ;;  %v2412_v47 = vld [vmem:[%s4815_s1 + $0x78] sm:$0xff]  ;;  %v118_v37 = vadd.f32 %v2393_v40, %v110_v53  ;;  %v119_v38 = vadd.f32 %v2398_v41, %v111_v54 }
  0x1d   :  { %5020 = vst [vmem:[#allocation26_spill] sm:$0xff] %v2407_v46  ;;  %5021 = vst [vmem:[#allocation27_spill] sm:$0xff] %v2412_v47  ;;  %v2417_v48 = vld [vmem:[%s4815_s1 + $0x140] sm:$0xff]  ;;  %v2422_v49 = vld [vmem:[%s4815_s1 + $0x148] sm:$0xff]  ;;  %v120_v40 = vadd.f32 %v2407_v46, %v112_v60  ;;  %v138_v60 = vmul.f32 %v2364_v31, %v2364_v31  ;;  %v140_v46 = vmul.f32 %v100_v42, %v100_v42 }
  0x1e   :  { %5022 = vst [vmem:[#allocation28_spill] sm:$0xff] %v2417_v48  ;;  %5023 = vst [vmem:[#allocation29_spill] sm:$0xff] %v2422_v49  ;;  %v2427_v50 = vld [vmem:[%s4815_s1 + $0x150] sm:$0xff]  ;;  %v2436_v55 = vld [vmem:[%s4815_s1 + $0x158] sm:$0xff]  ;;  %v122_v45 = vmul.f32 0.0, %v2417_v48  ;;  %v123_v52 = vmul.f32 0.0, %v2422_v49  ;;  %v145_v31 = vmul.f32 %v105_v59, %v105_v59 }
  0x1f   :  { %5024 = vst [vmem:[#allocation30_spill] sm:$0xff] %v2427_v50  ;;  %5025 = vst [vmem:[#allocation31_spill] sm:$0xff] %v2436_v55  ;;  %v2441_v56 = vld [vmem:[%s4815_s1 + $0x160] sm:$0xff]  ;;  %v2446_v57 = vld [vmem:[%s4815_s1 + $0x168] sm:$0xff]  ;;  %v124_v24 = vmul.f32 0.0, %v2427_v50  ;;  %v125_v53 = vmul.f32 0.0, %v2436_v55  ;;  %v121_v50 = vadd.f32 %v2412_v47, %v113_v61  ;;  %v139_v61 = vmul.f32 %v99_v36, %v99_v36 }
  0x20   :  { %5026 = vst [vmem:[#allocation32_spill] sm:$0xff] %v2441_v56  ;;  %5027 = vst [vmem:[#allocation33_spill] sm:$0xff] %v2446_v57  ;;  %v2455_v62 = vld [vmem:[%s4815_s1 + $0x80] sm:$0xff]  ;;  %v2460_v63 = vld [vmem:[%s4815_s1 + $0x170] sm:$0xff]  ;;  %v126_v54 = vmul.f32 0.0, %v2441_v56  ;;  %v127_v48 = vmul.f32 0.0, %v2446_v57 }
  0x21   :  { %5028 = vst [vmem:[#allocation34_spill] sm:$0xff] %v2455_v62  ;;  %5029 = vst [vmem:[#allocation35_spill] sm:$0xff] %v2460_v63  ;;  %v2465_v6 = vld [vmem:[%s4815_s1 + $0x178] sm:$0xff]  ;;  %v2474_v29 = vld [vmem:[%s4815_s1 + $0x88] sm:$0xff]  ;;  %v128_v55 = vmul.f32 0.0, %v2460_v63  ;;  %v130_v57 = vadd.f32 %v2455_v62, %v122_v45  ;;  %v141_v45 = vmul.f32 %v101_v43, %v101_v43  ;;  %v142_v62 = vmul.f32 %v102_v44, %v102_v44 }
  0x22   :  { %5030 = vst [vmem:[#allocation36_spill] sm:$0xff] %v2465_v6  ;;  %5031 = vst [vmem:[#allocation37_spill] sm:$0xff] %v2474_v29  ;;  %v2479_v30 = vld [vmem:[%s4815_s1 + $0x90] sm:$0xff]  ;;  %v2484_v35 = vld [vmem:[%s4815_s1 + $0x98] sm:$0xff]  ;;  %v129_v56 = vmul.f32 0.0, %v2465_v6  ;;  %v131_v23 = vadd.f32 %v2474_v29, %v123_v52  ;;  %v143_v52 = vmul.f32 %v103_v51, %v103_v51  ;;  %v146_v29 = vmul.f32 %v114_v13, %v114_v13 }
  0x23   :  { %5032 = vst [vmem:[#allocation38_spill] sm:$0xff] %v2479_v30  ;;  %5033 = vst [vmem:[#allocation39_spill] sm:$0xff] %v2484_v35  ;;  %v2493_v39 = vld [vmem:[%s4815_s1 + $0xa0] sm:$0xff]  ;;  %v2498_v32 = vld [vmem:[%s4815_s1 + $0xa8] sm:$0xff]  ;;  %v132_v34 = vadd.f32 %v2479_v30, %v124_v24  ;;  %v133_v33 = vadd.f32 %v2484_v35, %v125_v53  ;;  %v147_v24 = vmul.f32 %v115_v18, %v115_v18 }
  0x24   :  { %5034 = vst [vmem:[#allocation40_spill] sm:$0xff] %v2493_v39  ;;  %5035 = vst [vmem:[#allocation41_spill] sm:$0xff] %v2498_v32  ;;  %v2507_v49 = vld [vmem:[%s4815_s1 + $0xb0] sm:$0xff]  ;;  %v2512_v41 = vld [vmem:[%s4815_s1 + $0xb8] sm:$0xff]  ;;  %v134_v20 = vadd.f32 %v2493_v39, %v126_v54  ;;  %v135_v27 = vadd.f32 %v2498_v32, %v127_v48  ;;  %v148_v30 = vmul.f32 %v116_v22, %v116_v22 }
  0x25   :  { %5036 = vst [vmem:[#allocation42_spill] sm:$0xff] %v2507_v49  ;;  %v136_v47 = vadd.f32 %v2507_v49, %v128_v55  ;;  %v137_v6 = vadd.f32 %v2512_v41, %v129_v56  ;;  %v149_v53 = vmul.f32 %v117_v28, %v117_v28  ;;  %v150_v35 = vmul.f32 %v118_v37, %v118_v37 }
  0x26   :  { %v151_v54 = vmul.f32 %v119_v38, %v119_v38  ;;  %v144_v39 = vmul.f32 %v104_v58, %v104_v58  ;;  %v152_v48 = vmul.f32 %v120_v40, %v120_v40  ;;  %v154_v32 = vadd.f32 %v146_v29, %v138_v60 }
  0x27   :  { %v155_v63 = vadd.f32 %v147_v24, %v139_v61  ;;  %v153_v36 = vmul.f32 %v121_v50, %v121_v50  ;;  %v156_v26 = vadd.f32 %v148_v30, %v140_v46  ;;  %v157_v55 = vadd.f32 %v149_v53, %v141_v45 }
  0x28   :  { %v158_v49 = vadd.f32 %v150_v35, %v142_v62  ;;  %v159_v56 = vadd.f32 %v151_v54, %v143_v52  ;;  %v162_v42 = vmul.f32 %v130_v57, %v130_v57  ;;  %v163_v43 = vmul.f32 %v131_v23, %v131_v23 }
  0x29   :  { %v164_v44 = vmul.f32 %v132_v34, %v132_v34  ;;  %v165_v51 = vmul.f32 %v133_v33, %v133_v33  ;;  %v166_v13 = vmul.f32 %v134_v20, %v134_v20  ;;  %v167_v18 = vmul.f32 %v135_v27, %v135_v27 }
  0x2a   :  { %v160_v22 = vadd.f32 %v152_v48, %v144_v39  ;;  %v168_v28 = vmul.f32 %v136_v47, %v136_v47  ;;  %v170_v37 = vadd.f32 %v162_v42, %v154_v32  ;;  %v171_v58 = vadd.f32 %v163_v43, %v155_v63 }
  0x2b   :  { %v161_v40 = vadd.f32 %v153_v36, %v145_v31  ;;  %v169_v29 = vmul.f32 %v137_v6, %v137_v6  ;;  %v172_v38 = vadd.f32 %v164_v44, %v156_v26  ;;  %v2528_v59 = vadd.f32 %v165_v51, %v157_v55 }
  0x2c   :  { %v2530_v46 = vadd.f32 %v166_v13, %v158_v49  ;;  %1883 = vrsqrt.f32 %v170_v37  ;;  %v2532_v50 = vadd.f32 %v167_v18, %v159_v56  ;;  %v2534_v23 = vadd.f32 %v168_v28, %v160_v22 }
  0x2d   :  { %1885 = vrsqrt.f32 %v171_v58  ;;  %v2536_v20 = vadd.f32 %v169_v29, %v161_v40  ;;  %v2542_v26 = vstv %s77_s22  ;;  %vm180_vm0 = vcmp.eq.f32.partialorder %v170_v37, inf  ;;  %s4299_s22 = sld [smem:[#allocation2 + $0xc]] }
  0x2e   :  { %1887 = vrsqrt.f32 %v172_v38  ;;  %vm182_vm1 = vcmp.eq.f32.partialorder %v170_v37, 0.0  ;;  %v183_v27 = vand.u32 2147483648, %v170_v37  ;;  %vm187_vm2 = vcmp.eq.f32.partialorder %v171_v58, inf }
  0x2f   :  { %1889 = vrsqrt.f32 %v2528_v59  ;;  %vm189_vm3 = vcmp.eq.f32.partialorder %v171_v58, 0.0  ;;  %v190_v32 = vand.u32 2147483648, %v171_v58  ;;  %vm194_vm4 = vcmp.eq.f32.partialorder %v172_v38, inf }
  0x30   :  { %1891 = vrsqrt.f32 %v2530_v46  ;;  %vm196_vm5 = vcmp.eq.f32.partialorder %v172_v38, 0.0  ;;  %v197_v33 = vand.u32 2147483648, %v172_v38  ;;  %vm201_vm6 = vcmp.eq.f32.partialorder %v2528_v59, inf }
  0x31   :  { %1893 = vrsqrt.f32 %v2532_v50  ;;  %vm203_vm7 = vcmp.eq.f32.partialorder %v2528_v59, 0.0  ;;  %v204_v39 = vand.u32 2147483648, %v2528_v59  ;;  %vm208_vm8 = vcmp.eq.f32.partialorder %v2530_v46, inf }
  0x32   :  { %1895 = vrsqrt.f32 %v2534_v23  ;;  %vm210_vm9 = vcmp.eq.f32.partialorder %v2530_v46, 0.0  ;;  %v211_v47 = vand.u32 2147483648, %v2530_v46  ;;  %vm215_vm10 = vcmp.eq.f32.partialorder %v2532_v50, inf }
  0x33   :  { %1897 = vrsqrt.f32 %v2536_v20  ;;  %vm217_vm11 = vcmp.eq.f32.partialorder %v2532_v50, 0.0  ;;  %v218_v62 = vand.u32 2147483648, %v2532_v50  ;;  %vm222_vm12 = vcmp.eq.f32.partialorder %v2534_v23, inf }
  0x34   :  { %vm224_vm13 = vcmp.eq.f32.partialorder %v2534_v23, 0.0  ;;  %v225_v30 = vand.u32 2147483648, %v2534_v23  ;;  %vm229_vm14 = vcmp.eq.f32.partialorder %v2536_v20, inf  ;;  %vm231_vm15 = vcmp.eq.f32.partialorder %v2536_v20, 0.0 }
  0x35   :  { %v232_v54 = vand.u32 2147483648, %v2536_v20 }
  0x36   :  { %v1884_v34 = vpop.eup %1883 }
  0x37   :  { %v1886_v49 = vpop.eup %1885  ;;  %v179_v57 = vmul.f32 %v1884_v34, %v170_v37 }
  0x38   :  { %v1888_v63 = vpop.eup %1887  ;;  %v186_v6 = vmul.f32 %v1886_v49, %v171_v58 }
  0x39   :  { %v1890_v35 = vpop.eup %1889  ;;  %v181_v60 = vsel %vm180_vm0, %v170_v37, %v179_v57  ;;  %v193_v61 = vmul.f32 %v1888_v63, %v172_v38 }
  0x3a   :  { %v1892_v45 = vpop.eup %1891  ;;  %v184_v52 = vsel %vm182_vm1, %v183_v27, %v181_v60  ;;  %v188_v24 = vsel %vm187_vm2, %v171_v58, %v186_v6  ;;  %v200_v53 = vmul.f32 %v1890_v35, %v2528_v59 }
  0x3b   :  { %v1894_v48 = vpop.eup %1893  ;;  %v191_v31 = vsel %vm189_vm3, %v190_v32, %v188_v24  ;;  %v195_v36 = vsel %vm194_vm4, %v172_v38, %v193_v61  ;;  %v207_v55 = vmul.f32 %v1892_v45, %v2530_v46  ;;  %v2568_v56 = vsub.f32 %v184_v52, %v2542_v26 }
  0x3c   :  { %v1896_v42 = vpop.eup %1895  ;;  %v198_v43 = vsel %vm196_vm5, %v197_v33, %v195_v36  ;;  %v202_v44 = vsel %vm201_vm6, %v2528_v59, %v200_v53  ;;  %v214_v51 = vmul.f32 %v1894_v48, %v2532_v50  ;;  %v2576_v13 = vsub.f32 %v191_v31, %v2542_v26 }
  0x3d   :  { %v1898_v18 = vpop.eup %1897  ;;  %v205_v22 = vsel %vm203_vm7, %v204_v39, %v202_v44  ;;  %v209_v28 = vsel %vm208_vm8, %v2530_v46, %v207_v55  ;;  %v221_v37 = vmul.f32 %v1896_v42, %v2534_v23  ;;  %v2585_v58 = vsub.f32 %v198_v43, %v2542_v26  ;;  %v5037_v42 = vld [vmem:[#allocation18_spill] sm:$0xff]  ;;  %v5038_v44 = vld [vmem:[#allocation19_spill] sm:$0xff] }
  0x3e   :  { %v212_v40 = vsel %vm210_vm9, %v211_v47, %v209_v28  ;;  %v216_v29 = vsel %vm215_vm10, %v2532_v50, %v214_v51  ;;  %v228_v38 = vmul.f32 %v1898_v18, %v2536_v20  ;;  %v2594_v59 = vsub.f32 %v205_v22, %v2542_v26  ;;  %v5039_v18 = vld [vmem:[#allocation13_spill] sm:$0xff] }
  0x3f   :  { %v219_v27 = vsel %vm217_vm11, %v218_v62, %v216_v29  ;;  %v223_v32 = vsel %vm222_vm12, %v2534_v23, %v221_v37  ;;  %v2602_v33 = vsub.f32 %v212_v40, %v2542_v26  ;;  %v251_v46 = vmul.f32 %v2239_v0, %v2568_v56  ;;  %v5040_v28 = vld [vmem:[#allocation21_spill] sm:$0xff]  ;;  %v5041_v40 = vld [vmem:[#allocation22_spill] sm:$0xff] }
  0x40   :  { %v226_v34 = vsel %vm224_vm13, %v225_v30, %v223_v32  ;;  %v230_v39 = vsel %vm229_vm14, %v2536_v20, %v228_v38  ;;  %v2612_v50 = vsub.f32 %v219_v27, %v2542_v26  ;;  %v252_v47 = vmul.f32 %v2244_v1, %v2576_v13  ;;  %v5042_v38 = vld [vmem:[#allocation15_spill] sm:$0xff]  ;;  %v5043_v32 = vld [vmem:[#allocation16_spill] sm:$0xff] }
  0x41   :  { %v233_v49 = vsel %vm231_vm15, %v232_v54, %v230_v39  ;;  %v2619_v57 = vsub.f32 %v226_v34, %v2542_v26  ;;  %v253_v23 = vmul.f32 %v2249_v2, %v2585_v58  ;;  %v254_v62 = vmul.f32 %v2264_v5, %v2594_v59  ;;  %v5044_v34 = vld [vmem:[#allocation20_spill] sm:$0xff] }
  0x42   :  { %v2626_v63 = vsub.f32 %v233_v49, %v2542_v26  ;;  %v255_v6 = vmul.f32 %v2285_v10, %v2602_v33  ;;  %v256_v30 = vmul.f32 %v2290_v11, %v2612_v50  ;;  %v259_v35 = vadd.f32 %v251_v46, %v2254_v3 }
  0x43   :  { %v257_v20 = vmul.f32 %v2295_v12, %v2619_v57  ;;  %v260_v60 = vadd.f32 %v252_v47, %v2259_v4  ;;  %v261_v45 = vadd.f32 %v253_v23, %v2270_v7  ;;  %v262_v52 = vadd.f32 %v254_v62, %v2275_v8  ;;  %v5045_v47 = vld [vmem:[#allocation23_spill] sm:$0xff]  ;;  %v5046_v23 = vld [vmem:[#allocation24_spill] sm:$0xff] }
  0x44   :  { %v258_v61 = vmul.f32 %v2306_v15, %v2626_v63  ;;  %v267_v24 = vmul.f32 %v2311_v16, %v2568_v56  ;;  %v263_v53 = vadd.f32 %v255_v6, %v2280_v9  ;;  %v268_v54 = vmul.f32 %v2316_v17, %v2576_v13  ;;  %v5047_v6 = vld [vmem:[#allocation25_spill] sm:$0xff]  ;;  %v5062_v17 = vld [vmem:[#allocation40_spill] sm:$0xff] }
  0x45   :  { %v269_v48 = vmul.f32 %v2332_v21, %v2585_v58  ;;  %v270_v31 = vmul.f32 %v2348_v25, %v2594_v59  ;;  %v264_v36 = vadd.f32 %v256_v30, %v2301_v14  ;;  %v265_v55 = vadd.f32 %v257_v20, %v2322_v19  ;;  %v5048_v20 = vld [vmem:[#allocation28_spill] sm:$0xff]  ;;  %v5059_v19 = vld [vmem:[#allocation37_spill] sm:$0xff]  ;;  %v5060_v14 = vld [vmem:[#allocation38_spill] sm:$0xff] }
  0x46   :  { %v271_v43 = vmul.f32 %v5037_v42, %v2602_v33  ;;  %v272_v51 = vmul.f32 %v5038_v44, %v2612_v50  ;;  %v266_v22 = vadd.f32 %v258_v61, %v5039_v18  ;;  %v273_v37 = vmul.f32 %v5040_v28, %v2619_v57  ;;  %v5049_v28 = vld [vmem:[#allocation29_spill] sm:$0xff] }
  0x47   :  { %v274_v29 = vmul.f32 %v5041_v40, %v2626_v63  ;;  %v275_v27 = vadd.f32 %v5042_v38, %v267_v24  ;;  %v276_v46 = vadd.f32 %v5043_v32, %v268_v54  ;;  %v277_v39 = vadd.f32 %v5044_v34, %v269_v48  ;;  %v5050_v40 = vld [vmem:[#allocation30_spill] sm:$0xff]  ;;  %v5051_v24 = vld [vmem:[#allocation31_spill] sm:$0xff]  ;;  %v5052_v48 = vld [vmem:[#allocation32_spill] sm:$0xff] }
  0x48   :  { %v278_v49 = vadd.f32 %v5045_v47, %v270_v31  ;;  %v279_v62 = vadd.f32 %v5046_v23, %v271_v43  ;;  %v280_v30 = vadd.f32 %v5047_v6, %v272_v51  ;;  %v283_v61 = vmul.f32 %v5048_v20, %v2568_v56  ;;  %v5053_v31 = vld [vmem:[#allocation33_spill] sm:$0xff]  ;;  %v5054_v51 = vld [vmem:[#allocation35_spill] sm:$0xff]  ;;  %v5055_v23 = vld [vmem:[#allocation26_spill] sm:$0xff] }
  0x49   :  { %v284_v18 = vmul.f32 %v5049_v28, %v2576_v13  ;;  %v285_v44 = vmul.f32 %v5050_v40, %v2585_v58  ;;  %v286_v54 = vmul.f32 %v5051_v24, %v2594_v59  ;;  %v287_v34 = vmul.f32 %v5052_v48, %v2602_v33  ;;  %v5056_v47 = vld [vmem:[#allocation27_spill] sm:$0xff]  ;;  %v5057_v28 = vld [vmem:[#allocation36_spill] sm:$0xff]  ;;  %v5058_v40 = vld [vmem:[#allocation34_spill] sm:$0xff] }
  0x4a   :  { %v288_v43 = vmul.f32 %v5053_v31, %v2612_v50  ;;  %v289_v6 = vmul.f32 %v5054_v51, %v2619_v57  ;;  %v281_v20 = vadd.f32 %v5055_v23, %v273_v37  ;;  %v282_v32 = vadd.f32 %v5056_v47, %v274_v29  ;;  %v5061_v48 = vld [vmem:[#allocation39_spill] sm:$0xff]  ;;  %v5063_v9 = vld [vmem:[#allocation41_spill] sm:$0xff]  ;;  %v5064_v23 = vld [vmem:[#allocation42_spill] sm:$0xff] }
  0x4b   :  { %v290_v38 = vmul.f32 %v5057_v28, %v2626_v63  ;;  %v291_v42 = vadd.f32 %v5058_v40, %v283_v61  ;;  %v292_v24 = vadd.f32 %v5059_v19, %v284_v18  ;;  %v293_v25 = vadd.f32 %v5060_v14, %v285_v44 }
  0x4c   :  { %v294_v21 = vadd.f32 %v5061_v48, %v286_v54  ;;  %v295_v31 = vadd.f32 %v5062_v17, %v287_v34  ;;  %v296_v16 = vadd.f32 %v5063_v9, %v288_v43  ;;  %v299_v51 = vmul.f32 %v259_v35, %v259_v35 }
  0x4d   :  { %v300_v8 = vmul.f32 %v260_v60, %v260_v60  ;;  %v301_v37 = vmul.f32 %v261_v45, %v261_v45  ;;  %v297_v29 = vadd.f32 %v5064_v23, %v289_v6  ;;  %v302_v47 = vmul.f32 %v262_v52, %v262_v52 }
  0x4e   :  { %v303_v7 = vmul.f32 %v263_v53, %v263_v53  ;;  %v304_v28 = vmul.f32 %v264_v36, %v264_v36  ;;  %v305_v15 = vmul.f32 %v265_v55, %v265_v55  ;;  %v307_v61 = vmul.f32 %v275_v27, %v275_v27 }
  0x4f   :  { %v308_v40 = vmul.f32 %v276_v46, %v276_v46  ;;  %v309_v18 = vmul.f32 %v277_v39, %v277_v39  ;;  %v310_v19 = vmul.f32 %v278_v49, %v278_v49  ;;  %v311_v44 = vmul.f32 %v279_v62, %v279_v62 }
  0x50   :  { %v312_v14 = vmul.f32 %v280_v30, %v280_v30  ;;  %v313_v54 = vmul.f32 %v281_v20, %v281_v20  ;;  %v298_v34 = vadd.f32 %v2512_v41, %v290_v38  ;;  %v315_v17 = vadd.f32 %v307_v61, %v299_v51 }
  0x51   :  { %v316_v43 = vadd.f32 %v308_v40, %v300_v8  ;;  %v317_v35 = vadd.f32 %v309_v18, %v301_v37  ;;  %v306_v60 = vmul.f32 %v266_v22, %v266_v22  ;;  %v314_v45 = vmul.f32 %v282_v32, %v282_v32 }
  0x52   :  { %v318_v9 = vadd.f32 %v310_v19, %v302_v47  ;;  %v319_v6 = vadd.f32 %v311_v44, %v303_v7  ;;  %v320_v52 = vadd.f32 %v312_v14, %v304_v28  ;;  %v323_v53 = vmul.f32 %v291_v42, %v291_v42 }
  0x53   :  { %v324_v36 = vmul.f32 %v292_v24, %v292_v24  ;;  %v325_v55 = vmul.f32 %v293_v25, %v293_v25  ;;  %v321_v27 = vadd.f32 %v313_v54, %v305_v15  ;;  %v326_v46 = vmul.f32 %v294_v21, %v294_v21 }
  0x54   :  { %v327_v39 = vmul.f32 %v295_v31, %v295_v31  ;;  %v328_v49 = vmul.f32 %v296_v16, %v296_v16  ;;  %v329_v62 = vmul.f32 %v297_v29, %v297_v29  ;;  %v331_v30 = vadd.f32 %v323_v53, %v315_v17 }
  0x55   :  { %v332_v20 = vadd.f32 %v324_v36, %v316_v43  ;;  %v333_v23 = vadd.f32 %v325_v55, %v317_v35  ;;  %v322_v38 = vadd.f32 %v314_v45, %v306_v60  ;;  %v330_v51 = vmul.f32 %v298_v34, %v298_v34 }
  0x56   :  { %v334_v8 = vadd.f32 %v326_v46, %v318_v9  ;;  %v2692_v40 = vadd.f32 %v327_v39, %v319_v6  ;;  %1899 = vrsqrt.f32 %v331_v30  ;;  %v2694_v19 = vadd.f32 %v328_v49, %v320_v52 }
  0x57   :  { %1901 = vrsqrt.f32 %v332_v20  ;;  %v2696_v7 = vadd.f32 %v329_v62, %v321_v27  ;;  %v2698_v14 = vadd.f32 %v330_v51, %v322_v38  ;;  %vm341_vm0 = vcmp.eq.f32.partialorder %v331_v30, inf }
  0x58   :  { %1903 = vrsqrt.f32 %v333_v23  ;;  %vm343_vm1 = vcmp.eq.f32.partialorder %v331_v30, 0.0  ;;  %v344_v9 = vand.u32 2147483648, %v331_v30  ;;  %vm348_vm2 = vcmp.eq.f32.partialorder %v332_v20, inf }
  0x59   :  { %1905 = vrsqrt.f32 %v334_v8  ;;  %vm350_vm3 = vcmp.eq.f32.partialorder %v332_v20, 0.0  ;;  %v351_v15 = vand.u32 2147483648, %v332_v20  ;;  %vm355_vm4 = vcmp.eq.f32.partialorder %v333_v23, inf }
  0x5a   :  { %1907 = vrsqrt.f32 %v2692_v40  ;;  %vm357_vm5 = vcmp.eq.f32.partialorder %v333_v23, 0.0  ;;  %v358_v16 = vand.u32 2147483648, %v333_v23  ;;  %vm362_vm6 = vcmp.eq.f32.partialorder %v334_v8, inf }
  0x5b   :  { %1909 = vrsqrt.f32 %v2694_v19  ;;  %vm364_vm7 = vcmp.eq.f32.partialorder %v334_v8, 0.0  ;;  %v365_v21 = vand.u32 2147483648, %v334_v8  ;;  %vm369_vm8 = vcmp.eq.f32.partialorder %v2692_v40, inf }
  0x5c   :  { %1911 = vrsqrt.f32 %v2696_v7  ;;  %vm371_vm9 = vcmp.eq.f32.partialorder %v2692_v40, 0.0  ;;  %v372_v25 = vand.u32 2147483648, %v2692_v40  ;;  %vm376_vm10 = vcmp.eq.f32.partialorder %v2694_v19, inf }
  0x5d   :  { %1913 = vrsqrt.f32 %v2698_v14  ;;  %vm378_vm11 = vcmp.eq.f32.partialorder %v2694_v19, 0.0  ;;  %v379_v28 = vand.u32 2147483648, %v2694_v19  ;;  %vm383_vm12 = vcmp.eq.f32.partialorder %v2696_v7, inf }
  0x5e   :  { %vm385_vm13 = vcmp.eq.f32.partialorder %v2696_v7, 0.0  ;;  %v386_v24 = vand.u32 2147483648, %v2696_v7  ;;  %vm390_vm14 = vcmp.eq.f32.partialorder %v2698_v14, inf  ;;  %vm392_vm15 = vcmp.eq.f32.partialorder %v2698_v14, 0.0 }
  0x5f   :  { %v393_v34 = vand.u32 2147483648, %v2698_v14 }
  0x60   :  { %v1900_v17 = vpop.eup %1899 }
  0x61   :  { %v1902_v42 = vpop.eup %1901  ;;  %v340_v22 = vmul.f32 %v1900_v17, %v331_v30 }
  0x62   :  { %v1904_v32 = vpop.eup %1903  ;;  %v347_v47 = vmul.f32 %v1902_v42, %v332_v20 }
  0x63   :  { %v1906_v31 = vpop.eup %1905  ;;  %v342_v37 = vsel %vm341_vm0, %v331_v30, %v340_v22  ;;  %v354_v29 = vmul.f32 %v1904_v32, %v333_v23 }
  0x64   :  { %v1908_v61 = vpop.eup %1907  ;;  %v345_v18 = vsel %vm343_vm1, %v344_v9, %v342_v37  ;;  %v349_v44 = vsel %vm348_vm2, %v332_v20, %v347_v47  ;;  %v361_v54 = vmul.f32 %v1906_v31, %v334_v8 }
  0x65   :  { %v1910_v43 = vpop.eup %1909  ;;  %v352_v35 = vsel %vm350_vm3, %v351_v15, %v349_v44  ;;  %v356_v60 = vsel %vm355_vm4, %v333_v23, %v354_v29  ;;  %v368_v45 = vmul.f32 %v1908_v61, %v2692_v40  ;;  %v395_v6 = vsub.f32 %v345_v18, %v2542_v26  ;;  %v5068_v61 = vld [vmem:[#allocation10_spill] sm:$0xff]  ;;  %v5069_v18 = vld [vmem:[#allocation7_spill] sm:$0xff] }
  0x66   :  { %v1912_v52 = vpop.eup %1911  ;;  %v359_v53 = vsel %vm357_vm5, %v358_v16, %v356_v60  ;;  %v363_v36 = vsel %vm362_vm6, %v334_v8, %v361_v54  ;;  %v375_v55 = vmul.f32 %v1910_v43, %v2694_v19  ;;  %v396_v27 = vsub.f32 %v352_v35, %v2542_v26  ;;  %v5073_v43 = vld [vmem:[#allocation8_spill] sm:$0xff] }
  0x67   :  { %v1914_v46 = vpop.eup %1913  ;;  %v366_v39 = vsel %vm364_vm7, %v365_v21, %v363_v36  ;;  %v370_v49 = vsel %vm369_vm8, %v2692_v40, %v368_v45  ;;  %v382_v62 = vmul.f32 %v1912_v52, %v2696_v7  ;;  %v397_v30 = vsub.f32 %v359_v53, %v2542_v26  ;;  %v5074_v60 = vld [vmem:[#allocation12_spill] sm:$0xff]  ;;  %v5076_v53 = vld [vmem:[#allocation19_spill] sm:$0xff] }
  0x68   :  { %v373_v23 = vsel %vm371_vm9, %v372_v25, %v370_v49  ;;  %v377_v20 = vsel %vm376_vm10, %v2694_v19, %v375_v55  ;;  %v389_v38 = vmul.f32 %v1914_v46, %v2698_v14  ;;  %v398_v51 = vsub.f32 %v366_v39, %v2542_v26  ;;  %v5077_v55 = vld [vmem:[#allocation13_spill] sm:$0xff]  ;;  %v5079_v49 = vld [vmem:[#allocation22_spill] sm:$0xff] }
  0x69   :  { %v380_v8 = vsel %vm378_vm11, %v379_v28, %v377_v20  ;;  %v384_v9 = vsel %vm383_vm12, %v2696_v7, %v382_v62  ;;  %v399_v15 = vsub.f32 %v373_v23, %v2542_v26  ;;  %v2747_v40 = vadd.f32 %v395_v6, %v2568_v56  ;;  %v5075_v6 = vld [vmem:[#allocation18_spill] sm:$0xff]  ;;  %v5078_v46 = vld [vmem:[#allocation21_spill] sm:$0xff]  ;;  %v5081_v20 = vld [vmem:[#allocation16_spill] sm:$0xff] }
  0x6a   :  { %v387_v16 = vsel %vm385_vm13, %v386_v24, %v384_v9  ;;  %v391_v17 = vsel %vm390_vm14, %v2698_v14, %v389_v38  ;;  %v400_v21 = vsub.f32 %v380_v8, %v2542_v26  ;;  %v2756_v19 = vadd.f32 %v396_v27, %v2576_v13  ;;  %v5083_v9 = vld [vmem:[#allocation23_spill] sm:$0xff] }
  0x6b   :  { %v394_v25 = vsel %vm392_vm15, %v393_v34, %v391_v17  ;;  %v401_v42 = vsub.f32 %v387_v16, %v2542_v26  ;;  %v2762_v56 = vadd.f32 %v397_v30, %v2585_v58  ;;  %v2765_v7 = vadd.f32 %v398_v51, %v2594_v59  ;;  %v5080_v30 = vld [vmem:[#allocation15_spill] sm:$0xff]  ;;  %v5082_v51 = vld [vmem:[#allocation20_spill] sm:$0xff] }
  0x6c   :  { %v402_v22 = vsub.f32 %v394_v25, %v2542_v26  ;;  %v2769_v28 = vadd.f32 %v399_v15, %v2602_v33  ;;  %v2772_v32 = vadd.f32 %v400_v21, %v2612_v50  ;;  %v411_v13 = vmul.f32 %v2239_v0, %v2747_v40  ;;  %v5084_v16 = vld [vmem:[#allocation24_spill] sm:$0xff]  ;;  %v5085_v21 = vld [vmem:[#allocation25_spill] sm:$0xff] }
  0x6d   :  { %v2777_v14 = vadd.f32 %v401_v42, %v2619_v57  ;;  %v412_v58 = vmul.f32 %v2244_v1, %v2756_v19  ;;  %v413_v59 = vmul.f32 %v2249_v2, %v2762_v56  ;;  %v414_v47 = vmul.f32 %v2264_v5, %v2765_v7  ;;  %v5065_v2 = vld [vmem:[#allocation9_spill] sm:$0xff]  ;;  %v5086_v42 = vld [vmem:[#allocation28_spill] sm:$0xff] }
  0x6e   :  { %v2786_v33 = vadd.f32 %v402_v22, %v2626_v63  ;;  %v415_v50 = vmul.f32 %v2285_v10, %v2769_v28  ;;  %v416_v0 = vmul.f32 %v2290_v11, %v2772_v32  ;;  %v419_v1 = vadd.f32 %v411_v13, %v2254_v3  ;;  %v5066_v5 = vld [vmem:[#allocation5_spill] sm:$0xff]  ;;  %v5067_v63 = vld [vmem:[#allocation6_spill] sm:$0xff]  ;;  %v5070_v11 = vld [vmem:[#allocation11_spill] sm:$0xff] }
  0x6f   :  { %v417_v57 = vmul.f32 %v2295_v12, %v2777_v14  ;;  %v420_v24 = vadd.f32 %v412_v58, %v2259_v4  ;;  %v421_v37 = vadd.f32 %v413_v59, %v5066_v5  ;;  %v422_v29 = vadd.f32 %v414_v47, %v5067_v63  ;;  %v5071_v12 = vld [vmem:[#allocation14_spill] sm:$0xff]  ;;  %v5072_v4 = vld [vmem:[#allocation17_spill] sm:$0xff]  ;;  %v5092_v63 = vld [vmem:[#allocation35_spill] sm:$0xff] }
  0x70   :  { %v418_v31 = vmul.f32 %v5065_v2, %v2786_v33  ;;  %v427_v10 = vmul.f32 %v5068_v61, %v2747_v40  ;;  %v423_v44 = vadd.f32 %v415_v50, %v5069_v18  ;;  %v428_v54 = vmul.f32 %v5070_v11, %v2756_v19  ;;  %v5087_v13 = vld [vmem:[#allocation29_spill] sm:$0xff]  ;;  %v5088_v59 = vld [vmem:[#allocation30_spill] sm:$0xff]  ;;  %v5089_v50 = vld [vmem:[#allocation31_spill] sm:$0xff] }
  0x71   :  { %v429_v3 = vmul.f32 %v5071_v12, %v2762_v56  ;;  %v430_v34 = vmul.f32 %v5072_v4, %v2765_v7  ;;  %v424_v35 = vadd.f32 %v416_v0, %v5073_v43  ;;  %v425_v45 = vadd.f32 %v417_v57, %v5074_v60  ;;  %v5090_v57 = vld [vmem:[#allocation32_spill] sm:$0xff]  ;;  %v5094_v11 = vld [vmem:[#allocation27_spill] sm:$0xff]  ;;  %v5096_v4 = vld [vmem:[#allocation34_spill] sm:$0xff] }
  0x72   :  { %v431_v52 = vmul.f32 %v5075_v6, %v2769_v28  ;;  %v432_v36 = vmul.f32 %v5076_v53, %v2772_v32  ;;  %v426_v27 = vadd.f32 %v418_v31, %v5077_v55  ;;  %v433_v39 = vmul.f32 %v5078_v46, %v2777_v14  ;;  %v5091_v31 = vld [vmem:[#allocation33_spill] sm:$0xff]  ;;  %v5095_v12 = vld [vmem:[#allocation36_spill] sm:$0xff]  ;;  %v5098_v6 = vld [vmem:[#allocation38_spill] sm:$0xff] }
  0x73   :  { %v434_v62 = vmul.f32 %v5079_v49, %v2786_v33  ;;  %v435_v23 = vadd.f32 %v5080_v30, %v427_v10  ;;  %v436_v38 = vadd.f32 %v5081_v20, %v428_v54  ;;  %v437_v8 = vadd.f32 %v5082_v51, %v429_v3  ;;  %v5093_v10 = vld [vmem:[#allocation26_spill] sm:$0xff]  ;;  %v5097_v43 = vld [vmem:[#allocation37_spill] sm:$0xff] }
  0x74   :  { %v438_v15 = vadd.f32 %v5083_v9, %v430_v34  ;;  %v439_v17 = vadd.f32 %v5084_v16, %v431_v52  ;;  %v440_v25 = vadd.f32 %v5085_v21, %v432_v36  ;;  %v443_v22 = vmul.f32 %v5086_v42, %v2747_v40  ;;  %v5099_v36 = vld [vmem:[#allocation40_spill] sm:$0xff]  ;;  %v5100_v46 = vld [vmem:[#allocation41_spill] sm:$0xff]  ;;  %v5101_v51 = vld [vmem:[#allocation42_spill] sm:$0xff] }
  0x75   :  { %v444_v58 = vmul.f32 %v5087_v13, %v2756_v19  ;;  %v445_v47 = vmul.f32 %v5088_v59, %v2762_v56  ;;  %v446_v0 = vmul.f32 %v5089_v50, %v2765_v7  ;;  %v447_v2 = vmul.f32 %v5090_v57, %v2769_v28 }
  0x76   :  { %v448_v5 = vmul.f32 %v5091_v31, %v2772_v32  ;;  %v449_v61 = vmul.f32 %v5092_v63, %v2777_v14  ;;  %v441_v18 = vadd.f32 %v5093_v10, %v433_v39  ;;  %v442_v54 = vadd.f32 %v5094_v11, %v434_v62 }
  0x77   :  { %v450_v3 = vmul.f32 %v5095_v12, %v2786_v33  ;;  %v451_v34 = vadd.f32 %v5096_v4, %v443_v22  ;;  %v452_v60 = vadd.f32 %v5097_v43, %v444_v58  ;;  %v453_v52 = vadd.f32 %v5098_v6, %v445_v47 }
  0x78   :  { %v454_v53 = vadd.f32 %v5061_v48, %v446_v0  ;;  %v455_v55 = vadd.f32 %v5099_v36, %v447_v2  ;;  %v456_v49 = vadd.f32 %v5100_v46, %v448_v5  ;;  %v459_v30 = vmul.f32 %v419_v1, %v419_v1 }
  0x79   :  { %v460_v20 = vmul.f32 %v420_v24, %v420_v24  ;;  %v461_v39 = vmul.f32 %v421_v37, %v421_v37  ;;  %v457_v62 = vadd.f32 %v5101_v51, %v449_v61  ;;  %v462_v9 = vmul.f32 %v422_v29, %v422_v29 }
  0x7a   :  { %v463_v16 = vmul.f32 %v423_v44, %v423_v44  ;;  %v464_v21 = vmul.f32 %v424_v35, %v424_v35  ;;  %v465_v42 = vmul.f32 %v425_v45, %v425_v45  ;;  %v467_v22 = vmul.f32 %v435_v23, %v435_v23 }
  0x7b   :  { %v468_v13 = vmul.f32 %v436_v38, %v436_v38  ;;  %v469_v58 = vmul.f32 %v437_v8, %v437_v8  ;;  %v470_v59 = vmul.f32 %v438_v15, %v438_v15  ;;  %v471_v47 = vmul.f32 %v439_v17, %v439_v17 }
  0x7c   :  { %v472_v50 = vmul.f32 %v440_v25, %v440_v25  ;;  %v473_v48 = vmul.f32 %v441_v18, %v441_v18  ;;  %v458_v0 = vadd.f32 %v2512_v41, %v450_v3  ;;  %v475_v57 = vadd.f32 %v467_v22, %v459_v30 }
  0x7d   :  { %v476_v2 = vadd.f32 %v468_v13, %v460_v20  ;;  %v477_v1 = vadd.f32 %v469_v58, %v461_v39  ;;  %v466_v24 = vmul.f32 %v426_v27, %v426_v27  ;;  %v474_v37 = vmul.f32 %v442_v54, %v442_v54 }
  0x7e   :  { %v478_v31 = vadd.f32 %v470_v59, %v462_v9  ;;  %v479_v5 = vadd.f32 %v471_v47, %v463_v16  ;;  %v480_v29 = vadd.f32 %v472_v50, %v464_v21  ;;  %v483_v44 = vmul.f32 %v451_v34, %v451_v34 }
  0x7f   :  { %v484_v35 = vmul.f32 %v452_v60, %v452_v60  ;;  %v485_v45 = vmul.f32 %v453_v52, %v453_v52  ;;  %v481_v23 = vadd.f32 %v473_v48, %v465_v42  ;;  %v486_v38 = vmul.f32 %v454_v53, %v454_v53 }
  0x80   :  { %v487_v8 = vmul.f32 %v455_v55, %v455_v55  ;;  %v488_v15 = vmul.f32 %v456_v49, %v456_v49  ;;  %v489_v17 = vmul.f32 %v457_v62, %v457_v62  ;;  %v491_v25 = vadd.f32 %v483_v44, %v475_v57 }
  0x81   :  { %v492_v63 = vadd.f32 %v484_v35, %v476_v2  ;;  %v493_v61 = vadd.f32 %v485_v45, %v477_v1  ;;  %v482_v41 = vadd.f32 %v474_v37, %v466_v24  ;;  %v490_v10 = vmul.f32 %v458_v0, %v458_v0 }
  0x82   :  { %v494_v18 = vadd.f32 %v486_v38, %v478_v31  ;;  %v2852_v11 = vadd.f32 %v487_v8, %v479_v5  ;;  %1915 = vrsqrt.f32 %v491_v25  ;;  %v2854_v27 = vadd.f32 %v488_v15, %v480_v29 }
  0x83   :  { %1917 = vrsqrt.f32 %v492_v63  ;;  %v2856_v54 = vadd.f32 %v489_v17, %v481_v23  ;;  %v2858_v12 = vadd.f32 %v490_v10, %v482_v41  ;;  %vm501_vm0 = vcmp.eq.f32.partialorder %v491_v25, inf }
  0x84   :  { %1919 = vrsqrt.f32 %v493_v61  ;;  %vm503_vm1 = vcmp.eq.f32.partialorder %v491_v25, 0.0  ;;  %v504_v3 = vand.u32 2147483648, %v491_v25  ;;  %vm508_vm2 = vcmp.eq.f32.partialorder %v492_v63, inf }
  0x85   :  { %1921 = vrsqrt.f32 %v494_v18  ;;  %vm510_vm3 = vcmp.eq.f32.partialorder %v492_v63, 0.0  ;;  %v511_v4 = vand.u32 2147483648, %v492_v63  ;;  %vm515_vm4 = vcmp.eq.f32.partialorder %v493_v61, inf }
  0x86   :  { %1923 = vrsqrt.f32 %v2852_v11  ;;  %vm517_vm5 = vcmp.eq.f32.partialorder %v493_v61, 0.0  ;;  %v518_v34 = vand.u32 2147483648, %v493_v61  ;;  %vm522_vm6 = vcmp.eq.f32.partialorder %v494_v18, inf }
  0x87   :  { %1925 = vrsqrt.f32 %v2854_v27  ;;  %vm524_vm7 = vcmp.eq.f32.partialorder %v494_v18, 0.0  ;;  %v525_v60 = vand.u32 2147483648, %v494_v18  ;;  %vm529_vm8 = vcmp.eq.f32.partialorder %v2852_v11, inf }
  0x88   :  { %1927 = vrsqrt.f32 %v2856_v54  ;;  %vm531_vm9 = vcmp.eq.f32.partialorder %v2852_v11, 0.0  ;;  %v532_v6 = vand.u32 2147483648, %v2852_v11  ;;  %vm536_vm10 = vcmp.eq.f32.partialorder %v2854_v27, inf }
  0x89   :  { %1929 = vrsqrt.f32 %v2858_v12  ;;  %vm538_vm11 = vcmp.eq.f32.partialorder %v2854_v27, 0.0  ;;  %v539_v36 = vand.u32 2147483648, %v2854_v27  ;;  %vm543_vm12 = vcmp.eq.f32.partialorder %v2856_v54, inf }
  0x8a   :  { %vm545_vm13 = vcmp.eq.f32.partialorder %v2856_v54, 0.0  ;;  %v546_v49 = vand.u32 2147483648, %v2856_v54  ;;  %vm550_vm14 = vcmp.eq.f32.partialorder %v2858_v12, inf  ;;  %vm552_vm15 = vcmp.eq.f32.partialorder %v2858_v12, 0.0 }
  0x8b   :  { %v553_v21 = vand.u32 2147483648, %v2858_v12 }
  0x8c   :  { %v1916_v43 = vpop.eup %1915 }
  0x8d   :  { %v1918_v52 = vpop.eup %1917  ;;  %v500_v53 = vmul.f32 %v1916_v43, %v491_v25 }
  0x8e   :  { %v1920_v55 = vpop.eup %1919  ;;  %v507_v46 = vmul.f32 %v1918_v52, %v492_v63 }
  0x8f   :  { %v1922_v30 = vpop.eup %1921  ;;  %v502_v20 = vsel %vm501_vm0, %v491_v25, %v500_v53  ;;  %v514_v39 = vmul.f32 %v1920_v55, %v493_v61  ;;  %v2992_v53 = vld [vmem:[%s4815_s1] sm:$0xff]  ;;  %v3000_v55 = vld [vmem:[%s4815_s1 + $0x8] sm:$0xff] }
  0x90   :  { %v1924_v51 = vpop.eup %1923  ;;  %v505_v62 = vsel %vm503_vm1, %v504_v3, %v502_v20  ;;  %v509_v9 = vsel %vm508_vm2, %v492_v63, %v507_v46  ;;  %v521_v16 = vmul.f32 %v1922_v30, %v494_v18  ;;  %v3015_v20 = vld [vmem:[%s4815_s1 + $0x10] sm:$0xff] }
  0x91   :  { %v1926_v42 = vpop.eup %1925  ;;  %v512_v22 = vsel %vm510_vm3, %v511_v4, %v509_v9  ;;  %v516_v13 = vsel %vm515_vm4, %v493_v61, %v514_v39  ;;  %v528_v58 = vmul.f32 %v1924_v51, %v2852_v11  ;;  %v555_v59 = vsub.f32 %v505_v62, %v2542_v26  ;;  %5103 = vst [vmem:[#allocation9_spill] sm:$0xff] %v3015_v20  ;;  %v3023_v51 = vld [vmem:[%s4815_s1 + $0x18] sm:$0xff]  ;;  %v3031_v9 = vld [vmem:[%s4815_s1 + $0x100] sm:$0xff] }
  0x92   :  { %v1928_v47 = vpop.eup %1927  ;;  %v519_v50 = vsel %vm517_vm5, %v518_v34, %v516_v13  ;;  %v523_v48 = vsel %vm522_vm6, %v494_v18, %v521_v16  ;;  %v535_v0 = vmul.f32 %v1926_v42, %v2854_v27  ;;  %v556_v57 = vsub.f32 %v512_v22, %v2542_v26  ;;  %v2971_v34 = vld [vmem:[%s4815_s1 + $0xe0] sm:$0xff]  ;;  %5104 = vst [vmem:[#allocation5_spill] sm:$0xff] %v3023_v51  ;;  %v3046_v22 = vld [vmem:[%s4815_s1 + $0x108] sm:$0xff] }
  0x93   :  { %v1930_v2 = vpop.eup %1929  ;;  %v526_v1 = vsel %vm524_vm7, %v525_v60, %v523_v48  ;;  %v530_v24 = vsel %vm529_vm8, %v2852_v11, %v528_v58  ;;  %v542_v37 = vmul.f32 %v1928_v47, %v2856_v54  ;;  %v557_v31 = vsub.f32 %v519_v50, %v2542_v26  ;;  %v2978_v60 = vld [vmem:[%s4815_s1 + $0xe8] sm:$0xff]  ;;  %5105 = vst [vmem:[#allocation6_spill] sm:$0xff] %v3031_v9  ;;  %v3053_v58 = vld [vmem:[%s4815_s1 + $0x110] sm:$0xff]  ;;  %v3060_v47 = vld [vmem:[%s4815_s1 + $0x118] sm:$0xff] }
  0x94   :  { %v533_v5 = vsel %vm531_vm9, %v532_v6, %v530_v24  ;;  %v537_v29 = vsel %vm536_vm10, %v2854_v27, %v535_v0  ;;  %v549_v44 = vmul.f32 %v1930_v2, %v2858_v12  ;;  %v558_v35 = vsub.f32 %v526_v1, %v2542_v26  ;;  %5107 = vst [vmem:[#allocation7_spill] sm:$0xff] %v3046_v22  ;;  %v3067_v48 = vld [vmem:[%s4815_s1 + $0x28] sm:$0xff]  ;;  %v3083_v1 = vld [vmem:[%s4815_s1 + $0x120] sm:$0xff] }
  0x95   :  { %v540_v45 = vsel %vm538_vm11, %v539_v36, %v537_v29  ;;  %v544_v23 = vsel %vm543_vm12, %v2856_v54, %v542_v37  ;;  %v559_v38 = vsub.f32 %v533_v5, %v2542_v26  ;;  %v2907_v8 = vadd.f32 %v555_v59, %v2747_v40  ;;  %5108 = vst [vmem:[#allocation11_spill] sm:$0xff] %v3053_v58  ;;  %v3090_v37 = vld [vmem:[%s4815_s1 + $0x128] sm:$0xff]  ;;  %v3097_v5 = vld [vmem:[%s4815_s1 + $0x38] sm:$0xff] }
  0x96   :  { %v547_v15 = vsel %vm545_vm13, %v546_v49, %v544_v23  ;;  %v551_v17 = vsel %vm550_vm14, %v2858_v12, %v549_v44  ;;  %v560_v25 = vsub.f32 %v540_v45, %v2542_v26  ;;  %v2916_v63 = vadd.f32 %v556_v57, %v2756_v19  ;;  %v2937_v19 = vld [vmem:[%s4815_s1 + $0xc0] sm:$0xff]  ;;  %v3008_v49 = vld [vmem:[%s4815_s1 + $0xf8] sm:$0xff]  ;;  %5109 = vst [vmem:[#allocation14_spill] sm:$0xff] %v3060_v47  ;;  %v3075_v57 = vld [vmem:[%s4815_s1 + $0x30] sm:$0xff] }
  0x97   :  { %v554_v61 = vsel %vm552_vm15, %v553_v21, %v551_v17  ;;  %v561_v41 = vsub.f32 %v547_v15, %v2542_v26  ;;  %v2922_v40 = vadd.f32 %v557_v31, %v2762_v56  ;;  %v2925_v10 = vadd.f32 %v558_v35, %v2765_v7  ;;  %v2947_v7 = vld [vmem:[%s4815_s1 + $0xc8] sm:$0xff]  ;;  %5102 = vst [vmem:[#allocation39_spill] sm:$0xff] %v3008_v49  ;;  %v3038_v21 = vld [vmem:[%s4815_s1 + $0x20] sm:$0xff]  ;;  %v3105_v44 = vld [vmem:[%s4815_s1 + $0x130] sm:$0xff] }
  0x98   :  { %v562_v18 = vsub.f32 %v554_v61, %v2542_v26  ;;  %v2929_v11 = vadd.f32 %v559_v38, %v2769_v28  ;;  %v2932_v27 = vadd.f32 %v560_v25, %v2772_v32  ;;  %v571_v56 = vmul.f32 %v2937_v19, %v2907_v8  ;;  %v2954_v32 = vld [vmem:[%s4815_s1 + $0xd0] sm:$0xff]  ;;  %5106 = vst [vmem:[#allocation10_spill] sm:$0xff] %v3038_v21  ;;  %v3112_v45 = vld [vmem:[%s4815_s1 + $0x138] sm:$0xff]  ;;  %v3119_v38 = vld [vmem:[%s4815_s1 + $0x40] sm:$0xff] }
  0x99   :  { %v2942_v54 = vadd.f32 %v561_v41, %v2777_v14  ;;  %v572_v28 = vmul.f32 %v2947_v7, %v2916_v63  ;;  %v573_v12 = vmul.f32 %v2954_v32, %v2922_v40  ;;  %v2961_v14 = vld [vmem:[%s4815_s1 + $0xd8] sm:$0xff]  ;;  %v587_v16 = vmul.f32 %v3031_v9, %v2907_v8  ;;  %5110 = vst [vmem:[#allocation17_spill] sm:$0xff] %v3067_v48  ;;  %v3125_v17 = vld [vmem:[%s4815_s1 + $0x48] sm:$0xff]  ;;  %v3131_v61 = vld [vmem:[%s4815_s1 + $0x50] sm:$0xff] }
  0x9a   :  { %v574_v3 = vmul.f32 %v2961_v14, %v2925_v10  ;;  %v2966_v4 = vadd.f32 %v562_v18, %v2786_v33  ;;  %v575_v43 = vmul.f32 %v2971_v34, %v2929_v11  ;;  %v576_v6 = vmul.f32 %v2978_v60, %v2932_v27  ;;  %v2985_v33 = vld [vmem:[%s4815_s1 + $0xf0] sm:$0xff]  ;;  %5111 = vst [vmem:[#allocation8_spill] sm:$0xff] %v3075_v57  ;;  %v3137_v18 = vld [vmem:[%s4815_s1 + $0x58] sm:$0xff] }
  0x9b   :  { %v577_v52 = vmul.f32 %v2985_v33, %v2942_v54  ;;  %v2995_v36 = vadd.f32 %v2992_v53, %v571_v56  ;;  %v3003_v46 = vadd.f32 %v3000_v55, %v572_v28  ;;  %v3018_v39 = vadd.f32 %v3015_v20, %v573_v12  ;;  %5112 = vst [vmem:[#allocation12_spill] sm:$0xff] %v3083_v1  ;;  %v3143_v28 = vld [vmem:[%s4815_s1 + $0x60] sm:$0xff] }
  0x9c   :  { %v578_v30 = vmul.f32 %v3008_v49, %v2966_v4  ;;  %v3026_v62 = vadd.f32 %v3023_v51, %v574_v3  ;;  %v3041_v42 = vadd.f32 %v3038_v21, %v575_v43  ;;  %v588_v13 = vmul.f32 %v3046_v22, %v2916_v63  ;;  %5113 = vst [vmem:[#allocation18_spill] sm:$0xff] %v3090_v37  ;;  %v3149_v3 = vld [vmem:[%s4815_s1 + $0x68] sm:$0xff] }
  0x9d   :  { %v589_v59 = vmul.f32 %v3053_v58, %v2922_v40  ;;  %v590_v50 = vmul.f32 %v3060_v47, %v2925_v10  ;;  %v3070_v0 = vadd.f32 %v3067_v48, %v576_v6  ;;  %v3078_v2 = vadd.f32 %v3075_v57, %v577_v52  ;;  %5114 = vst [vmem:[#allocation19_spill] sm:$0xff] %v3097_v5  ;;  %v3155_v6 = vld [vmem:[%s4815_s1 + $0x140] sm:$0xff] }
  0x9e   :  { %v591_v24 = vmul.f32 %v3083_v1, %v2929_v11  ;;  %v592_v31 = vmul.f32 %v3090_v37, %v2932_v27  ;;  %v3100_v29 = vadd.f32 %v3097_v5, %v578_v30  ;;  %5115 = vst [vmem:[#allocation13_spill] sm:$0xff] %v3105_v44  ;;  %v593_v35 = vmul.f32 %v3105_v44, %v2942_v54  ;;  %v3162_v30 = vld [vmem:[%s4815_s1 + $0x148] sm:$0xff] }
  0x9f   :  { %5116 = vst [vmem:[#allocation21_spill] sm:$0xff] %v3112_v45  ;;  %v594_v23 = vmul.f32 %v3112_v45, %v2966_v4  ;;  %5117 = vst [vmem:[#allocation22_spill] sm:$0xff] %v3119_v38  ;;  %v595_v15 = vadd.f32 %v3119_v38, %v587_v16  ;;  %v596_v25 = vadd.f32 %v3125_v17, %v588_v13  ;;  %v3169_v13 = vld [vmem:[%s4815_s1 + $0x150] sm:$0xff]  ;;  %v3241_v38 = vld [vmem:[%s4815_s1 + $0x98] sm:$0xff] }
  0xa0   :  { %5118 = vst [vmem:[#allocation15_spill] sm:$0xff] %v3125_v17  ;;  %5119 = vst [vmem:[#allocation16_spill] sm:$0xff] %v3131_v61  ;;  %v597_v41 = vadd.f32 %v3131_v61, %v589_v59  ;;  %v598_v56 = vadd.f32 %v3137_v18, %v590_v50  ;;  %v599_v12 = vadd.f32 %v3143_v28, %v591_v24  ;;  %v3176_v50 = vld [vmem:[%s4815_s1 + $0x158] sm:$0xff]  ;;  %v3223_v17 = vld [vmem:[%s4815_s1 + $0x80] sm:$0xff] }
  0xa1   :  { %5120 = vst [vmem:[#allocation20_spill] sm:$0xff] %v3137_v18  ;;  %5121 = vst [vmem:[#allocation23_spill] sm:$0xff] %v3143_v28  ;;  %v600_v43 = vadd.f32 %v3149_v3, %v592_v31  ;;  %v603_v52 = vmul.f32 %v3155_v6, %v2907_v8  ;;  %v604_v16 = vmul.f32 %v3162_v30, %v2916_v63  ;;  %v3183_v31 = vld [vmem:[%s4815_s1 + $0x160] sm:$0xff]  ;;  %v3210_v18 = vld [vmem:[%s4815_s1 + $0x78] sm:$0xff] }
  0xa2   :  { %5122 = vst [vmem:[#allocation24_spill] sm:$0xff] %v3149_v3  ;;  %5123 = vst [vmem:[#allocation25_spill] sm:$0xff] %v3155_v6  ;;  %v605_v59 = vmul.f32 %v3169_v13, %v2922_v40  ;;  %v606_v24 = vmul.f32 %v3176_v50, %v2925_v10  ;;  %v3216_v61 = vld [vmem:[%s4815_s1 + $0x178] sm:$0xff]  ;;  %v622_v45 = vmul.f32 %v3026_v62, %v3026_v62 }
  0xa3   :  { %5124 = vst [vmem:[#allocation28_spill] sm:$0xff] %v3162_v30  ;;  %5125 = vst [vmem:[#allocation29_spill] sm:$0xff] %v3169_v13  ;;  %v607_v30 = vmul.f32 %v3183_v31, %v2929_v11  ;;  %v3190_v13 = vld [vmem:[%s4815_s1 + $0x168] sm:$0xff]  ;;  %v629_v44 = vmul.f32 %v597_v41, %v597_v41  ;;  %v630_v5 = vmul.f32 %v598_v56, %v598_v56  ;;  %v3279_v62 = vld [vmem:[%s4815_s1 + $0xb8] sm:$0xff] }
  0xa4   :  { %5126 = vst [vmem:[#allocation30_spill] sm:$0xff] %v3176_v50  ;;  %5127 = vst [vmem:[#allocation31_spill] sm:$0xff] %v3183_v31  ;;  %v608_v6 = vmul.f32 %v3190_v13, %v2932_v27  ;;  %v3197_v50 = vld [vmem:[%s4815_s1 + $0x170] sm:$0xff]  ;;  %v631_v37 = vmul.f32 %v599_v12, %v599_v12  ;;  %v632_v1 = vmul.f32 %v600_v43, %v600_v43 }
  0xa5   :  { %5128 = vst [vmem:[#allocation32_spill] sm:$0xff] %v3190_v13  ;;  %5129 = vst [vmem:[#allocation33_spill] sm:$0xff] %v3197_v50  ;;  %v609_v3 = vmul.f32 %v3197_v50, %v2942_v54  ;;  %v3204_v31 = vld [vmem:[%s4815_s1 + $0x70] sm:$0xff]  ;;  %v602_v13 = vadd.f32 %v3210_v18, %v594_v23  ;;  %v610_v50 = vmul.f32 %v3216_v61, %v2966_v4 }
  0xa6   :  { %5130 = vst [vmem:[#allocation35_spill] sm:$0xff] %v3204_v31  ;;  %v601_v28 = vadd.f32 %v3204_v31, %v593_v35  ;;  %5131 = vst [vmem:[#allocation26_spill] sm:$0xff] %v3210_v18  ;;  %v611_v35 = vadd.f32 %v3223_v17, %v603_v52  ;;  %v3229_v31 = vld [vmem:[%s4815_s1 + $0x88] sm:$0xff]  ;;  %v3235_v18 = vld [vmem:[%s4815_s1 + $0x90] sm:$0xff]  ;;  %v614_v52 = vadd.f32 %v3241_v38, %v606_v24 }
  0xa7   :  { %5132 = vst [vmem:[#allocation27_spill] sm:$0xff] %v3216_v61  ;;  %5133 = vst [vmem:[#allocation36_spill] sm:$0xff] %v3223_v17  ;;  %v612_v23 = vadd.f32 %v3229_v31, %v604_v16  ;;  %v613_v61 = vadd.f32 %v3235_v18, %v605_v59  ;;  %v3247_v17 = vld [vmem:[%s4815_s1 + $0xa0] sm:$0xff]  ;;  %v620_v24 = vmul.f32 %v3003_v46, %v3003_v46 }
  0xa8   :  { %5134 = vst [vmem:[#allocation34_spill] sm:$0xff] %v3229_v31  ;;  %5135 = vst [vmem:[#allocation37_spill] sm:$0xff] %v3235_v18  ;;  %v615_v16 = vadd.f32 %v3247_v17, %v607_v30  ;;  %v3253_v31 = vld [vmem:[%s4815_s1 + $0xa8] sm:$0xff]  ;;  %v619_v18 = vmul.f32 %v2995_v36, %v2995_v36  ;;  %v3265_v30 = vld [vmem:[%s4815_s1 + $0xb0] sm:$0xff]  ;;  %v624_v36 = vmul.f32 %v3070_v0, %v3070_v0 }
  0xa9   :  { %5136 = vst [vmem:[#allocation38_spill] sm:$0xff] %v3241_v38  ;;  %5137 = vst [vmem:[#allocation40_spill] sm:$0xff] %v3247_v17  ;;  %v616_v59 = vadd.f32 %v3253_v31, %v608_v6  ;;  %v621_v38 = vmul.f32 %v3018_v39, %v3018_v39  ;;  %v617_v17 = vadd.f32 %v3265_v30, %v609_v3 }
  0xaa   :  { %5138 = vst [vmem:[#allocation41_spill] sm:$0xff] %v3253_v31  ;;  %5139 = vst [vmem:[#allocation42_spill] sm:$0xff] %v3265_v30  ;;  %v623_v6 = vmul.f32 %v3041_v42, %v3041_v42  ;;  %v625_v46 = vmul.f32 %v3078_v2, %v3078_v2  ;;  %v627_v39 = vmul.f32 %v595_v15, %v595_v15 }
  0xab   :  { %v628_v31 = vmul.f32 %v596_v25, %v596_v25  ;;  %v633_v57 = vmul.f32 %v601_v28, %v601_v28  ;;  %v618_v42 = vadd.f32 %v3279_v62, %v610_v50  ;;  %v637_v0 = vadd.f32 %v629_v44, %v621_v38 }
  0xac   :  { %v635_v3 = vadd.f32 %v627_v39, %v619_v18  ;;  %v626_v2 = vmul.f32 %v3100_v29, %v3100_v29  ;;  %v634_v15 = vmul.f32 %v602_v13, %v602_v13  ;;  %v638_v25 = vadd.f32 %v630_v5, %v622_v45 }
  0xad   :  { %v636_v30 = vadd.f32 %v628_v31, %v620_v24  ;;  %v639_v41 = vadd.f32 %v631_v37, %v623_v6  ;;  %v640_v56 = vadd.f32 %v632_v1, %v624_v36  ;;  %v643_v12 = vmul.f32 %v611_v35, %v611_v35 }
  0xae   :  { %v644_v43 = vmul.f32 %v612_v23, %v612_v23  ;;  %v645_v28 = vmul.f32 %v613_v61, %v613_v61  ;;  %v641_v48 = vadd.f32 %v633_v57, %v625_v46  ;;  %v646_v47 = vmul.f32 %v614_v52, %v614_v52 }
  0xaf   :  { %v647_v58 = vmul.f32 %v615_v16, %v615_v16  ;;  %v648_v22 = vmul.f32 %v616_v59, %v616_v59  ;;  %v649_v21 = vmul.f32 %v617_v17, %v617_v17  ;;  %v651_v9 = vadd.f32 %v643_v12, %v635_v3 }
  0xb0   :  { %v652_v50 = vadd.f32 %v644_v43, %v636_v30  ;;  %v653_v18 = vadd.f32 %v645_v28, %v637_v0  ;;  %v642_v31 = vadd.f32 %v634_v15, %v626_v2  ;;  %v650_v44 = vmul.f32 %v618_v42, %v618_v42 }
  0xb1   :  { %v654_v38 = vadd.f32 %v646_v47, %v638_v25  ;;  %v3284_v24 = vadd.f32 %v647_v58, %v639_v41  ;;  %1931 = vrsqrt.f32 %v651_v9  ;;  %v3286_v5 = vadd.f32 %v648_v22, %v640_v56 }
  0xb2   :  { %1933 = vrsqrt.f32 %v652_v50  ;;  %v3288_v1 = vadd.f32 %v649_v21, %v641_v48  ;;  %v3290_v57 = vadd.f32 %v650_v44, %v642_v31  ;;  %vm661_vm0 = vcmp.eq.f32.partialorder %v651_v9, inf }
  0xb3   :  { %1935 = vrsqrt.f32 %v653_v18  ;;  %vm663_vm1 = vcmp.eq.f32.partialorder %v651_v9, 0.0  ;;  %v664_v58 = vand.u32 2147483648, %v651_v9  ;;  %vm668_vm2 = vcmp.eq.f32.partialorder %v652_v50, inf }
  0xb4   :  { %1937 = vrsqrt.f32 %v654_v38  ;;  %vm670_vm3 = vcmp.eq.f32.partialorder %v652_v50, 0.0  ;;  %v671_v22 = vand.u32 2147483648, %v652_v50  ;;  %vm675_vm4 = vcmp.eq.f32.partialorder %v653_v18, inf }
  0xb5   :  { %1939 = vrsqrt.f32 %v3284_v24  ;;  %vm677_vm5 = vcmp.eq.f32.partialorder %v653_v18, 0.0  ;;  %v678_v21 = vand.u32 2147483648, %v653_v18  ;;  %vm682_vm6 = vcmp.eq.f32.partialorder %v654_v38, inf }
  0xb6   :  { %1941 = vrsqrt.f32 %v3286_v5  ;;  %vm684_vm7 = vcmp.eq.f32.partialorder %v654_v38, 0.0  ;;  %v685_v48 = vand.u32 2147483648, %v654_v38  ;;  %vm689_vm8 = vcmp.eq.f32.partialorder %v3284_v24, inf }
  0xb7   :  { %1943 = vrsqrt.f32 %v3288_v1  ;;  %vm691_vm9 = vcmp.eq.f32.partialorder %v3284_v24, 0.0  ;;  %v692_v37 = vand.u32 2147483648, %v3284_v24  ;;  %vm696_vm10 = vcmp.eq.f32.partialorder %v3286_v5, inf }
  0xb8   :  { %1945 = vrsqrt.f32 %v3290_v57  ;;  %vm698_vm11 = vcmp.eq.f32.partialorder %v3286_v5, 0.0  ;;  %v699_v17 = vand.u32 2147483648, %v3286_v5  ;;  %vm703_vm12 = vcmp.eq.f32.partialorder %v3288_v1, inf }
  0xb9   :  { %vm705_vm13 = vcmp.eq.f32.partialorder %v3288_v1, 0.0  ;;  %v706_v35 = vand.u32 2147483648, %v3288_v1  ;;  %vm710_vm14 = vcmp.eq.f32.partialorder %v3290_v57, inf  ;;  %vm712_vm15 = vcmp.eq.f32.partialorder %v3290_v57, 0.0 }
  0xba   :  { %v713_v46 = vand.u32 2147483648, %v3290_v57 }
  0xbb   :  { %v1932_v47 = vpop.eup %1931 }
  0xbc   :  { %v1934_v29 = vpop.eup %1933  ;;  %v660_v45 = vmul.f32 %v1932_v47, %v651_v9 }
  0xbd   :  { %v1936_v61 = vpop.eup %1935  ;;  %v667_v13 = vmul.f32 %v1934_v29, %v652_v50 }
  0xbe   :  { %v1938_v23 = vpop.eup %1937  ;;  %v662_v52 = vsel %vm661_vm0, %v651_v9, %v660_v45  ;;  %v674_v16 = vmul.f32 %v1936_v61, %v653_v18 }
  0xbf   :  { %v1940_v59 = vpop.eup %1939  ;;  %v665_v30 = vsel %vm663_vm1, %v664_v58, %v662_v52  ;;  %v669_v6 = vsel %vm668_vm2, %v652_v50, %v667_v13  ;;  %v681_v36 = vmul.f32 %v1938_v23, %v654_v38 }
  0xc0   :  { %v1942_v39 = vpop.eup %1941  ;;  %v672_v42 = vsel %vm670_vm3, %v671_v22, %v669_v6  ;;  %v676_v3 = vsel %vm675_vm4, %v653_v18, %v674_v16  ;;  %v688_v0 = vmul.f32 %v1940_v59, %v3284_v24  ;;  %v715_v2 = vsub.f32 %v665_v30, %v2542_v26 }
  0xc1   :  { %v1944_v15 = vpop.eup %1943  ;;  %v679_v25 = vsel %vm677_vm5, %v678_v21, %v676_v3  ;;  %v683_v9 = vsel %vm682_vm6, %v654_v38, %v681_v36  ;;  %v695_v41 = vmul.f32 %v1942_v39, %v3286_v5  ;;  %v716_v56 = vsub.f32 %v672_v42, %v2542_v26  ;;  %v5140_v36 = vld [vmem:[#allocation6_spill] sm:$0xff]  ;;  %v5142_v3 = vld [vmem:[#allocation7_spill] sm:$0xff] }
  0xc2   :  { %v1946_v12 = vpop.eup %1945  ;;  %v686_v43 = vsel %vm684_vm7, %v685_v48, %v683_v9  ;;  %v690_v28 = vsel %vm689_vm8, %v3284_v24, %v688_v0  ;;  %v702_v50 = vmul.f32 %v1944_v15, %v3288_v1  ;;  %v717_v31 = vsub.f32 %v679_v25, %v2542_v26  ;;  %v5141_v39 = vld [vmem:[#allocation10_spill] sm:$0xff] }
  0xc3   :  { %v693_v18 = vsel %vm691_vm9, %v692_v37, %v690_v28  ;;  %v697_v44 = vsel %vm696_vm10, %v3286_v5, %v695_v41  ;;  %v709_v58 = vmul.f32 %v1946_v12, %v3290_v57  ;;  %v718_v38 = vsub.f32 %v686_v43, %v2542_v26  ;;  %v5144_v25 = vld [vmem:[#allocation14_spill] sm:$0xff]  ;;  %v5145_v41 = vld [vmem:[#allocation17_spill] sm:$0xff]  ;;  %v5146_v12 = vld [vmem:[#allocation8_spill] sm:$0xff] }
  0xc4   :  { %v700_v22 = vsel %vm698_vm11, %v699_v17, %v697_v44  ;;  %v704_v21 = vsel %vm703_vm12, %v3288_v1, %v702_v50  ;;  %v719_v47 = vsub.f32 %v693_v18, %v2542_v26  ;;  %v3339_v24 = vadd.f32 %v715_v2, %v2907_v8  ;;  %v5143_v2 = vld [vmem:[#allocation11_spill] sm:$0xff]  ;;  %v5147_v28 = vld [vmem:[#allocation12_spill] sm:$0xff] }
  0xc5   :  { %v707_v48 = vsel %vm705_vm13, %v706_v35, %v704_v21  ;;  %v711_v37 = vsel %vm710_vm14, %v3290_v57, %v709_v58  ;;  %v720_v29 = vsub.f32 %v700_v22, %v2542_v26  ;;  %v3348_v5 = vadd.f32 %v716_v56, %v2916_v63  ;;  %v5149_v44 = vld [vmem:[#allocation19_spill] sm:$0xff]  ;;  %v5151_v21 = vld [vmem:[#allocation21_spill] sm:$0xff] }
  0xc6   :  { %v714_v45 = vsel %vm712_vm15, %v713_v46, %v711_v37  ;;  %v721_v17 = vsub.f32 %v707_v48, %v2542_v26  ;;  %v3354_v8 = vadd.f32 %v717_v31, %v2922_v40  ;;  %v3357_v1 = vadd.f32 %v718_v38, %v2925_v10  ;;  %v5148_v31 = vld [vmem:[#allocation18_spill] sm:$0xff]  ;;  %v5150_v38 = vld [vmem:[#allocation13_spill] sm:$0xff] }
  0xc7   :  { %v722_v61 = vsub.f32 %v714_v45, %v2542_v26  ;;  %v3361_v13 = vadd.f32 %v719_v47, %v2929_v11  ;;  %v3364_v35 = vadd.f32 %v720_v29, %v2932_v27  ;;  %v731_v63 = vmul.f32 %v2937_v19, %v3339_v24  ;;  %v5152_v48 = vld [vmem:[#allocation22_spill] sm:$0xff]  ;;  %v5153_v29 = vld [vmem:[#allocation15_spill] sm:$0xff] }
  0xc8   :  { %v3369_v57 = vadd.f32 %v721_v17, %v2942_v54  ;;  %v732_v40 = vmul.f32 %v2947_v7, %v3348_v5  ;;  %v733_v10 = vmul.f32 %v2954_v32, %v3354_v8  ;;  %v734_v23 = vmul.f32 %v2961_v14, %v3357_v1  ;;  %v5154_v17 = vld [vmem:[#allocation16_spill] sm:$0xff] }
  0xc9   :  { %v3378_v11 = vadd.f32 %v722_v61, %v2966_v4  ;;  %v735_v27 = vmul.f32 %v2971_v34, %v3361_v13  ;;  %v736_v52 = vmul.f32 %v2978_v60, %v3364_v35  ;;  %v739_v16 = vadd.f32 %v2992_v53, %v731_v63  ;;  %v5155_v63 = vld [vmem:[#allocation20_spill] sm:$0xff] }
  0xca   :  { %v737_v54 = vmul.f32 %v2985_v33, %v3369_v57  ;;  %v740_v59 = vadd.f32 %v3000_v55, %v732_v40  ;;  %v741_v6 = vadd.f32 %v3015_v20, %v733_v10  ;;  %v742_v4 = vadd.f32 %v3023_v51, %v734_v23  ;;  %v5156_v10 = vld [vmem:[#allocation23_spill] sm:$0xff] }
  0xcb   :  { %v738_v30 = vmul.f32 %v3008_v49, %v3378_v11  ;;  %v747_v46 = vmul.f32 %v5140_v36, %v3339_v24  ;;  %v743_v42 = vadd.f32 %v5141_v39, %v735_v27  ;;  %v748_v0 = vmul.f32 %v5142_v3, %v3348_v5  ;;  %v5157_v27 = vld [vmem:[#allocation24_spill] sm:$0xff]  ;;  %v5173_v39 = vld [vmem:[#allocation41_spill] sm:$0xff] }
  0xcc   :  { %v749_v15 = vmul.f32 %v5143_v2, %v3354_v8  ;;  %v750_v9 = vmul.f32 %v5144_v25, %v3357_v1  ;;  %v744_v56 = vadd.f32 %v5145_v41, %v736_v52  ;;  %v745_v43 = vadd.f32 %v5146_v12, %v737_v54  ;;  %v5158_v54 = vld [vmem:[#allocation25_spill] sm:$0xff]  ;;  %v5169_v12 = vld [vmem:[#allocation34_spill] sm:$0xff]  ;;  %v5172_v3 = vld [vmem:[#allocation40_spill] sm:$0xff] }
  0xcd   :  { %v751_v50 = vmul.f32 %v5147_v28, %v3361_v13  ;;  %v752_v18 = vmul.f32 %v5148_v31, %v3364_v35  ;;  %v746_v58 = vadd.f32 %v5149_v44, %v738_v30  ;;  %v753_v22 = vmul.f32 %v5150_v38, %v3369_v57  ;;  %v5159_v38 = vld [vmem:[#allocation28_spill] sm:$0xff]  ;;  %v5170_v41 = vld [vmem:[#allocation37_spill] sm:$0xff] }
  0xce   :  { %v754_v47 = vmul.f32 %v5151_v21, %v3378_v11  ;;  %v755_v37 = vadd.f32 %v5152_v48, %v747_v46  ;;  %v756_v45 = vadd.f32 %v5153_v29, %v748_v0  ;;  %v757_v61 = vadd.f32 %v5154_v17, %v749_v15  ;;  %v5160_v21 = vld [vmem:[#allocation29_spill] sm:$0xff]  ;;  %v5161_v46 = vld [vmem:[#allocation30_spill] sm:$0xff]  ;;  %v5162_v15 = vld [vmem:[#allocation31_spill] sm:$0xff] }
  0xcf   :  { %v758_v40 = vadd.f32 %v5155_v63, %v750_v9  ;;  %v759_v23 = vadd.f32 %v5156_v10, %v751_v50  ;;  %v760_v52 = vadd.f32 %v5157_v27, %v752_v18  ;;  %v763_v30 = vmul.f32 %v5158_v54, %v3339_v24  ;;  %v5163_v9 = vld [vmem:[#allocation32_spill] sm:$0xff]  ;;  %v5164_v18 = vld [vmem:[#allocation33_spill] sm:$0xff]  ;;  %v5165_v10 = vld [vmem:[#allocation35_spill] sm:$0xff] }
  0xd0   :  { %v764_v44 = vmul.f32 %v5159_v38, %v3348_v5  ;;  %v765_v31 = vmul.f32 %v5160_v21, %v3354_v8  ;;  %v766_v0 = vmul.f32 %v5161_v46, %v3357_v1  ;;  %v767_v17 = vmul.f32 %v5162_v15, %v3361_v13  ;;  %v5166_v63 = vld [vmem:[#allocation26_spill] sm:$0xff]  ;;  %v5167_v38 = vld [vmem:[#allocation27_spill] sm:$0xff]  ;;  %v5168_v21 = vld [vmem:[#allocation36_spill] sm:$0xff] }
  0xd1   :  { %v768_v50 = vmul.f32 %v5163_v9, %v3364_v35  ;;  %v769_v27 = vmul.f32 %v5164_v18, %v3369_v57  ;;  %v761_v54 = vadd.f32 %v5165_v10, %v753_v22  ;;  %v762_v29 = vadd.f32 %v5166_v63, %v754_v47  ;;  %v5171_v15 = vld [vmem:[#allocation38_spill] sm:$0xff] }
  0xd2   :  { %v770_v48 = vmul.f32 %v5167_v38, %v3378_v11  ;;  %v771_v28 = vadd.f32 %v5168_v21, %v763_v30  ;;  %v772_v46 = vadd.f32 %v5169_v12, %v764_v44  ;;  %v773_v25 = vadd.f32 %v5170_v41, %v765_v31  ;;  %v5174_v10 = vld [vmem:[#allocation42_spill] sm:$0xff] }
  0xd3   :  { %v774_v2 = vadd.f32 %v5171_v15, %v766_v0  ;;  %v775_v9 = vadd.f32 %v5172_v3, %v767_v17  ;;  %v776_v36 = vadd.f32 %v5173_v39, %v768_v50  ;;  %v779_v18 = vmul.f32 %v739_v16, %v739_v16 }
  0xd4   :  { %v780_v51 = vmul.f32 %v740_v59, %v740_v59  ;;  %v781_v22 = vmul.f32 %v741_v6, %v741_v6  ;;  %v777_v47 = vadd.f32 %v5174_v10, %v769_v27  ;;  %v782_v63 = vmul.f32 %v742_v4, %v742_v4 }
  0xd5   :  { %v783_v20 = vmul.f32 %v743_v42, %v743_v42  ;;  %v784_v38 = vmul.f32 %v744_v56, %v744_v56  ;;  %v785_v49 = vmul.f32 %v745_v43, %v745_v43  ;;  %v787_v30 = vmul.f32 %v755_v37, %v755_v37 }
  0xd6   :  { %v788_v21 = vmul.f32 %v756_v45, %v756_v45  ;;  %v789_v44 = vmul.f32 %v757_v61, %v757_v61  ;;  %v790_v12 = vmul.f32 %v758_v40, %v758_v40  ;;  %v791_v31 = vmul.f32 %v759_v23, %v759_v23 }
  0xd7   :  { %v792_v41 = vmul.f32 %v760_v52, %v760_v52  ;;  %v793_v0 = vmul.f32 %v761_v54, %v761_v54  ;;  %v778_v17 = vadd.f32 %v3279_v62, %v770_v48  ;;  %v795_v3 = vadd.f32 %v787_v30, %v779_v18 }
  0xd8   :  { %v796_v50 = vadd.f32 %v788_v21, %v780_v51  ;;  %v797_v16 = vadd.f32 %v789_v44, %v781_v22  ;;  %v786_v59 = vmul.f32 %v746_v58, %v746_v58  ;;  %v794_v6 = vmul.f32 %v762_v29, %v762_v29 }
  0xd9   :  { %v798_v39 = vadd.f32 %v790_v12, %v782_v63  ;;  %v799_v27 = vadd.f32 %v791_v31, %v783_v20  ;;  %v800_v4 = vadd.f32 %v792_v41, %v784_v38  ;;  %v803_v42 = vmul.f32 %v771_v28, %v771_v28 }
  0xda   :  { %v804_v56 = vmul.f32 %v772_v46, %v772_v46  ;;  %v805_v43 = vmul.f32 %v773_v25, %v773_v25  ;;  %v801_v37 = vadd.f32 %v793_v0, %v785_v49  ;;  %v806_v45 = vmul.f32 %v774_v2, %v774_v2 }
  0xdb   :  { %v807_v61 = vmul.f32 %v775_v9, %v775_v9  ;;  %v808_v40 = vmul.f32 %v776_v36, %v776_v36  ;;  %v809_v23 = vmul.f32 %v777_v47, %v777_v47  ;;  %v811_v52 = vadd.f32 %v803_v42, %v795_v3 }
  0xdc   :  { %v812_v54 = vadd.f32 %v804_v56, %v796_v50  ;;  %v813_v10 = vadd.f32 %v805_v43, %v797_v16  ;;  %v802_v48 = vadd.f32 %v794_v6, %v786_v59  ;;  %v810_v18 = vmul.f32 %v778_v17, %v778_v17 }
  0xdd   :  { %v814_v51 = vadd.f32 %v806_v45, %v798_v39  ;;  %v3444_v21 = vadd.f32 %v807_v61, %v799_v27  ;;  %1947 = vrsqrt.f32 %v811_v52  ;;  %v3446_v12 = vadd.f32 %v808_v40, %v800_v4 }
  0xde   :  { %1949 = vrsqrt.f32 %v812_v54  ;;  %v3448_v20 = vadd.f32 %v809_v23, %v801_v37  ;;  %v3450_v49 = vadd.f32 %v810_v18, %v802_v48  ;;  %vm821_vm0 = vcmp.eq.f32.partialorder %v811_v52, inf }
  0xdf   :  { %1951 = vrsqrt.f32 %v813_v10  ;;  %vm823_vm1 = vcmp.eq.f32.partialorder %v811_v52, 0.0  ;;  %v824_v36 = vand.u32 2147483648, %v811_v52  ;;  %vm828_vm2 = vcmp.eq.f32.partialorder %v812_v54, inf }
  0xe0   :  { %1953 = vrsqrt.f32 %v814_v51  ;;  %vm830_vm3 = vcmp.eq.f32.partialorder %v812_v54, 0.0  ;;  %v831_v39 = vand.u32 2147483648, %v812_v54  ;;  %vm835_vm4 = vcmp.eq.f32.partialorder %v813_v10, inf }
  0xe1   :  { %1955 = vrsqrt.f32 %v3444_v21  ;;  %vm837_vm5 = vcmp.eq.f32.partialorder %v813_v10, 0.0  ;;  %v838_v3 = vand.u32 2147483648, %v813_v10  ;;  %vm842_vm6 = vcmp.eq.f32.partialorder %v814_v51, inf }
  0xe2   :  { %1957 = vrsqrt.f32 %v3446_v12  ;;  %vm844_vm7 = vcmp.eq.f32.partialorder %v814_v51, 0.0  ;;  %v845_v25 = vand.u32 2147483648, %v814_v51  ;;  %vm849_vm8 = vcmp.eq.f32.partialorder %v3444_v21, inf }
  0xe3   :  { %1959 = vrsqrt.f32 %v3448_v20  ;;  %vm851_vm9 = vcmp.eq.f32.partialorder %v3444_v21, 0.0  ;;  %v852_v41 = vand.u32 2147483648, %v3444_v21  ;;  %vm856_vm10 = vcmp.eq.f32.partialorder %v3446_v12, inf }
  0xe4   :  { %1961 = vrsqrt.f32 %v3450_v49  ;;  %vm858_vm11 = vcmp.eq.f32.partialorder %v3446_v12, 0.0  ;;  %v859_v38 = vand.u32 2147483648, %v3446_v12  ;;  %vm863_vm12 = vcmp.eq.f32.partialorder %v3448_v20, inf }
  0xe5   :  { %vm865_vm13 = vcmp.eq.f32.partialorder %v3448_v20, 0.0  ;;  %v866_v46 = vand.u32 2147483648, %v3448_v20  ;;  %vm870_vm14 = vcmp.eq.f32.partialorder %v3450_v49, inf  ;;  %vm872_vm15 = vcmp.eq.f32.partialorder %v3450_v49, 0.0 }
  0xe6   :  { %v873_v17 = vand.u32 2147483648, %v3450_v49 }
  0xe7   :  { %v1948_v2 = vpop.eup %1947 }
  0xe8   :  { %v1950_v28 = vpop.eup %1949  ;;  %v820_v58 = vmul.f32 %v1948_v2, %v811_v52 }
  0xe9   :  { %v1952_v29 = vpop.eup %1951  ;;  %v827_v63 = vmul.f32 %v1950_v28, %v812_v54 }
  0xea   :  { %v1954_v9 = vpop.eup %1953  ;;  %v822_v22 = vsel %vm821_vm0, %v811_v52, %v820_v58  ;;  %v834_v47 = vmul.f32 %v1952_v29, %v813_v10 }
  0xeb   :  { %v1956_v30 = vpop.eup %1955  ;;  %v825_v44 = vsel %vm823_vm1, %v824_v36, %v822_v22  ;;  %v829_v31 = vsel %vm828_vm2, %v812_v54, %v827_v63  ;;  %v841_v0 = vmul.f32 %v1954_v9, %v814_v51 }
  0xec   :  { %v1958_v50 = vpop.eup %1957  ;;  %v832_v16 = vsel %vm830_vm3, %v831_v39, %v829_v31  ;;  %v836_v59 = vsel %vm835_vm4, %v813_v10, %v834_v47  ;;  %v848_v6 = vmul.f32 %v1956_v30, %v3444_v21  ;;  %v875_v27 = vsub.f32 %v825_v44, %v2542_v26  ;;  %v5175_v47 = vld [vmem:[#allocation39_spill] sm:$0xff]  ;;  %v5176_v44 = vld [vmem:[#allocation9_spill] sm:$0xff] }
  0xed   :  { %v1960_v4 = vpop.eup %1959  ;;  %v839_v42 = vsel %vm837_vm5, %v838_v3, %v836_v59  ;;  %v843_v56 = vsel %vm842_vm6, %v814_v51, %v841_v0  ;;  %v855_v43 = vmul.f32 %v1958_v50, %v3446_v12  ;;  %v876_v37 = vsub.f32 %v832_v16, %v2542_v26  ;;  %v5179_v16 = vld [vmem:[#allocation10_spill] sm:$0xff] }
  0xee   :  { %v1962_v45 = vpop.eup %1961  ;;  %v846_v61 = vsel %vm844_vm7, %v845_v25, %v843_v56  ;;  %v850_v40 = vsel %vm849_vm8, %v3444_v21, %v848_v6  ;;  %v862_v23 = vmul.f32 %v1960_v4, %v3448_v20  ;;  %v877_v52 = vsub.f32 %v839_v42, %v2542_v26  ;;  %v5180_v6 = vld [vmem:[#allocation7_spill] sm:$0xff]  ;;  %v5182_v56 = vld [vmem:[#allocation14_spill] sm:$0xff] }
  0xef   :  { %v853_v10 = vsel %vm851_vm9, %v852_v41, %v850_v40  ;;  %v857_v54 = vsel %vm856_vm10, %v3446_v12, %v855_v43  ;;  %v869_v48 = vmul.f32 %v1962_v45, %v3450_v49  ;;  %v878_v18 = vsub.f32 %v846_v61, %v2542_v26  ;;  %v5181_v4 = vld [vmem:[#allocation11_spill] sm:$0xff]  ;;  %v5184_v61 = vld [vmem:[#allocation8_spill] sm:$0xff] }
  0xf0   :  { %v860_v51 = vsel %vm858_vm11, %v859_v38, %v857_v54  ;;  %v864_v36 = vsel %vm863_vm12, %v3448_v20, %v862_v23  ;;  %v879_v39 = vsub.f32 %v853_v10, %v2542_v26  ;;  %v3499_v21 = vadd.f32 %v875_v27, %v3339_v24  ;;  %v5185_v23 = vld [vmem:[#allocation12_spill] sm:$0xff]  ;;  %v5186_v10 = vld [vmem:[#allocation18_spill] sm:$0xff] }
  0xf1   :  { %v867_v3 = vsel %vm865_vm13, %v866_v46, %v864_v36  ;;  %v871_v2 = vsel %vm870_vm14, %v3450_v49, %v869_v48  ;;  %v880_v25 = vsub.f32 %v860_v51, %v2542_v26  ;;  %v3508_v12 = vadd.f32 %v876_v37, %v3348_v5  ;;  %v5183_v37 = vld [vmem:[#allocation17_spill] sm:$0xff]  ;;  %v5187_v48 = vld [vmem:[#allocation19_spill] sm:$0xff] }
  0xf2   :  { %v874_v41 = vsel %vm872_vm15, %v873_v17, %v871_v2  ;;  %v881_v28 = vsub.f32 %v867_v3, %v2542_v26  ;;  %v3514_v24 = vadd.f32 %v877_v52, %v3354_v8  ;;  %v3517_v20 = vadd.f32 %v878_v18, %v3357_v1  ;;  %v5178_v17 = vld [vmem:[#allocation6_spill] sm:$0xff]  ;;  %v5188_v51 = vld [vmem:[#allocation13_spill] sm:$0xff] }
  0xf3   :  { %v882_v58 = vsub.f32 %v874_v41, %v2542_v26  ;;  %v3521_v38 = vadd.f32 %v879_v39, %v3361_v13  ;;  %v3524_v29 = vadd.f32 %v880_v25, %v3364_v35  ;;  %v891_v5 = vmul.f32 %v2937_v19, %v3499_v21  ;;  %v5189_v39 = vld [vmem:[#allocation21_spill] sm:$0xff]  ;;  %v5190_v2 = vld [vmem:[#allocation22_spill] sm:$0xff]  ;;  %v5191_v41 = vld [vmem:[#allocation15_spill] sm:$0xff] }
  0xf4   :  { %v3529_v49 = vadd.f32 %v881_v28, %v3369_v57  ;;  %v892_v8 = vmul.f32 %v2947_v7, %v3508_v12  ;;  %v893_v1 = vmul.f32 %v2954_v32, %v3514_v24  ;;  %v894_v63 = vmul.f32 %v2961_v14, %v3517_v20 }
  0xf5   :  { %v3538_v13 = vadd.f32 %v882_v58, %v3378_v11  ;;  %v895_v35 = vmul.f32 %v2971_v34, %v3521_v38  ;;  %v896_v46 = vmul.f32 %v2978_v60, %v3524_v29  ;;  %v899_v9 = vadd.f32 %v2992_v53, %v891_v5  ;;  %v5177_v11 = vld [vmem:[#allocation5_spill] sm:$0xff]  ;;  %v5192_v58 = vld [vmem:[#allocation16_spill] sm:$0xff] }
  0xf6   :  { %v897_v57 = vmul.f32 %v2985_v33, %v3529_v49  ;;  %v900_v22 = vadd.f32 %v3000_v55, %v892_v8  ;;  %v901_v31 = vadd.f32 %v5176_v44, %v893_v1  ;;  %v902_v0 = vadd.f32 %v5177_v11, %v894_v63  ;;  %v5193_v8 = vld [vmem:[#allocation20_spill] sm:$0xff]  ;;  %v5194_v63 = vld [vmem:[#allocation23_spill] sm:$0xff] }
  0xf7   :  { %v898_v30 = vmul.f32 %v5175_v47, %v3538_v13  ;;  %v907_v50 = vmul.f32 %v5178_v17, %v3499_v21  ;;  %v903_v59 = vadd.f32 %v5179_v16, %v895_v35  ;;  %v908_v27 = vmul.f32 %v5180_v6, %v3508_v12  ;;  %v5209_v6 = vld [vmem:[#allocation40_spill] sm:$0xff]  ;;  %v5210_v16 = vld [vmem:[#allocation41_spill] sm:$0xff] }
  0xf8   :  { %v909_v42 = vmul.f32 %v5181_v4, %v3514_v24  ;;  %v910_v43 = vmul.f32 %v5182_v56, %v3517_v20  ;;  %v904_v45 = vadd.f32 %v5183_v37, %v896_v46  ;;  %v905_v40 = vadd.f32 %v5184_v61, %v897_v57  ;;  %v5195_v46 = vld [vmem:[#allocation24_spill] sm:$0xff]  ;;  %v5207_v37 = vld [vmem:[#allocation34_spill] sm:$0xff]  ;;  %v5208_v56 = vld [vmem:[#allocation37_spill] sm:$0xff] }
  0xf9   :  { %v911_v52 = vmul.f32 %v5185_v23, %v3521_v38  ;;  %v912_v54 = vmul.f32 %v5186_v10, %v3524_v29  ;;  %v906_v18 = vadd.f32 %v5187_v48, %v898_v30  ;;  %v913_v36 = vmul.f32 %v5188_v51, %v3529_v49  ;;  %v5196_v30 = vld [vmem:[#allocation25_spill] sm:$0xff]  ;;  %v5197_v51 = vld [vmem:[#allocation28_spill] sm:$0xff] }
  0xfa   :  { %v914_v3 = vmul.f32 %v5189_v39, %v3538_v13  ;;  %v915_v25 = vadd.f32 %v5190_v2, %v907_v50  ;;  %v916_v28 = vadd.f32 %v5191_v41, %v908_v27  ;;  %v917_v5 = vadd.f32 %v5192_v58, %v909_v42  ;;  %v5198_v39 = vld [vmem:[#allocation29_spill] sm:$0xff]  ;;  %v5199_v50 = vld [vmem:[#allocation30_spill] sm:$0xff]  ;;  %v5200_v42 = vld [vmem:[#allocation31_spill] sm:$0xff] }
  0xfb   :  { %v918_v1 = vadd.f32 %v5193_v8, %v910_v43  ;;  %v919_v35 = vadd.f32 %v5194_v63, %v911_v52  ;;  %v920_v57 = vadd.f32 %v5195_v46, %v912_v54  ;;  %v923_v48 = vmul.f32 %v5196_v30, %v3499_v21  ;;  %v5201_v43 = vld [vmem:[#allocation32_spill] sm:$0xff]  ;;  %v5202_v54 = vld [vmem:[#allocation33_spill] sm:$0xff]  ;;  %v5203_v63 = vld [vmem:[#allocation35_spill] sm:$0xff] }
  0xfc   :  { %v924_v10 = vmul.f32 %v5197_v51, %v3508_v12  ;;  %v925_v23 = vmul.f32 %v5198_v39, %v3514_v24  ;;  %v926_v27 = vmul.f32 %v5199_v50, %v3517_v20  ;;  %v927_v58 = vmul.f32 %v5200_v42, %v3521_v38  ;;  %v5204_v8 = vld [vmem:[#allocation26_spill] sm:$0xff]  ;;  %v5205_v51 = vld [vmem:[#allocation27_spill] sm:$0xff]  ;;  %v5206_v39 = vld [vmem:[#allocation36_spill] sm:$0xff] }
  0xfd   :  { %v928_v52 = vmul.f32 %v5201_v43, %v3524_v29  ;;  %v929_v46 = vmul.f32 %v5202_v54, %v3529_v49  ;;  %v921_v30 = vadd.f32 %v5203_v63, %v913_v36  ;;  %v922_v41 = vadd.f32 %v5204_v8, %v914_v3  ;;  %v5211_v63 = vld [vmem:[#allocation42_spill] sm:$0xff] }
  0xfe   :  { %v930_v2 = vmul.f32 %v5205_v51, %v3538_v13  ;;  %v931_v61 = vadd.f32 %v5206_v39, %v923_v48  ;;  %v932_v50 = vadd.f32 %v5207_v37, %v924_v10  ;;  %v933_v4 = vadd.f32 %v5208_v56, %v925_v23 }
  0xff   :  { %v934_v42 = vadd.f32 %v5171_v15, %v926_v27  ;;  %v935_v43 = vadd.f32 %v5209_v6, %v927_v58  ;;  %v936_v17 = vadd.f32 %v5210_v16, %v928_v52  ;;  %v939_v54 = vmul.f32 %v899_v9, %v899_v9 }
 0x100   :  { %v940_v11 = vmul.f32 %v900_v22, %v900_v22  ;;  %v941_v36 = vmul.f32 %v901_v31, %v901_v31  ;;  %v937_v3 = vadd.f32 %v5211_v63, %v929_v46  ;;  %v942_v8 = vmul.f32 %v902_v0, %v902_v0 }
 0x101   :  { %v943_v44 = vmul.f32 %v903_v59, %v903_v59  ;;  %v944_v51 = vmul.f32 %v904_v45, %v904_v45  ;;  %v945_v47 = vmul.f32 %v905_v40, %v905_v40  ;;  %v947_v48 = vmul.f32 %v915_v25, %v915_v25 }
 0x102   :  { %v948_v39 = vmul.f32 %v916_v28, %v916_v28  ;;  %v949_v10 = vmul.f32 %v917_v5, %v917_v5  ;;  %v950_v37 = vmul.f32 %v918_v1, %v918_v1  ;;  %v951_v23 = vmul.f32 %v919_v35, %v919_v35 }
 0x103   :  { %v952_v56 = vmul.f32 %v920_v57, %v920_v57  ;;  %v953_v27 = vmul.f32 %v921_v30, %v921_v30  ;;  %v938_v58 = vadd.f32 %v3279_v62, %v930_v2  ;;  %v955_v6 = vadd.f32 %v947_v48, %v939_v54 }
 0x104   :  { %v956_v52 = vadd.f32 %v948_v39, %v940_v11  ;;  %v957_v9 = vadd.f32 %v949_v10, %v941_v36  ;;  %v946_v22 = vmul.f32 %v906_v18, %v906_v18  ;;  %v954_v31 = vmul.f32 %v922_v41, %v922_v41 }
 0x105   :  { %v958_v16 = vadd.f32 %v950_v37, %v942_v8  ;;  %v959_v46 = vadd.f32 %v951_v23, %v943_v44  ;;  %v960_v0 = vadd.f32 %v952_v56, %v944_v51  ;;  %v963_v59 = vmul.f32 %v931_v61, %v931_v61 }
 0x106   :  { %v964_v45 = vmul.f32 %v932_v50, %v932_v50  ;;  %v965_v40 = vmul.f32 %v933_v4, %v933_v4  ;;  %v961_v25 = vadd.f32 %v953_v27, %v945_v47  ;;  %v966_v28 = vmul.f32 %v934_v42, %v934_v42 }
 0x107   :  { %v967_v5 = vmul.f32 %v935_v43, %v935_v43  ;;  %v968_v1 = vmul.f32 %v936_v17, %v936_v17  ;;  %v969_v35 = vmul.f32 %v937_v3, %v937_v3  ;;  %v971_v57 = vadd.f32 %v963_v59, %v955_v6 }
 0x108   :  { %v972_v30 = vadd.f32 %v964_v45, %v956_v52  ;;  %v973_v63 = vadd.f32 %v965_v40, %v957_v9  ;;  %v962_v2 = vadd.f32 %v954_v31, %v946_v22  ;;  %v970_v54 = vmul.f32 %v938_v58, %v938_v58 }
 0x109   :  { %v974_v11 = vadd.f32 %v966_v28, %v958_v16  ;;  %v3604_v39 = vadd.f32 %v967_v5, %v959_v46  ;;  %1963 = vrsqrt.f32 %v971_v57  ;;  %v3606_v37 = vadd.f32 %v968_v1, %v960_v0 }
 0x10a   :  { %1965 = vrsqrt.f32 %v972_v30  ;;  %v3608_v44 = vadd.f32 %v969_v35, %v961_v25  ;;  %v3610_v47 = vadd.f32 %v970_v54, %v962_v2  ;;  %vm981_vm0 = vcmp.eq.f32.partialorder %v971_v57, inf }
 0x10b   :  { %1967 = vrsqrt.f32 %v973_v63  ;;  %vm983_vm1 = vcmp.eq.f32.partialorder %v971_v57, 0.0  ;;  %v984_v17 = vand.u32 2147483648, %v971_v57  ;;  %vm988_vm2 = vcmp.eq.f32.partialorder %v972_v30, inf }
 0x10c   :  { %1969 = vrsqrt.f32 %v974_v11  ;;  %vm990_vm3 = vcmp.eq.f32.partialorder %v972_v30, 0.0  ;;  %v991_v16 = vand.u32 2147483648, %v972_v30  ;;  %vm995_vm4 = vcmp.eq.f32.partialorder %v973_v63, inf }
 0x10d   :  { %1971 = vrsqrt.f32 %v3604_v39  ;;  %vm997_vm5 = vcmp.eq.f32.partialorder %v973_v63, 0.0  ;;  %v998_v6 = vand.u32 2147483648, %v973_v63  ;;  %vm1002_vm6 = vcmp.eq.f32.partialorder %v974_v11, inf }
 0x10e   :  { %1973 = vrsqrt.f32 %v3606_v37  ;;  %vm1004_vm7 = vcmp.eq.f32.partialorder %v974_v11, 0.0  ;;  %v1005_v56 = vand.u32 2147483648, %v974_v11  ;;  %vm1009_vm8 = vcmp.eq.f32.partialorder %v3604_v39, inf }
 0x10f   :  { %1975 = vrsqrt.f32 %v3608_v44  ;;  %vm1011_vm9 = vcmp.eq.f32.partialorder %v3604_v39, 0.0  ;;  %v1012_v61 = vand.u32 2147483648, %v3604_v39  ;;  %vm1016_vm10 = vcmp.eq.f32.partialorder %v3606_v37, inf }
 0x110   :  { %1977 = vrsqrt.f32 %v3610_v47  ;;  %vm1018_vm11 = vcmp.eq.f32.partialorder %v3606_v37, 0.0  ;;  %v1019_v41 = vand.u32 2147483648, %v3606_v37  ;;  %vm1023_vm12 = vcmp.eq.f32.partialorder %v3608_v44, inf }
 0x111   :  { %vm1025_vm13 = vcmp.eq.f32.partialorder %v3608_v44, 0.0  ;;  %v1026_v42 = vand.u32 2147483648, %v3608_v44  ;;  %vm1030_vm14 = vcmp.eq.f32.partialorder %v3610_v47, inf  ;;  %vm1032_vm15 = vcmp.eq.f32.partialorder %v3610_v47, 0.0 }
 0x112   :  { %v1033_v58 = vand.u32 2147483648, %v3610_v47 }
 0x113   :  { %v1964_v4 = vpop.eup %1963 }
 0x114   :  { %v1966_v18 = vpop.eup %1965  ;;  %v980_v51 = vmul.f32 %v1964_v4, %v971_v57 }
 0x115   :  { %v1968_v8 = vpop.eup %1967  ;;  %v987_v50 = vmul.f32 %v1966_v18, %v972_v30 }
 0x116   :  { %v1970_v43 = vpop.eup %1969  ;;  %v982_v36 = vsel %vm981_vm0, %v971_v57, %v980_v51  ;;  %v994_v3 = vmul.f32 %v1968_v8, %v973_v63 }
 0x117   :  { %v1972_v48 = vpop.eup %1971  ;;  %v985_v10 = vsel %vm983_vm1, %v984_v17, %v982_v36  ;;  %v989_v23 = vsel %vm988_vm2, %v972_v30, %v987_v50  ;;  %v1001_v27 = vmul.f32 %v1970_v43, %v974_v11 }
 0x118   :  { %v1974_v52 = vpop.eup %1973  ;;  %v992_v9 = vsel %vm990_vm3, %v991_v16, %v989_v23  ;;  %v996_v22 = vsel %vm995_vm4, %v973_v63, %v994_v3  ;;  %v1008_v31 = vmul.f32 %v1972_v48, %v3604_v39  ;;  %v1035_v46 = vsub.f32 %v985_v10, %v2542_v26  ;;  %v5215_v48 = vld [vmem:[#allocation6_spill] sm:$0xff] }
 0x119   :  { %v1976_v0 = vpop.eup %1975  ;;  %v999_v59 = vsel %vm997_vm5, %v998_v6, %v996_v22  ;;  %v1003_v45 = vsel %vm1002_vm6, %v974_v11, %v1001_v27  ;;  %v1015_v40 = vmul.f32 %v1974_v52, %v3606_v37  ;;  %v1036_v25 = vsub.f32 %v992_v9, %v2542_v26  ;;  %v5216_v10 = vld [vmem:[#allocation10_spill] sm:$0xff]  ;;  %v5220_v52 = vld [vmem:[#allocation17_spill] sm:$0xff]  ;;  %v5221_v22 = vld [vmem:[#allocation8_spill] sm:$0xff] }
 0x11a   :  { %v1978_v28 = vpop.eup %1977  ;;  %v1006_v5 = vsel %vm1004_vm7, %v1005_v56, %v1003_v45  ;;  %v1010_v1 = vsel %vm1009_vm8, %v3604_v39, %v1008_v31  ;;  %v1022_v35 = vmul.f32 %v1976_v0, %v3608_v44  ;;  %v1037_v57 = vsub.f32 %v999_v59, %v2542_v26  ;;  %v5223_v59 = vld [vmem:[#allocation18_spill] sm:$0xff] }
 0x11b   :  { %v1013_v63 = vsel %vm1011_vm9, %v1012_v61, %v1010_v1  ;;  %v1017_v30 = vsel %vm1016_vm10, %v3606_v37, %v1015_v40  ;;  %v1029_v2 = vmul.f32 %v1978_v28, %v3610_v47  ;;  %v1038_v54 = vsub.f32 %v1006_v5, %v2542_v26  ;;  %v5224_v40 = vld [vmem:[#allocation19_spill] sm:$0xff]  ;;  %v5225_v28 = vld [vmem:[#allocation13_spill] sm:$0xff] }
 0x11c   :  { %v1020_v11 = vsel %vm1018_vm11, %v1019_v41, %v1017_v30  ;;  %v1024_v17 = vsel %vm1023_vm12, %v3608_v44, %v1022_v35  ;;  %v1039_v16 = vsub.f32 %v1013_v63, %v2542_v26  ;;  %v3659_v39 = vadd.f32 %v1035_v46, %v3499_v21  ;;  %v5222_v46 = vld [vmem:[#allocation12_spill] sm:$0xff]  ;;  %v5226_v1 = vld [vmem:[#allocation21_spill] sm:$0xff]  ;;  %v5228_v30 = vld [vmem:[#allocation15_spill] sm:$0xff] }
 0x11d   :  { %v1027_v6 = vsel %vm1025_vm13, %v1026_v42, %v1024_v17  ;;  %v1031_v4 = vsel %vm1030_vm14, %v3610_v47, %v1029_v2  ;;  %v1040_v56 = vsub.f32 %v1020_v11, %v2542_v26  ;;  %v3668_v37 = vadd.f32 %v1036_v25, %v3508_v12  ;;  %v5230_v17 = vld [vmem:[#allocation20_spill] sm:$0xff] }
 0x11e   :  { %v1034_v61 = vsel %vm1032_vm15, %v1033_v58, %v1031_v4  ;;  %v1041_v18 = vsub.f32 %v1027_v6, %v2542_v26  ;;  %v3674_v21 = vadd.f32 %v1037_v57, %v3514_v24  ;;  %v3677_v44 = vadd.f32 %v1038_v54, %v3517_v20  ;;  %v5227_v57 = vld [vmem:[#allocation22_spill] sm:$0xff]  ;;  %v5229_v54 = vld [vmem:[#allocation16_spill] sm:$0xff]  ;;  %v5231_v6 = vld [vmem:[#allocation23_spill] sm:$0xff] }
 0x11f   :  { %v1042_v51 = vsub.f32 %v1034_v61, %v2542_v26  ;;  %v3681_v41 = vadd.f32 %v1039_v16, %v3521_v38  ;;  %v3684_v8 = vadd.f32 %v1040_v56, %v3524_v29  ;;  %v1051_v12 = vmul.f32 %v2937_v19, %v3659_v39  ;;  %v5232_v56 = vld [vmem:[#allocation24_spill] sm:$0xff] }
 0x120   :  { %v3689_v47 = vadd.f32 %v1041_v18, %v3529_v49  ;;  %v1052_v24 = vmul.f32 %v2947_v7, %v3668_v37  ;;  %v1053_v20 = vmul.f32 %v2954_v32, %v3674_v21  ;;  %v1054_v50 = vmul.f32 %v2961_v14, %v3677_v44  ;;  %v5212_v32 = vld [vmem:[#allocation39_spill] sm:$0xff]  ;;  %v5213_v14 = vld [vmem:[#allocation9_spill] sm:$0xff] }
 0x121   :  { %v3698_v38 = vadd.f32 %v1042_v51, %v3538_v13  ;;  %v1055_v29 = vmul.f32 %v2971_v34, %v3681_v41  ;;  %v1056_v19 = vmul.f32 %v2978_v60, %v3684_v8  ;;  %v1059_v7 = vadd.f32 %v2992_v53, %v1051_v12  ;;  %v5214_v13 = vld [vmem:[#allocation5_spill] sm:$0xff]  ;;  %v5217_v60 = vld [vmem:[#allocation7_spill] sm:$0xff]  ;;  %v5234_v12 = vld [vmem:[#allocation28_spill] sm:$0xff] }
 0x122   :  { %v1057_v49 = vmul.f32 %v2985_v33, %v3689_v47  ;;  %v1060_v42 = vadd.f32 %v3000_v55, %v1052_v24  ;;  %v1061_v36 = vadd.f32 %v5213_v14, %v1053_v20  ;;  %v1062_v3 = vadd.f32 %v5214_v13, %v1054_v50  ;;  %v5218_v33 = vld [vmem:[#allocation11_spill] sm:$0xff]  ;;  %v5219_v55 = vld [vmem:[#allocation14_spill] sm:$0xff]  ;;  %v5233_v18 = vld [vmem:[#allocation25_spill] sm:$0xff] }
 0x123   :  { %v1058_v43 = vmul.f32 %v5212_v32, %v3698_v38  ;;  %v1067_v34 = vmul.f32 %v5215_v48, %v3659_v39  ;;  %v1063_v23 = vadd.f32 %v5216_v10, %v1055_v29  ;;  %v1068_v27 = vmul.f32 %v5217_v60, %v3668_v37  ;;  %v5235_v20 = vld [vmem:[#allocation29_spill] sm:$0xff]  ;;  %v5236_v29 = vld [vmem:[#allocation30_spill] sm:$0xff] }
 0x124   :  { %v1069_v53 = vmul.f32 %v5218_v33, %v3674_v21  ;;  %v1070_v58 = vmul.f32 %v5219_v55, %v3677_v44  ;;  %v1064_v9 = vadd.f32 %v5220_v52, %v1056_v19  ;;  %v1065_v31 = vadd.f32 %v5221_v22, %v1057_v49  ;;  %v5237_v49 = vld [vmem:[#allocation31_spill] sm:$0xff]  ;;  %v5239_v13 = vld [vmem:[#allocation33_spill] sm:$0xff]  ;;  %v5241_v60 = vld [vmem:[#allocation26_spill] sm:$0xff] }
 0x125   :  { %v1071_v0 = vmul.f32 %v5222_v46, %v3681_v41  ;;  %v1072_v45 = vmul.f32 %v5223_v59, %v3684_v8  ;;  %v1066_v25 = vadd.f32 %v5224_v40, %v1058_v43  ;;  %v1073_v5 = vmul.f32 %v5225_v28, %v3689_v47  ;;  %v5238_v43 = vld [vmem:[#allocation32_spill] sm:$0xff]  ;;  %v5242_v33 = vld [vmem:[#allocation27_spill] sm:$0xff]  ;;  %v5244_v52 = vld [vmem:[#allocation34_spill] sm:$0xff] }
 0x126   :  { %v1074_v35 = vmul.f32 %v5226_v1, %v3698_v38  ;;  %v1075_v63 = vadd.f32 %v5227_v57, %v1067_v34  ;;  %v1076_v2 = vadd.f32 %v5228_v30, %v1068_v27  ;;  %v1077_v11 = vadd.f32 %v5229_v54, %v1069_v53  ;;  %v5240_v34 = vld [vmem:[#allocation35_spill] sm:$0xff]  ;;  %v5243_v55 = vld [vmem:[#allocation36_spill] sm:$0xff]  ;;  %v5245_v46 = vld [vmem:[#allocation37_spill] sm:$0xff] }
 0x127   :  { %v1078_v16 = vadd.f32 %v5230_v17, %v1070_v58  ;;  %v1079_v4 = vadd.f32 %v5231_v6, %v1071_v0  ;;  %v1080_v61 = vadd.f32 %v5232_v56, %v1072_v45  ;;  %v1083_v51 = vmul.f32 %v5233_v18, %v3659_v39  ;;  %v5246_v45 = vld [vmem:[#allocation40_spill] sm:$0xff]  ;;  %v5247_v28 = vld [vmem:[#allocation41_spill] sm:$0xff]  ;;  %v5248_v54 = vld [vmem:[#allocation42_spill] sm:$0xff] }
 0x128   :  { %v1084_v24 = vmul.f32 %v5234_v12, %v3668_v37  ;;  %v1085_v50 = vmul.f32 %v5235_v20, %v3674_v21  ;;  %v1086_v19 = vmul.f32 %v5236_v29, %v3677_v44  ;;  %v1087_v32 = vmul.f32 %v5237_v49, %v3681_v41 }
 0x129   :  { %v1088_v14 = vmul.f32 %v5238_v43, %v3684_v8  ;;  %v1089_v48 = vmul.f32 %v5239_v13, %v3689_v47  ;;  %v1081_v10 = vadd.f32 %v5240_v34, %v1073_v5  ;;  %v1082_v27 = vadd.f32 %v5241_v60, %v1074_v35 }
 0x12a   :  { %v1090_v53 = vmul.f32 %v5242_v33, %v3698_v38  ;;  %v1091_v58 = vadd.f32 %v5243_v55, %v1083_v51  ;;  %v1092_v22 = vadd.f32 %v5244_v52, %v1084_v24  ;;  %v1093_v0 = vadd.f32 %v5245_v46, %v1085_v50 }
 0x12b   :  { %v1094_v59 = vadd.f32 %v5171_v15, %v1086_v19  ;;  %v1095_v40 = vadd.f32 %v5246_v45, %v1087_v32  ;;  %v1096_v1 = vadd.f32 %v5247_v28, %v1088_v14  ;;  %v1099_v57 = vmul.f32 %v1059_v7, %v1059_v7 }
 0x12c   :  { %v1100_v30 = vmul.f32 %v1060_v42, %v1060_v42  ;;  %v1101_v5 = vmul.f32 %v1061_v36, %v1061_v36  ;;  %v1097_v35 = vadd.f32 %v5248_v54, %v1089_v48  ;;  %v1102_v17 = vmul.f32 %v1062_v3, %v1062_v3 }
 0x12d   :  { %v1103_v6 = vmul.f32 %v1063_v23, %v1063_v23  ;;  %v1104_v56 = vmul.f32 %v1064_v9, %v1064_v9  ;;  %v1105_v18 = vmul.f32 %v1065_v31, %v1065_v31  ;;  %v1107_v51 = vmul.f32 %v1075_v63, %v1075_v63 }
 0x12e   :  { %v1108_v12 = vmul.f32 %v1076_v2, %v1076_v2  ;;  %v1109_v24 = vmul.f32 %v1077_v11, %v1077_v11  ;;  %v1110_v20 = vmul.f32 %v1078_v16, %v1078_v16  ;;  %v1111_v50 = vmul.f32 %v1079_v4, %v1079_v4 }
 0x12f   :  { %v1112_v29 = vmul.f32 %v1080_v61, %v1080_v61  ;;  %v1113_v15 = vmul.f32 %v1081_v10, %v1081_v10  ;;  %v1098_v19 = vadd.f32 %v3279_v62, %v1090_v53  ;;  %v1115_v49 = vadd.f32 %v1107_v51, %v1099_v57 }
 0x130   :  { %v1116_v32 = vadd.f32 %v1108_v12, %v1100_v30  ;;  %v1117_v7 = vadd.f32 %v1109_v24, %v1101_v5  ;;  %v1106_v42 = vmul.f32 %v1066_v25, %v1066_v25  ;;  %v1114_v36 = vmul.f32 %v1082_v27, %v1082_v27 }
 0x131   :  { %v1118_v43 = vadd.f32 %v1110_v20, %v1102_v17  ;;  %v1119_v14 = vadd.f32 %v1111_v50, %v1103_v6  ;;  %v1120_v3 = vadd.f32 %v1112_v29, %v1104_v56  ;;  %v1123_v23 = vmul.f32 %v1091_v58, %v1091_v58 }
 0x132   :  { %v1124_v9 = vmul.f32 %v1092_v22, %v1092_v22  ;;  %v1125_v31 = vmul.f32 %v1093_v0, %v1093_v0  ;;  %v1121_v63 = vadd.f32 %v1113_v15, %v1105_v18  ;;  %v1126_v2 = vmul.f32 %v1094_v59, %v1094_v59 }
 0x133   :  { %v1127_v11 = vmul.f32 %v1095_v40, %v1095_v40  ;;  %v1128_v16 = vmul.f32 %v1096_v1, %v1096_v1  ;;  %v1129_v4 = vmul.f32 %v1097_v35, %v1097_v35  ;;  %v1131_v61 = vadd.f32 %v1123_v23, %v1115_v49 }
 0x134   :  { %v1132_v13 = vadd.f32 %v1124_v9, %v1116_v32  ;;  %v1133_v48 = vadd.f32 %v1125_v31, %v1117_v7  ;;  %v1122_v62 = vadd.f32 %v1114_v36, %v1106_v42  ;;  %v1130_v34 = vmul.f32 %v1098_v19, %v1098_v19 }
 0x135   :  { %v1134_v10 = vadd.f32 %v1126_v2, %v1118_v43  ;;  %v3764_v60 = vadd.f32 %v1127_v11, %v1119_v14  ;;  %1979 = vrsqrt.f32 %v1131_v61  ;;  %v3766_v25 = vadd.f32 %v1128_v16, %v1120_v3 }
 0x136   :  { %1981 = vrsqrt.f32 %v1132_v13  ;;  %v3768_v27 = vadd.f32 %v1129_v4, %v1121_v63  ;;  %v3770_v33 = vadd.f32 %v1130_v34, %v1122_v62  ;;  %vm1141_vm0 = vcmp.eq.f32.partialorder %v1131_v61, inf }
 0x137   :  { %1983 = vrsqrt.f32 %v1133_v48  ;;  %vm1143_vm1 = vcmp.eq.f32.partialorder %v1131_v61, 0.0  ;;  %v1144_v53 = vand.u32 2147483648, %v1131_v61  ;;  %vm1148_vm2 = vcmp.eq.f32.partialorder %v1132_v13, inf }
 0x138   :  { %1985 = vrsqrt.f32 %v1134_v10  ;;  %vm1150_vm3 = vcmp.eq.f32.partialorder %v1132_v13, 0.0  ;;  %v1151_v55 = vand.u32 2147483648, %v1132_v13  ;;  %vm1155_vm4 = vcmp.eq.f32.partialorder %v1133_v48, inf }
 0x139   :  { %1987 = vrsqrt.f32 %v3764_v60  ;;  %vm1157_vm5 = vcmp.eq.f32.partialorder %v1133_v48, 0.0  ;;  %v1158_v58 = vand.u32 2147483648, %v1133_v48  ;;  %vm1162_vm6 = vcmp.eq.f32.partialorder %v1134_v10, inf }
 0x13a   :  { %1989 = vrsqrt.f32 %v3766_v25  ;;  %vm1164_vm7 = vcmp.eq.f32.partialorder %v1134_v10, 0.0  ;;  %v1165_v22 = vand.u32 2147483648, %v1134_v10  ;;  %vm1169_vm8 = vcmp.eq.f32.partialorder %v3764_v60, inf }
 0x13b   :  { %1991 = vrsqrt.f32 %v3768_v27  ;;  %vm1171_vm9 = vcmp.eq.f32.partialorder %v3764_v60, 0.0  ;;  %v1172_v46 = vand.u32 2147483648, %v3764_v60  ;;  %vm1176_vm10 = vcmp.eq.f32.partialorder %v3766_v25, inf }
 0x13c   :  { %1993 = vrsqrt.f32 %v3770_v33  ;;  %vm1178_vm11 = vcmp.eq.f32.partialorder %v3766_v25, 0.0  ;;  %v1179_v45 = vand.u32 2147483648, %v3766_v25  ;;  %vm1183_vm12 = vcmp.eq.f32.partialorder %v3768_v27, inf }
 0x13d   :  { %vm1185_vm13 = vcmp.eq.f32.partialorder %v3768_v27, 0.0  ;;  %v1186_v1 = vand.u32 2147483648, %v3768_v27  ;;  %vm1190_vm14 = vcmp.eq.f32.partialorder %v3770_v33, inf  ;;  %vm1192_vm15 = vcmp.eq.f32.partialorder %v3770_v33, 0.0 }
 0x13e   :  { %v1193_v56 = vand.u32 2147483648, %v3770_v33 }
 0x13f   :  { %v1980_v52 = vpop.eup %1979 }
 0x140   :  { %v1982_v0 = vpop.eup %1981  ;;  %v1140_v59 = vmul.f32 %v1980_v52, %v1131_v61 }
 0x141   :  { %v1984_v40 = vpop.eup %1983  ;;  %v1147_v28 = vmul.f32 %v1982_v0, %v1132_v13 }
 0x142   :  { %v1986_v57 = vpop.eup %1985  ;;  %v1142_v30 = vsel %vm1141_vm0, %v1131_v61, %v1140_v59  ;;  %v1154_v5 = vmul.f32 %v1984_v40, %v1133_v48  ;;  %v3904_v59 = vld [vmem:[%s4815_s1] sm:$0xff]  ;;  %v3912_v40 = vld [vmem:[%s4815_s1 + $0x8] sm:$0xff] }
 0x143   :  { %v1988_v54 = vpop.eup %1987  ;;  %v1145_v35 = vsel %vm1143_vm1, %v1144_v53, %v1142_v30  ;;  %v1149_v17 = vsel %vm1148_vm2, %v1132_v13, %v1147_v28  ;;  %v1161_v6 = vmul.f32 %v1986_v57, %v1134_v10  ;;  %v3927_v30 = vld [vmem:[%s4815_s1 + $0x10] sm:$0xff] }
 0x144   :  { %v1990_v18 = vpop.eup %1989  ;;  %v1152_v51 = vsel %vm1150_vm3, %v1151_v55, %v1149_v17  ;;  %v1156_v12 = vsel %vm1155_vm4, %v1133_v48, %v1154_v5  ;;  %v1168_v24 = vmul.f32 %v1988_v54, %v3764_v60  ;;  %v1195_v20 = vsub.f32 %v1145_v35, %v2542_v26  ;;  %v3935_v54 = vld [vmem:[%s4815_s1 + $0x18] sm:$0xff]  ;;  %v3943_v17 = vld [vmem:[%s4815_s1 + $0x100] sm:$0xff] }
 0x145   :  { %v1992_v50 = vpop.eup %1991  ;;  %v1159_v29 = vsel %vm1157_vm5, %v1158_v58, %v1156_v12  ;;  %v1163_v15 = vsel %vm1162_vm6, %v1134_v10, %v1161_v6  ;;  %v1175_v19 = vmul.f32 %v1990_v18, %v3766_v25  ;;  %v1196_v49 = vsub.f32 %v1152_v51, %v2542_v26  ;;  %v3883_v58 = vld [vmem:[%s4815_s1 + $0xe0] sm:$0xff]  ;;  %5249 = vst [vmem:[#allocation38_spill] sm:$0xff] %v3943_v17  ;;  %v3958_v51 = vld [vmem:[%s4815_s1 + $0x108] sm:$0xff] }
 0x146   :  { %v1994_v32 = vpop.eup %1993  ;;  %v1166_v7 = vsel %vm1164_vm7, %v1165_v22, %v1163_v15  ;;  %v1170_v42 = vsel %vm1169_vm8, %v3764_v60, %v1168_v24  ;;  %v1182_v36 = vmul.f32 %v1992_v50, %v3768_v27  ;;  %v1197_v43 = vsub.f32 %v1159_v29, %v2542_v26  ;;  %v3890_v22 = vld [vmem:[%s4815_s1 + $0xe8] sm:$0xff]  ;;  %5250 = vst [vmem:[#allocation39_spill] sm:$0xff] %v3958_v51  ;;  %v3965_v24 = vld [vmem:[%s4815_s1 + $0x110] sm:$0xff]  ;;  %v3972_v50 = vld [vmem:[%s4815_s1 + $0x118] sm:$0xff] }
 0x147   :  { %v1173_v14 = vsel %vm1171_vm9, %v1172_v46, %v1170_v42  ;;  %v1177_v3 = vsel %vm1176_vm10, %v3766_v25, %v1175_v19  ;;  %v1189_v23 = vmul.f32 %v1994_v32, %v3770_v33  ;;  %v1198_v9 = vsub.f32 %v1166_v7, %v2542_v26  ;;  %5251 = vst [vmem:[#allocation9_spill] sm:$0xff] %v3965_v24  ;;  %v3979_v15 = vld [vmem:[%s4815_s1 + $0x28] sm:$0xff]  ;;  %v3995_v7 = vld [vmem:[%s4815_s1 + $0x120] sm:$0xff] }
 0x148   :  { %v1180_v31 = vsel %vm1178_vm11, %v1179_v45, %v1177_v3  ;;  %v1184_v63 = vsel %vm1183_vm12, %v3768_v27, %v1182_v36  ;;  %v1199_v2 = vsub.f32 %v1173_v14, %v2542_v26  ;;  %v3819_v11 = vadd.f32 %v1195_v20, %v3659_v39  ;;  %5252 = vst [vmem:[#allocation5_spill] sm:$0xff] %v3972_v50  ;;  %v4002_v36 = vld [vmem:[%s4815_s1 + $0x128] sm:$0xff]  ;;  %v4009_v14 = vld [vmem:[%s4815_s1 + $0x38] sm:$0xff] }
 0x149   :  { %v1187_v16 = vsel %vm1185_vm13, %v1186_v1, %v1184_v63  ;;  %v1191_v4 = vsel %vm1190_vm14, %v3770_v33, %v1189_v23  ;;  %v1200_v61 = vsub.f32 %v1180_v31, %v2542_v26  ;;  %v3828_v13 = vadd.f32 %v1196_v49, %v3668_v37  ;;  %v3849_v37 = vld [vmem:[%s4815_s1 + $0xc0] sm:$0xff]  ;;  %v3920_v1 = vld [vmem:[%s4815_s1 + $0xf8] sm:$0xff]  ;;  %v3987_v49 = vld [vmem:[%s4815_s1 + $0x30] sm:$0xff]  ;;  %5254 = vst [vmem:[#allocation10_spill] sm:$0xff] %v3995_v7 }
 0x14a   :  { %v1194_v48 = vsel %vm1192_vm15, %v1193_v56, %v1191_v4  ;;  %v1201_v62 = vsub.f32 %v1187_v16, %v2542_v26  ;;  %v3834_v39 = vadd.f32 %v1197_v43, %v3674_v21  ;;  %v3837_v34 = vadd.f32 %v1198_v9, %v3677_v44  ;;  %v3859_v44 = vld [vmem:[%s4815_s1 + $0xc8] sm:$0xff]  ;;  %v3950_v56 = vld [vmem:[%s4815_s1 + $0x20] sm:$0xff]  ;;  %5253 = vst [vmem:[#allocation6_spill] sm:$0xff] %v3987_v49  ;;  %v4017_v23 = vld [vmem:[%s4815_s1 + $0x130] sm:$0xff] }
 0x14b   :  { %v1202_v10 = vsub.f32 %v1194_v48, %v2542_v26  ;;  %v3841_v60 = vadd.f32 %v1199_v2, %v3681_v41  ;;  %v3844_v25 = vadd.f32 %v1200_v61, %v3684_v8  ;;  %v1211_v21 = vmul.f32 %v3849_v37, %v3819_v11  ;;  %v3866_v8 = vld [vmem:[%s4815_s1 + $0xd0] sm:$0xff]  ;;  %5255 = vst [vmem:[#allocation7_spill] sm:$0xff] %v4002_v36  ;;  %v4024_v31 = vld [vmem:[%s4815_s1 + $0x138] sm:$0xff]  ;;  %v4031_v2 = vld [vmem:[%s4815_s1 + $0x40] sm:$0xff] }
 0x14c   :  { %v3854_v27 = vadd.f32 %v1201_v62, %v3689_v47  ;;  %v1212_v41 = vmul.f32 %v3859_v44, %v3828_v13  ;;  %v1213_v33 = vmul.f32 %v3866_v8, %v3834_v39  ;;  %v3873_v47 = vld [vmem:[%s4815_s1 + $0xd8] sm:$0xff]  ;;  %v1227_v6 = vmul.f32 %v3943_v17, %v3819_v11  ;;  %5256 = vst [vmem:[#allocation11_spill] sm:$0xff] %v4009_v14  ;;  %v4037_v4 = vld [vmem:[%s4815_s1 + $0x48] sm:$0xff]  ;;  %v4043_v48 = vld [vmem:[%s4815_s1 + $0x50] sm:$0xff] }
 0x14d   :  { %v1214_v53 = vmul.f32 %v3873_v47, %v3837_v34  ;;  %v3878_v55 = vadd.f32 %v1202_v10, %v3698_v38  ;;  %v1215_v52 = vmul.f32 %v3883_v58, %v3841_v60  ;;  %v1216_v46 = vmul.f32 %v3890_v22, %v3844_v25  ;;  %v3897_v38 = vld [vmem:[%s4815_s1 + $0xf0] sm:$0xff]  ;;  %5257 = vst [vmem:[#allocation14_spill] sm:$0xff] %v4017_v23  ;;  %v4049_v10 = vld [vmem:[%s4815_s1 + $0x58] sm:$0xff] }
 0x14e   :  { %v1217_v0 = vmul.f32 %v3897_v38, %v3854_v27  ;;  %v3907_v45 = vadd.f32 %v3904_v59, %v1211_v21  ;;  %v3915_v28 = vadd.f32 %v3912_v40, %v1212_v41  ;;  %v3930_v5 = vadd.f32 %v3927_v30, %v1213_v33  ;;  %5258 = vst [vmem:[#allocation17_spill] sm:$0xff] %v4024_v31  ;;  %v4055_v41 = vld [vmem:[%s4815_s1 + $0x60] sm:$0xff] }
 0x14f   :  { %v1218_v57 = vmul.f32 %v3920_v1, %v3878_v55  ;;  %v3938_v35 = vadd.f32 %v3935_v54, %v1214_v53  ;;  %v3953_v18 = vadd.f32 %v3950_v56, %v1215_v52  ;;  %v1228_v12 = vmul.f32 %v3958_v51, %v3828_v13  ;;  %5259 = vst [vmem:[#allocation8_spill] sm:$0xff] %v4031_v2  ;;  %v4061_v53 = vld [vmem:[%s4815_s1 + $0x68] sm:$0xff] }
 0x150   :  { %v1229_v20 = vmul.f32 %v3965_v24, %v3834_v39  ;;  %v1230_v29 = vmul.f32 %v3972_v50, %v3837_v34  ;;  %v3982_v19 = vadd.f32 %v3979_v15, %v1216_v46  ;;  %v3990_v32 = vadd.f32 %v3987_v49, %v1217_v0  ;;  %5260 = vst [vmem:[#allocation12_spill] sm:$0xff] %v4037_v4  ;;  %v4067_v46 = vld [vmem:[%s4815_s1 + $0x140] sm:$0xff] }
 0x151   :  { %v1231_v42 = vmul.f32 %v3995_v7, %v3841_v60  ;;  %v1232_v43 = vmul.f32 %v4002_v36, %v3844_v25  ;;  %v4012_v3 = vadd.f32 %v4009_v14, %v1218_v57  ;;  %v1233_v9 = vmul.f32 %v4017_v23, %v3854_v27  ;;  %5261 = vst [vmem:[#allocation18_spill] sm:$0xff] %v4043_v48  ;;  %v4074_v57 = vld [vmem:[%s4815_s1 + $0x148] sm:$0xff] }
 0x152   :  { %v1234_v63 = vmul.f32 %v4024_v31, %v3878_v55  ;;  %v1235_v16 = vadd.f32 %v4031_v2, %v1227_v6  ;;  %v1236_v61 = vadd.f32 %v4037_v4, %v1228_v12  ;;  %v1237_v62 = vadd.f32 %v4043_v48, %v1229_v20  ;;  %5262 = vst [vmem:[#allocation19_spill] sm:$0xff] %v4049_v10  ;;  %v4081_v12 = vld [vmem:[%s4815_s1 + $0x150] sm:$0xff]  ;;  %v4128_v48 = vld [vmem:[%s4815_s1 + $0x178] sm:$0xff]  ;;  %v4135_v4 = vld [vmem:[%s4815_s1 + $0x80] sm:$0xff] }
 0x153   :  { %v1238_v21 = vadd.f32 %v4049_v10, %v1230_v29  ;;  %5263 = vst [vmem:[#allocation13_spill] sm:$0xff] %v4055_v41  ;;  %v1239_v33 = vadd.f32 %v4055_v41, %v1231_v42  ;;  %5264 = vst [vmem:[#allocation21_spill] sm:$0xff] %v4061_v53  ;;  %v1240_v52 = vadd.f32 %v4061_v53, %v1232_v43  ;;  %v4088_v29 = vld [vmem:[%s4815_s1 + $0x158] sm:$0xff]  ;;  %v4095_v43 = vld [vmem:[%s4815_s1 + $0x160] sm:$0xff] }
 0x154   :  { %5265 = vst [vmem:[#allocation22_spill] sm:$0xff] %v4067_v46  ;;  %v1243_v0 = vmul.f32 %v4067_v46, %v3819_v11  ;;  %5266 = vst [vmem:[#allocation15_spill] sm:$0xff] %v4074_v57  ;;  %v1244_v6 = vmul.f32 %v4074_v57, %v3828_v13  ;;  %v1245_v20 = vmul.f32 %v4081_v12, %v3834_v39  ;;  %v4122_v10 = vld [vmem:[%s4815_s1 + $0x78] sm:$0xff] }
 0x155   :  { %5267 = vst [vmem:[#allocation16_spill] sm:$0xff] %v4081_v12  ;;  %5268 = vst [vmem:[#allocation20_spill] sm:$0xff] %v4088_v29  ;;  %v1246_v42 = vmul.f32 %v4088_v29, %v3837_v34  ;;  %v1247_v57 = vmul.f32 %v4095_v43, %v3841_v60  ;;  %v4102_v12 = vld [vmem:[%s4815_s1 + $0x168] sm:$0xff]  ;;  %v4109_v29 = vld [vmem:[%s4815_s1 + $0x170] sm:$0xff]  ;;  %v1262_v31 = vmul.f32 %v3938_v35, %v3938_v35 }
 0x156   :  { %5269 = vst [vmem:[#allocation23_spill] sm:$0xff] %v4095_v43  ;;  %5270 = vst [vmem:[#allocation24_spill] sm:$0xff] %v4102_v12  ;;  %v1248_v46 = vmul.f32 %v4102_v12, %v3844_v25  ;;  %v1249_v53 = vmul.f32 %v4109_v29, %v3854_v27  ;;  %v4116_v43 = vld [vmem:[%s4815_s1 + $0x70] sm:$0xff]  ;;  %v1242_v12 = vadd.f32 %v4122_v10, %v1234_v63  ;;  %v4153_v2 = vld [vmem:[%s4815_s1 + $0x98] sm:$0xff] }
 0x157   :  { %5271 = vst [vmem:[#allocation25_spill] sm:$0xff] %v4109_v29  ;;  %5272 = vst [vmem:[#allocation28_spill] sm:$0xff] %v4116_v43  ;;  %v1241_v41 = vadd.f32 %v4116_v43, %v1233_v9  ;;  %v1250_v29 = vmul.f32 %v4128_v48, %v3878_v55  ;;  %v1251_v9 = vadd.f32 %v4135_v4, %v1243_v0  ;;  %v4141_v43 = vld [vmem:[%s4815_s1 + $0x88] sm:$0xff]  ;;  %v4191_v35 = vld [vmem:[%s4815_s1 + $0xb8] sm:$0xff] }
 0x158   :  { %5273 = vst [vmem:[#allocation29_spill] sm:$0xff] %v4122_v10  ;;  %5274 = vst [vmem:[#allocation30_spill] sm:$0xff] %v4128_v48  ;;  %v1252_v63 = vadd.f32 %v4141_v43, %v1244_v6  ;;  %v4147_v10 = vld [vmem:[%s4815_s1 + $0x90] sm:$0xff]  ;;  %v1254_v0 = vadd.f32 %v4153_v2, %v1246_v42  ;;  %v1260_v42 = vmul.f32 %v3915_v28, %v3915_v28 }
 0x159   :  { %5275 = vst [vmem:[#allocation31_spill] sm:$0xff] %v4135_v4  ;;  %5276 = vst [vmem:[#allocation32_spill] sm:$0xff] %v4141_v43  ;;  %v1253_v48 = vadd.f32 %v4147_v10, %v1245_v20  ;;  %v4159_v4 = vld [vmem:[%s4815_s1 + $0xa0] sm:$0xff]  ;;  %v4165_v43 = vld [vmem:[%s4815_s1 + $0xa8] sm:$0xff]  ;;  %v1265_v28 = vmul.f32 %v3990_v32, %v3990_v32  ;;  %v1269_v23 = vmul.f32 %v1237_v62, %v1237_v62 }
 0x15a   :  { %5277 = vst [vmem:[#allocation33_spill] sm:$0xff] %v4147_v10  ;;  %5278 = vst [vmem:[#allocation35_spill] sm:$0xff] %v4153_v2  ;;  %v1255_v6 = vadd.f32 %v4159_v4, %v1247_v57  ;;  %v1256_v20 = vadd.f32 %v4165_v43, %v1248_v46  ;;  %v1259_v10 = vmul.f32 %v3907_v45, %v3907_v45  ;;  %v4177_v57 = vld [vmem:[%s4815_s1 + $0xb0] sm:$0xff]  ;;  %s1832_s1 = sld [smem:[#allocation2 + $0x3]] }
 0x15b   :  { %5279 = vst [vmem:[#allocation26_spill] sm:$0xff] %v4159_v4  ;;  %5280 = vst [vmem:[#allocation27_spill] sm:$0xff] %v4165_v43  ;;  %v1261_v2 = vmul.f32 %v3930_v5, %v3930_v5  ;;  %v1257_v4 = vadd.f32 %v4177_v57, %v1249_v53  ;;  %v1263_v46 = vmul.f32 %v3953_v18, %v3953_v18 }
 0x15c   :  { %5281 = vst [vmem:[#allocation36_spill] sm:$0xff] %v4177_v57  ;;  %v1264_v45 = vmul.f32 %v3982_v19, %v3982_v19  ;;  %v1267_v5 = vmul.f32 %v1235_v16, %v1235_v16  ;;  %v1268_v43 = vmul.f32 %v1236_v61, %v1236_v61  ;;  %v1270_v36 = vmul.f32 %v1238_v21, %v1238_v21 }
 0x15d   :  { %v1271_v7 = vmul.f32 %v1239_v33, %v1239_v33  ;;  %v1272_v50 = vmul.f32 %v1240_v52, %v1240_v52  ;;  %v1273_v24 = vmul.f32 %v1241_v41, %v1241_v41  ;;  %v1258_v18 = vadd.f32 %v4191_v35, %v1250_v29 }
 0x15e   :  { %v1275_v53 = vadd.f32 %v1267_v5, %v1259_v10  ;;  %v1276_v57 = vadd.f32 %v1268_v43, %v1260_v42  ;;  %v1277_v19 = vadd.f32 %v1269_v23, %v1261_v2  ;;  %v1266_v32 = vmul.f32 %v4012_v3, %v4012_v3 }
 0x15f   :  { %v1274_v16 = vmul.f32 %v1242_v12, %v1242_v12  ;;  %v1278_v61 = vadd.f32 %v1270_v36, %v1262_v31  ;;  %v1279_v62 = vadd.f32 %v1271_v7, %v1263_v46  ;;  %v1280_v21 = vadd.f32 %v1272_v50, %v1264_v45 }
 0x160   :  { %v1283_v33 = vmul.f32 %v1251_v9, %v1251_v9  ;;  %v1284_v52 = vmul.f32 %v1252_v63, %v1252_v63  ;;  %v1285_v41 = vmul.f32 %v1253_v48, %v1253_v48  ;;  %v1281_v51 = vadd.f32 %v1273_v24, %v1265_v28 }
 0x161   :  { %v1286_v17 = vmul.f32 %v1254_v0, %v1254_v0  ;;  %v1287_v14 = vmul.f32 %v1255_v6, %v1255_v6  ;;  %v1288_v49 = vmul.f32 %v1256_v20, %v1256_v20  ;;  %v1289_v10 = vmul.f32 %v1257_v4, %v1257_v4 }
 0x162   :  { %v4196_v23 = vadd.f32 %v1283_v33, %v1275_v53  ;;  %v4198_v2 = vadd.f32 %v1284_v52, %v1276_v57  ;;  %v4200_v3 = vadd.f32 %v1285_v41, %v1277_v19  ;;  %v1282_v50 = vadd.f32 %v1274_v16, %v1266_v32 }
 0x163   :  { %v1290_v7 = vmul.f32 %v1258_v18, %v1258_v18  ;;  %v4202_v36 = vadd.f32 %v1286_v17, %v1278_v61  ;;  %v4204_v31 = vadd.f32 %v1287_v14, %v1279_v62  ;;  %v4207_v24 = vadd.f32 %v1288_v49, %v1280_v21 }
 0x164   :  { %1995 = vrsqrt.f32 %v4196_v23  ;;  %v4210_v4 = vadd.f32 %v1289_v10, %v1281_v51  ;;  %v4218_v17 = vstv %s1830_s13  ;;  %v4221_v49 = vstv %s1831_s14 }
 0x165   :  { %1997 = vrsqrt.f32 %v4198_v2  ;;  %v4213_v48 = vadd.f32 %v1290_v7, %v1282_v50  ;;  %v4223_v14 = vstv %s1832_s1  ;;  %v4225_v51 = vstv %s1839_s15 }
 0x166   :  { %1999 = vrsqrt.f32 %v4200_v3  ;;  %vm1301_vm0 = vcmp.eq.f32.partialorder %v4196_v23, inf  ;;  %v4229_v12 = vstv %s1833_s16  ;;  %v4231_v29 = vstv %s1834_s0 }
 0x167   :  { %2001 = vrsqrt.f32 %v4202_v36  ;;  %vm1303_vm1 = vcmp.eq.f32.partialorder %v4196_v23, 0.0  ;;  %v1304_v43 = vand.u32 2147483648, %v4196_v23  ;;  %vm1308_vm2 = vcmp.eq.f32.partialorder %v4198_v2, inf }
 0x168   :  { %2003 = vrsqrt.f32 %v4204_v31  ;;  %vm1310_vm3 = vcmp.eq.f32.partialorder %v4198_v2, 0.0  ;;  %v1311_v9 = vand.u32 2147483648, %v4198_v2  ;;  %vm1315_vm4 = vcmp.eq.f32.partialorder %v4200_v3, inf }
 0x169   :  { %2005 = vrsqrt.f32 %v4207_v24  ;;  %vm1317_vm5 = vcmp.eq.f32.partialorder %v4200_v3, 0.0  ;;  %v1318_v63 = vand.u32 2147483648, %v4200_v3  ;;  %vm1322_vm6 = vcmp.eq.f32.partialorder %v4202_v36, inf }
 0x16a   :  { %2007 = vrsqrt.f32 %v4210_v4  ;;  %vm1324_vm7 = vcmp.eq.f32.partialorder %v4202_v36, 0.0  ;;  %v1325_v6 = vand.u32 2147483648, %v4202_v36  ;;  %vm1329_vm8 = vcmp.eq.f32.partialorder %v4204_v31, inf }
 0x16b   :  { %2009 = vrsqrt.f32 %v4213_v48  ;;  %vm1331_vm9 = vcmp.eq.f32.partialorder %v4204_v31, 0.0  ;;  %v1332_v57 = vand.u32 2147483648, %v4204_v31  ;;  %vm1336_vm10 = vcmp.eq.f32.partialorder %v4207_v24, inf }
 0x16c   :  { %vm1338_vm11 = vcmp.eq.f32.partialorder %v4207_v24, 0.0  ;;  %v1339_v28 = vand.u32 2147483648, %v4207_v24  ;;  %vm1343_vm12 = vcmp.eq.f32.partialorder %v4210_v4, inf  ;;  %vm1345_vm13 = vcmp.eq.f32.partialorder %v4210_v4, 0.0 }
 0x16d   :  { %v1346_v19 = vand.u32 2147483648, %v4210_v4  ;;  %vm1350_vm14 = vcmp.eq.f32.partialorder %v4213_v48, inf  ;;  %vm1352_vm15 = vcmp.eq.f32.partialorder %v4213_v48, 0.0 }
 0x16e   :  { %v1996_v0 = vpop.eup %1995 }
 0x16f   :  { %v1998_v20 = vpop.eup %1997  ;;  %v1300_v42 = vmul.f32 %v1996_v0, %v4196_v23 }
 0x170   :  { %v2000_v46 = vpop.eup %1999  ;;  %v1307_v45 = vmul.f32 %v1998_v20, %v4198_v2 }
 0x171   :  { %v2002_v5 = vpop.eup %2001  ;;  %v1302_v18 = vsel %vm1301_vm0, %v4196_v23, %v1300_v42  ;;  %v1314_v53 = vmul.f32 %v2000_v46, %v4200_v3 }
 0x172   :  { %v2004_v32 = vpop.eup %2003  ;;  %v1305_v16 = vsel %vm1303_vm1, %v1304_v43, %v1302_v18  ;;  %v1309_v61 = vsel %vm1308_vm2, %v4198_v2, %v1307_v45  ;;  %v1321_v62 = vmul.f32 %v2002_v5, %v4202_v36  ;;  %v1353_v2 = vand.u32 2147483648, %v4213_v48 }
 0x173   :  { %v2006_v21 = vpop.eup %2005  ;;  %v1312_v33 = vsel %vm1310_vm3, %v1311_v9, %v1309_v61  ;;  %v1316_v52 = vsel %vm1315_vm4, %v4200_v3, %v1314_v53  ;;  %v1328_v41 = vmul.f32 %v2004_v32, %v4204_v31  ;;  %v4297_v3 = vsub.f32 %v1305_v16, %v2542_v26 }
 0x174   :  { %v2008_v10 = vpop.eup %2007  ;;  %v1319_v23 = vsel %vm1317_vm5, %v1318_v63, %v1316_v52  ;;  %v1323_v50 = vsel %vm1322_vm6, %v4202_v36, %v1321_v62  ;;  %v1335_v7 = vmul.f32 %v2006_v21, %v4207_v24  ;;  %v4308_v42 = vsub.f32 %v1312_v33, %v2542_v26 }
 0x175   :  { %v2010_v43 = vpop.eup %2009  ;;  %v1326_v9 = vsel %vm1324_vm7, %v1325_v6, %v1323_v50  ;;  %v1330_v0 = vsel %vm1329_vm8, %v4204_v31, %v1328_v41  ;;  %v1342_v20 = vmul.f32 %v2008_v10, %v4210_v4  ;;  %v4338_v16 = vstv %s4249_s17 }
 0x176   :  { %v1333_v63 = vsel %vm1331_vm9, %v1332_v57, %v1330_v0  ;;  %v1337_v36 = vsel %vm1336_vm10, %v4207_v24, %v1335_v7  ;;  %v1349_v6 = vmul.f32 %v2010_v43, %v4213_v48  ;;  %v4316_v57 = vsub.f32 %v1319_v23, %v2542_v26  ;;  %v5308_v7 = vld [vmem:[#allocation15_spill] sm:$0xff] }
 0x177   :  { %v1340_v46 = vsel %vm1338_vm11, %v1339_v28, %v1337_v36  ;;  %v1344_v31 = vsel %vm1343_vm12, %v4210_v4, %v1342_v20  ;;  %v4319_v45 = vsub.f32 %v1326_v9, %v2542_v26  ;;  %v4327_v24 = vsub.f32 %v1333_v63, %v2542_v26 }
 0x178   :  { %v1347_v5 = vsel %vm1345_vm13, %v1346_v19, %v1344_v31  ;;  %v1351_v18 = vsel %vm1350_vm14, %v4213_v48, %v1349_v6  ;;  %v4330_v28 = vsub.f32 %v1340_v46, %v2542_v26  ;;  %v4341_v4 = vstv %s4257_s19 }
 0x179   :  { %v1354_v53 = vsel %vm1352_vm15, %v1353_v2, %v1351_v18  ;;  %v4335_v32 = vsub.f32 %v1347_v5, %v2542_v26  ;;  %v4347_v61 = vstv %s4255_s18  ;;  %v4350_v62 = vstv %s4265_s20  ;;  %v5292_v5 = vld [vmem:[#allocation39_spill] sm:$0xff]  ;;  %v5293_v18 = vld [vmem:[#allocation9_spill] sm:$0xff] }
 0x17a   :  { %5282 = vst [vmem:[#allocation34_spill] sm:$0xff] %v4330_v28  ;;  %v4344_v19 = vsub.f32 %v1354_v53, %v2542_v26  ;;  %5285 = vst [vmem:[#allocation41_spill] sm:$0xff] %v4347_v61  ;;  %v4353_v21 = vstv %s4267_s21  ;;  %v1363_v48 = vadd.f32 %v4297_v3, %v3819_v11  ;;  %v1364_v33 = vadd.f32 %v4308_v42, %v3828_v13  ;;  %v5314_v11 = vld [vmem:[#allocation30_spill] sm:$0xff] }
 0x17b   :  { %5283 = vst [vmem:[#allocation37_spill] sm:$0xff] %v4335_v32  ;;  %5286 = vst [vmem:[#allocation42_spill] sm:$0xff] %v4350_v62  ;;  %v1365_v52 = vadd.f32 %v4316_v57, %v3834_v39  ;;  %v1366_v26 = vadd.f32 %v4319_v45, %v3837_v34  ;;  %v1367_v41 = vadd.f32 %v4327_v24, %v3841_v60  ;;  %v4379_v2 = vstv %s4299_s22  ;;  %v5311_v39 = vld [vmem:[#allocation23_spill] sm:$0xff] }
 0x17c   :  { %5284 = vst [vmem:[#allocation40_spill] sm:$0xff] %v4344_v19  ;;  %5287 = vst [vmem:[#allocation43_spill] sm:$0xff] %v4353_v21  ;;  %v1368_v10 = vadd.f32 %v4330_v28, %v3844_v25  ;;  %v1369_v23 = vadd.f32 %v4335_v32, %v3854_v27  ;;  %v1370_v13 = vadd.f32 %v4344_v19, %v3878_v55 }
 0x17d   :  { %5288 = vst [vmem:[#allocation44_spill] sm:$0xff] %v4379_v2  ;;  %v1387_v43 = vmul.f32 %v3849_v37, %v1363_v48  ;;  %v1388_v55 = vmul.f32 %v3859_v44, %v1364_v33  ;;  %v1389_v9 = vmul.f32 %v3866_v8, %v1365_v52  ;;  %v1390_v0 = vmul.f32 %v3873_v47, %v1366_v26 }
 0x17e   :  { %v1391_v20 = vmul.f32 %v3883_v58, %v1367_v41  ;;  %v1392_v63 = vmul.f32 %v3890_v22, %v1368_v10  ;;  %v1393_v36 = vmul.f32 %v3897_v38, %v1369_v23  ;;  %v1394_v6 = vmul.f32 %v3920_v1, %v1370_v13  ;;  %v5289_v58 = vld [vmem:[#allocation6_spill] sm:$0xff]  ;;  %v5290_v38 = vld [vmem:[#allocation11_spill] sm:$0xff] }
 0x17f   :  { %v4391_v46 = vadd.f32 %v3904_v59, %v1387_v43  ;;  %v4394_v31 = vadd.f32 %v3912_v40, %v1388_v55  ;;  %v4397_v37 = vadd.f32 %v3927_v30, %v1389_v9  ;;  %v4400_v44 = vadd.f32 %v3935_v54, %v1390_v0  ;;  %v5291_v40 = vld [vmem:[#allocation38_spill] sm:$0xff]  ;;  %v5294_v54 = vld [vmem:[#allocation5_spill] sm:$0xff]  ;;  %v5296_v9 = vld [vmem:[#allocation7_spill] sm:$0xff] }
 0x180   :  { %v4403_v8 = vadd.f32 %v3950_v56, %v1391_v20  ;;  %v4406_v47 = vadd.f32 %v3979_v15, %v1392_v63  ;;  %v4409_v22 = vadd.f32 %v5289_v58, %v1393_v36  ;;  %v4412_v59 = vadd.f32 %v5290_v38, %v1394_v6  ;;  %v5295_v55 = vld [vmem:[#allocation10_spill] sm:$0xff]  ;;  %v5298_v63 = vld [vmem:[#allocation17_spill] sm:$0xff]  ;;  %v5299_v58 = vld [vmem:[#allocation8_spill] sm:$0xff] }
 0x181   :  { %v1403_v1 = vmul.f32 %v5291_v40, %v1363_v48  ;;  %v1404_v30 = vmul.f32 %v5292_v5, %v1364_v33  ;;  %v1405_v53 = vmul.f32 %v5293_v18, %v1365_v52  ;;  %v1406_v43 = vmul.f32 %v5294_v54, %v1366_v26  ;;  %v5297_v15 = vld [vmem:[#allocation14_spill] sm:$0xff]  ;;  %v5300_v6 = vld [vmem:[#allocation12_spill] sm:$0xff]  ;;  %v5302_v18 = vld [vmem:[#allocation19_spill] sm:$0xff] }
 0x182   :  { %v1407_v56 = vmul.f32 %v5295_v55, %v1367_v41  ;;  %v1408_v0 = vmul.f32 %v5296_v9, %v1368_v10  ;;  %v1409_v20 = vmul.f32 %v5297_v15, %v1369_v23  ;;  %v1410_v36 = vmul.f32 %v5298_v63, %v1370_v13  ;;  %v5301_v40 = vld [vmem:[#allocation18_spill] sm:$0xff]  ;;  %v5303_v54 = vld [vmem:[#allocation13_spill] sm:$0xff]  ;;  %v5305_v15 = vld [vmem:[#allocation28_spill] sm:$0xff] }
 0x183   :  { %v4423_v27 = vadd.f32 %v5299_v58, %v1403_v1  ;;  %v4426_v38 = vadd.f32 %v5300_v6, %v1404_v30  ;;  %v4429_v5 = vadd.f32 %v5301_v40, %v1405_v53  ;;  %v4432_v25 = vadd.f32 %v5302_v18, %v1406_v43  ;;  %v5304_v9 = vld [vmem:[#allocation21_spill] sm:$0xff]  ;;  %v5307_v30 = vld [vmem:[#allocation22_spill] sm:$0xff]  ;;  %v5309_v40 = vld [vmem:[#allocation16_spill] sm:$0xff] }
 0x184   :  { %v4435_v55 = vadd.f32 %v5303_v54, %v1407_v56  ;;  %v4438_v60 = vadd.f32 %v5304_v9, %v1408_v0  ;;  %v4441_v63 = vadd.f32 %v5305_v15, %v1409_v20  ;;  %v5306_v1 = vld [vmem:[#allocation29_spill] sm:$0xff]  ;;  %v1419_v6 = vmul.f32 %v5307_v30, %v1363_v48  ;;  %v5310_v43 = vld [vmem:[#allocation20_spill] sm:$0xff]  ;;  %v5315_v15 = vld [vmem:[#allocation31_spill] sm:$0xff] }
 0x185   :  { %v4444_v58 = vadd.f32 %v5306_v1, %v1410_v36  ;;  %v1420_v53 = vmul.f32 %v5308_v7, %v1364_v33  ;;  %v1421_v34 = vmul.f32 %v5309_v40, %v1365_v52  ;;  %v1422_v18 = vmul.f32 %v5310_v43, %v1366_v26  ;;  %v5312_v54 = vld [vmem:[#allocation24_spill] sm:$0xff]  ;;  %v5313_v0 = vld [vmem:[#allocation25_spill] sm:$0xff]  ;;  %v5318_v52 = vld [vmem:[#allocation35_spill] sm:$0xff] }
 0x186   :  { %v1423_v56 = vmul.f32 %v5311_v39, %v1367_v41  ;;  %v1424_v50 = vmul.f32 %v5312_v54, %v1368_v10  ;;  %v1425_v9 = vmul.f32 %v5313_v0, %v1369_v23  ;;  %v1426_v20 = vmul.f32 %v5314_v11, %v1370_v13  ;;  %v5316_v36 = vld [vmem:[#allocation32_spill] sm:$0xff]  ;;  %v5317_v48 = vld [vmem:[#allocation33_spill] sm:$0xff]  ;;  %v5319_v26 = vld [vmem:[#allocation26_spill] sm:$0xff] }
 0x187   :  { %v4455_v2 = vadd.f32 %v5315_v15, %v1419_v6  ;;  %v4458_v1 = vadd.f32 %v5316_v36, %v1420_v53  ;;  %v4461_v33 = vadd.f32 %v5317_v48, %v1421_v34  ;;  %v4464_v7 = vadd.f32 %v5318_v52, %v1422_v18  ;;  %v5320_v10 = vld [vmem:[#allocation27_spill] sm:$0xff]  ;;  %v5321_v23 = vld [vmem:[#allocation36_spill] sm:$0xff] }
 0x188   :  { %v4467_v41 = vadd.f32 %v5319_v26, %v1423_v56  ;;  %v4470_v39 = vadd.f32 %v5320_v10, %v1424_v50  ;;  %v4473_v11 = vadd.f32 %v5321_v23, %v1425_v9  ;;  %v4476_v13 = vadd.f32 %v4191_v35, %v1426_v20 }
 0x189   :  { %v1436_v30 = vmul.f32 %v4218_v17, %v4391_v46  ;;  %v1437_v34 = vmul.f32 %v4218_v17, %v4394_v31  ;;  %v1438_v6 = vmul.f32 %v4218_v17, %v4397_v37  ;;  %v1439_v53 = vmul.f32 %v4218_v17, %v4400_v44 }
 0x18a   :  { %v1440_v50 = vmul.f32 %v4218_v17, %v4403_v8  ;;  %v1441_v40 = vmul.f32 %v4218_v17, %v4406_v47  ;;  %v1442_v35 = vmul.f32 %v4218_v17, %v4409_v22  ;;  %v1443_v43 = vmul.f32 %v4218_v17, %v4412_v59 }
 0x18b   :  { %v1445_v18 = vmul.f32 %v4221_v49, %v4423_v27  ;;  %v1446_v56 = vmul.f32 %v4221_v49, %v4426_v38  ;;  %v1447_v54 = vmul.f32 %v4221_v49, %v4429_v5  ;;  %v1448_v0 = vmul.f32 %v4221_v49, %v4432_v25 }
 0x18c   :  { %v1449_v9 = vmul.f32 %v4221_v49, %v4435_v55  ;;  %v1450_v20 = vmul.f32 %v4221_v49, %v4438_v60  ;;  %v1451_v17 = vmul.f32 %v4221_v49, %v4441_v63  ;;  %v1452_v15 = vmul.f32 %v4221_v49, %v4444_v58 }
 0x18d   :  { %v1453_v36 = vadd.f32 %v1445_v18, %v1436_v30  ;;  %v1454_v48 = vadd.f32 %v1446_v56, %v1437_v34  ;;  %v1455_v52 = vadd.f32 %v1447_v54, %v1438_v6  ;;  %v1456_v26 = vadd.f32 %v1448_v0, %v1439_v53 }
 0x18e   :  { %v1457_v10 = vadd.f32 %v1449_v9, %v1440_v50  ;;  %v1458_v23 = vadd.f32 %v1450_v20, %v1441_v40  ;;  %v1459_v21 = vadd.f32 %v1451_v17, %v1442_v35  ;;  %v1460_v62 = vadd.f32 %v1452_v15, %v1443_v43 }
 0x18f   :  { %v1462_v61 = vmul.f32 %v4223_v14, %v4455_v2  ;;  %v1463_v19 = vmul.f32 %v4223_v14, %v4458_v1  ;;  %v1464_v32 = vmul.f32 %v4223_v14, %v4461_v33  ;;  %v1465_v49 = vmul.f32 %v4223_v14, %v4464_v7 }
 0x190   :  { %v1466_v30 = vmul.f32 %v4223_v14, %v4467_v41  ;;  %v1467_v34 = vmul.f32 %v4223_v14, %v4470_v39  ;;  %v1468_v6 = vmul.f32 %v4223_v14, %v4473_v11  ;;  %v1469_v53 = vmul.f32 %v4223_v14, %v4476_v13 }
 0x191   :  { %v1470_v50 = vadd.f32 %v1462_v61, %v1453_v36  ;;  %v1471_v40 = vadd.f32 %v1463_v19, %v1454_v48  ;;  %v1472_v35 = vadd.f32 %v1464_v32, %v1455_v52  ;;  %v1473_v43 = vadd.f32 %v1465_v49, %v1456_v26 }
 0x192   :  { %v1474_v18 = vadd.f32 %v1466_v30, %v1457_v10  ;;  %v1475_v56 = vadd.f32 %v1467_v34, %v1458_v23  ;;  %v1476_v54 = vadd.f32 %v1468_v6, %v1459_v21  ;;  %v1477_v0 = vadd.f32 %v1469_v53, %v1460_v62 }
 0x193   :  { %v1479_v9 = vadd.f32 %v4225_v51, %v1470_v50  ;;  %v1480_v20 = vadd.f32 %v4225_v51, %v1471_v40  ;;  %v1481_v17 = vadd.f32 %v4225_v51, %v1472_v35  ;;  %v1482_v15 = vadd.f32 %v4225_v51, %v1473_v43 }
 0x194   :  { %v1483_v28 = vadd.f32 %v4225_v51, %v1474_v18  ;;  %v1484_v14 = vadd.f32 %v4225_v51, %v1475_v56  ;;  %v1485_v19 = vadd.f32 %v4225_v51, %v1476_v54  ;;  %v1486_v32 = vadd.f32 %v4225_v51, %v1477_v0 }
 0x195   :  { %v1842_v61 = vmul.f32 -1.442695, %v1479_v9  ;;  %v1843_v36 = vmul.f32 -1.442695, %v1480_v20  ;;  %v1844_v21 = vmul.f32 -1.442695, %v1481_v17  ;;  %v1552_v26 = vmul.f32 %v4229_v12, %v4391_v46 }
 0x196   :  { %v1845_v62 = vmul.f32 -1.442695, %v1482_v15  ;;  %v1846_v48 = vmul.f32 -1.442695, %v1483_v28  ;;  %v1847_v52 = vmul.f32 -1.442695, %v1484_v14  ;;  %v1553_v49 = vmul.f32 %v4229_v12, %v4394_v31 }
 0x197   :  { %2011 = vpow2.f32 %v1842_v61  ;;  %v1848_v10 = vmul.f32 -1.442695, %v1485_v19  ;;  %v1849_v23 = vmul.f32 -1.442695, %v1486_v32  ;;  %v1554_v30 = vmul.f32 %v4229_v12, %v4397_v37 }
 0x198   :  { %2013 = vpow2.f32 %v1843_v36  ;;  %v1555_v51 = vmul.f32 %v4229_v12, %v4400_v44  ;;  %v1556_v28 = vmul.f32 %v4229_v12, %v4403_v8  ;;  %v1557_v34 = vmul.f32 %v4229_v12, %v4406_v47 }
 0x199   :  { %2015 = vpow2.f32 %v1844_v21  ;;  %v1558_v6 = vmul.f32 %v4229_v12, %v4409_v22  ;;  %v1559_v53 = vmul.f32 %v4229_v12, %v4412_v59  ;;  %v1561_v50 = vmul.f32 %v4231_v29, %v4423_v27 }
 0x19a   :  { %2017 = vpow2.f32 %v1845_v62  ;;  %v1562_v40 = vmul.f32 %v4231_v29, %v4426_v38  ;;  %v1563_v35 = vmul.f32 %v4231_v29, %v4429_v5  ;;  %v1564_v43 = vmul.f32 %v4231_v29, %v4432_v25 }
 0x19b   :  { %2019 = vpow2.f32 %v1846_v48  ;;  %v1565_v18 = vmul.f32 %v4231_v29, %v4435_v55  ;;  %v1566_v12 = vmul.f32 %v4231_v29, %v4438_v60  ;;  %v1567_v56 = vmul.f32 %v4231_v29, %v4441_v63 }
 0x19c   :  { %2021 = vpow2.f32 %v1847_v52  ;;  %v1568_v54 = vmul.f32 %v4231_v29, %v4444_v58  ;;  %v1569_v0 = vadd.f32 %v1561_v50, %v1552_v26  ;;  %v1570_v9 = vadd.f32 %v1562_v40, %v1553_v49 }
 0x19d   :  { %2023 = vpow2.f32 %v1848_v10  ;;  %v1571_v20 = vadd.f32 %v1563_v35, %v1554_v30  ;;  %v1572_v17 = vadd.f32 %v1564_v43, %v1555_v51  ;;  %v1573_v15 = vadd.f32 %v1565_v18, %v1556_v28 }
 0x19e   :  { %2025 = vpow2.f32 %v1849_v23  ;;  %v1574_v14 = vadd.f32 %v1566_v12, %v1557_v34  ;;  %v1575_v19 = vadd.f32 %v1567_v56, %v1558_v6  ;;  %v1576_v32 = vadd.f32 %v1568_v54, %v1559_v53 }
 0x19f   :  { %v1578_v61 = vmul.f32 %v4338_v16, %v4455_v2  ;;  %v1579_v36 = vmul.f32 %v4338_v16, %v4458_v1  ;;  %v1580_v21 = vmul.f32 %v4338_v16, %v4461_v33  ;;  %v1581_v29 = vmul.f32 %v4338_v16, %v4464_v7 }
 0x1a0   :  { %v1582_v62 = vmul.f32 %v4338_v16, %v4467_v41  ;;  %v1583_v48 = vmul.f32 %v4338_v16, %v4470_v39  ;;  %v1584_v52 = vmul.f32 %v4338_v16, %v4473_v11  ;;  %v1585_v10 = vmul.f32 %v4338_v16, %v4476_v13 }
 0x1a1   :  { %v2012_v26 = vpop.eup %2011  ;;  %v1586_v23 = vadd.f32 %v1578_v61, %v1569_v0  ;;  %v1587_v49 = vadd.f32 %v1579_v36, %v1570_v9  ;;  %v1588_v30 = vadd.f32 %v1580_v21, %v1571_v20  ;;  %v1589_v34 = vadd.f32 %v1581_v29, %v1572_v17 }
 0x1a2   :  { %v2014_v51 = vpop.eup %2013  ;;  %v1511_v28 = vadd.f32 1.0, %v2012_v26  ;;  %v1590_v6 = vadd.f32 %v1582_v62, %v1573_v15  ;;  %v1591_v53 = vadd.f32 %v1583_v48, %v1574_v14  ;;  %v1592_v35 = vadd.f32 %v1584_v52, %v1575_v19 }
 0x1a3   :  { %v2016_v50 = vpop.eup %2015  ;;  %v1512_v40 = vadd.f32 1.0, %v2014_v51  ;;  %v1593_v43 = vadd.f32 %v1585_v10, %v1576_v32  ;;  %v1595_v18 = vadd.f32 %v4341_v4, %v1586_v23  ;;  %v5322_v56 = vand.u32 2147483647, %v4297_v3 }
 0x1a4   :  { %v2018_v12 = vpop.eup %2017  ;;  %v1513_v16 = vadd.f32 1.0, %v2016_v50  ;;  %2027 = vrcp.f32 %v1511_v28  ;;  %v1596_v0 = vadd.f32 %v4341_v4, %v1587_v49  ;;  %v1597_v9 = vadd.f32 %v4341_v4, %v1588_v30 }
 0x1a5   :  { %vm4585_vm0 = vcmp.le.f32.partialorder %v5322_v56, 1.0  ;;  %v2020_v20 = vpop.eup %2019  ;;  %v5325_v17 = vand.u32 2147483647, %v4308_v42  ;;  %v1514_v14 = vadd.f32 1.0, %v2018_v12  ;;  %2029 = vrcp.f32 %v1512_v40  ;;  %v5341_v40 = vld [vmem:[#allocation37_spill] sm:$0xff]  ;;  %v5345_v56 = vld [vmem:[#allocation40_spill] sm:$0xff] }
 0x1a6   :  { %v1598_v3 = vadd.f32 %v4341_v4, %v1589_v34  ;;  %v1599_v19 = vadd.f32 %v4341_v4, %v1590_v6  ;;  %v2022_v32 = vpop.eup %2021  ;;  %v5328_v61 = vand.u32 2147483647, %v4316_v57  ;;  %v1515_v21 = vadd.f32 1.0, %v2020_v20 }
 0x1a7   :  { %vm4593_vm1 = vcmp.le.f32.partialorder %v5325_v17, 1.0  ;;  %2031 = vrcp.f32 %v1513_v16  ;;  %v1600_v42 = vadd.f32 %v4341_v4, %v1591_v53  ;;  %v1601_v29 = vadd.f32 %v4341_v4, %v1592_v35  ;;  %v2024_v62 = vpop.eup %2023 }
 0x1a8   :  { %vm4601_vm2 = vcmp.le.f32.partialorder %v5328_v61, 1.0  ;;  %v5331_v48 = vand.u32 2147483647, %v4319_v45  ;;  %v1516_v26 = vadd.f32 1.0, %v2022_v32  ;;  %2033 = vrcp.f32 %v1514_v14  ;;  %v2026_v10 = vpop.eup %2025  ;;  %v5337_v45 = vld [vmem:[#allocation34_spill] sm:$0xff] }
 0x1a9   :  { %v1602_v57 = vadd.f32 %v4341_v4, %v1593_v43  ;;  %v5334_v23 = vand.u32 2147483647, %v4327_v24  ;;  %v1517_v30 = vadd.f32 1.0, %v2024_v62  ;;  %2035 = vrcp.f32 %v1515_v21  ;;  %v5350_v21 = vld [vmem:[#allocation42_spill] sm:$0xff] }
 0x1aa   :  { %vm4609_vm3 = vcmp.le.f32.partialorder %v5331_v48, 1.0  ;;  %v1850_v51 = vmul.f32 -1.442695, %v1595_v18  ;;  %v1851_v28 = vmul.f32 -1.442695, %v1596_v0  ;;  %v1518_v53 = vadd.f32 1.0, %v2026_v10 }
 0x1ab   :  { %vm4616_vm4 = vcmp.le.f32.partialorder %v5334_v23, 1.0  ;;  %v5338_v34 = vand.u32 2147483647, %v5337_v45  ;;  %2037 = vrcp.f32 %v1516_v26  ;;  %v1852_v4 = vmul.f32 -1.442695, %v1597_v9  ;;  %v5349_v9 = vld [vmem:[#allocation41_spill] sm:$0xff] }
 0x1ac   :  { %v1853_v50 = vmul.f32 -1.442695, %v1598_v3  ;;  %v5342_v24 = vand.u32 2147483647, %v5341_v40  ;;  %2039 = vrcp.f32 %v1517_v30  ;;  %v1854_v43 = vmul.f32 -1.442695, %v1599_v19 }
 0x1ad   :  { %vm4622_vm5 = vcmp.le.f32.partialorder %v5338_v34, 1.0  ;;  %v1855_v18 = vmul.f32 -1.442695, %v1600_v42  ;;  %v1856_v12 = vmul.f32 -1.442695, %v1601_v29  ;;  %2041 = vrcp.f32 %v1518_v53 }
 0x1ae   :  { %vm4628_vm6 = vcmp.le.f32.partialorder %v5342_v24, 1.0  ;;  %v5346_v16 = vand.u32 2147483647, %v5345_v56  ;;  %v1857_v20 = vmul.f32 -1.442695, %v1602_v57  ;;  %v1669_v17 = vmul.f32 %v5349_v9, %v4391_v46  ;;  %v2028_v42 = vpop.eup %2027 }
 0x1af   :  { %v1670_v14 = vmul.f32 %v5349_v9, %v4394_v31  ;;  %2043 = vpow2.f32 %v1850_v51  ;;  %v1671_v3 = vmul.f32 %v5349_v9, %v4397_v37  ;;  %v1672_v19 = vmul.f32 %v5349_v9, %v4400_v44  ;;  %v2030_v29 = vpop.eup %2029 }
 0x1b0   :  { %vm4634_vm7 = vcmp.le.f32.partialorder %v5346_v16, 1.0  ;;  %v1673_v32 = vmul.f32 %v5349_v9, %v4403_v8  ;;  %2045 = vpow2.f32 %v1851_v28  ;;  %v1674_v61 = vmul.f32 %v5349_v9, %v4406_v47 }
 0x1b1   :  { %v1675_v46 = vmul.f32 %v5349_v9, %v4409_v22  ;;  %v1678_v31 = vmul.f32 %v5350_v21, %v4423_v27  ;;  %2047 = vpow2.f32 %v1852_v4  ;;  %v1676_v37 = vmul.f32 %v5349_v9, %v4412_v59  ;;  %v2032_v62 = vpop.eup %2031  ;;  %v5351_v4 = vld [vmem:[#allocation43_spill] sm:$0xff] }
 0x1b2   :  { %v1679_v44 = vmul.f32 %v5350_v21, %v4426_v38  ;;  %v1680_v8 = vmul.f32 %v5350_v21, %v4429_v5  ;;  %v1535_v47 = vsel %vm4585_vm0, %v2028_v42, 0.0  ;;  %2049 = vpow2.f32 %v1853_v50  ;;  %v2034_v48 = vpop.eup %2033 }
 0x1b3   :  { %v1681_v22 = vmul.f32 %v5350_v21, %v4432_v25  ;;  %v1682_v27 = vmul.f32 %v5350_v21, %v4435_v55  ;;  %v1536_v59 = vsel %vm4593_vm1, %v2030_v29, 0.0  ;;  %1543 = vst [vmem:[%s4816_s2] sm:$0xff] %v1535_v47  ;;  %2051 = vpow2.f32 %v1854_v43  ;;  %v2036_v57 = vpop.eup %2035 }
 0x1b4   :  { %v1683_v38 = vmul.f32 %v5350_v21, %v4438_v60  ;;  %v1684_v5 = vmul.f32 %v5350_v21, %v4441_v63  ;;  %v1537_v25 = vsel %vm4601_vm2, %v2032_v62, 0.0  ;;  %1544 = vst [vmem:[%s4816_s2 + $0x8] sm:$0xff] %v1536_v59  ;;  %2053 = vpow2.f32 %v1855_v18 }
 0x1b5   :  { %v1685_v55 = vmul.f32 %v5350_v21, %v4444_v58  ;;  %v1686_v26 = vadd.f32 %v1678_v31, %v1669_v17  ;;  %v1538_v60 = vsel %vm4609_vm3, %v2034_v48, 0.0  ;;  %1545 = vst [vmem:[%s4816_s2 + $0x10] sm:$0xff] %v1537_v25  ;;  %2055 = vpow2.f32 %v1856_v12  ;;  %v2038_v23 = vpop.eup %2037 }
 0x1b6   :  { %v1687_v63 = vadd.f32 %v1679_v44, %v1670_v14  ;;  %v1688_v10 = vadd.f32 %v1680_v8, %v1671_v3  ;;  %v1539_v30 = vsel %vm4616_vm4, %v2036_v57, 0.0  ;;  %1546 = vst [vmem:[%s4816_s2 + $0x18] sm:$0xff] %v1538_v60  ;;  %2057 = vpow2.f32 %v1857_v20  ;;  %v2040_v28 = vpop.eup %2039  ;;  %v5352_v8 = vld [vmem:[#allocation44_spill] sm:$0xff] }
 0x1b7   :  { %v1689_v58 = vadd.f32 %v1681_v22, %v1672_v19  ;;  %v1690_v51 = vadd.f32 %v1682_v27, %v1673_v32  ;;  %v1540_v45 = vsel %vm4622_vm5, %v2038_v23, 0.0  ;;  %1547 = vst [vmem:[%s4816_s2 + $0x20] sm:$0xff] %v1539_v30  ;;  %v1691_v34 = vadd.f32 %v1683_v38, %v1674_v61  ;;  %v2042_v40 = vpop.eup %2041 }
 0x1b8   :  { %v1692_v53 = vadd.f32 %v1684_v5, %v1675_v46  ;;  %v1695_v50 = vmul.f32 %v5351_v4, %v4455_v2  ;;  %v1541_v24 = vsel %vm4628_vm6, %v2040_v28, 0.0  ;;  %1548 = vst [vmem:[%s4816_s2 + $0x28] sm:$0xff] %v1540_v45  ;;  %v1696_v43 = vmul.f32 %v5351_v4, %v4458_v1 }
 0x1b9   :  { %v1697_v18 = vmul.f32 %v5351_v4, %v4461_v33  ;;  %v1698_v12 = vmul.f32 %v5351_v4, %v4464_v7  ;;  %v2044_v56 = vpop.eup %2043  ;;  %v1542_v2 = vsel %vm4634_vm7, %v2042_v40, 0.0  ;;  %1549 = vst [vmem:[%s4816_s2 + $0x30] sm:$0xff] %v1541_v24  ;;  %v1699_v16 = vmul.f32 %v5351_v4, %v4467_v41 }
 0x1ba   :  { %v1700_v1 = vmul.f32 %v5351_v4, %v4470_v39  ;;  %v1701_v33 = vmul.f32 %v5351_v4, %v4473_v11  ;;  %v2046_v20 = vpop.eup %2045  ;;  %1550 = vst [vmem:[%s4816_s2 + $0x38] sm:$0xff] %v1542_v2  ;;  %v1627_v7 = vadd.f32 1.0, %v2044_v56  ;;  %v1693_v9 = vadd.f32 %v1685_v55, %v1676_v37 }
 0x1bb   :  { %v1703_v17 = vadd.f32 %v1695_v50, %v1686_v26  ;;  %v1704_v14 = vadd.f32 %v1696_v43, %v1687_v63  ;;  %v2048_v3 = vpop.eup %2047  ;;  %v1628_v19 = vadd.f32 1.0, %v2046_v20  ;;  %v1702_v41 = vmul.f32 %v5351_v4, %v4476_v13 }
 0x1bc   :  { %v1705_v32 = vadd.f32 %v1697_v18, %v1688_v10  ;;  %v1706_v61 = vadd.f32 %v1698_v12, %v1689_v58  ;;  %v2050_v39 = vpop.eup %2049  ;;  %v1629_v46 = vadd.f32 1.0, %v2048_v3  ;;  %2059 = vrcp.f32 %v1627_v7 }
 0x1bd   :  { %v1707_v11 = vadd.f32 %v1699_v16, %v1690_v51  ;;  %v1708_v21 = vadd.f32 %v1700_v1, %v1691_v34  ;;  %v2052_v31 = vpop.eup %2051  ;;  %v1630_v42 = vadd.f32 1.0, %v2050_v39  ;;  %2061 = vrcp.f32 %v1628_v19 }
 0x1be   :  { %v1709_v44 = vadd.f32 %v1701_v33, %v1692_v53  ;;  %v1712_v37 = vadd.f32 %v5352_v8, %v1703_v17  ;;  %v2054_v29 = vpop.eup %2053  ;;  %v1631_v47 = vadd.f32 1.0, %v2052_v31  ;;  %2063 = vrcp.f32 %v1629_v46 }
 0x1bf   :  { %v1713_v22 = vadd.f32 %v5352_v8, %v1704_v14  ;;  %v1714_v13 = vadd.f32 %v5352_v8, %v1705_v32  ;;  %v2056_v27 = vpop.eup %2055  ;;  %v1632_v62 = vadd.f32 1.0, %v2054_v29  ;;  %2065 = vrcp.f32 %v1630_v42 }
 0x1c0   :  { %v1710_v59 = vadd.f32 %v1702_v41, %v1693_v9  ;;  %v1715_v38 = vadd.f32 %v5352_v8, %v1706_v61  ;;  %v2058_v5 = vpop.eup %2057  ;;  %v1633_v48 = vadd.f32 1.0, %v2056_v27  ;;  %2067 = vrcp.f32 %v1631_v47 }
 0x1c1   :  { %v1716_v25 = vadd.f32 %v5352_v8, %v1707_v11  ;;  %v1634_v55 = vadd.f32 1.0, %v2058_v5  ;;  %2069 = vrcp.f32 %v1632_v62  ;;  %v1717_v26 = vadd.f32 %v5352_v8, %v1708_v21 }
 0x1c2   :  { %v1866_v57 = vmul.f32 -1.442695, %v1712_v37  ;;  %2071 = vrcp.f32 %v1633_v48  ;;  %v1718_v60 = vadd.f32 %v5352_v8, %v1709_v44  ;;  %v1867_v63 = vmul.f32 -1.442695, %v1713_v22 }
 0x1c3   :  { %v1868_v10 = vmul.f32 -1.442695, %v1714_v13  ;;  %2073 = vrcp.f32 %v1634_v55  ;;  %v1719_v23 = vadd.f32 %v5352_v8, %v1710_v59  ;;  %v1869_v30 = vmul.f32 -1.442695, %v1715_v38 }
 0x1c4   :  { %2075 = vpow2.f32 %v1866_v57  ;;  %v1870_v58 = vmul.f32 -1.442695, %v1716_v25  ;;  %v1871_v51 = vmul.f32 -1.442695, %v1717_v26  ;;  %v1872_v45 = vmul.f32 -1.442695, %v1718_v60 }
 0x1c5   :  { %2077 = vpow2.f32 %v1867_v63  ;;  %v1873_v4 = vmul.f32 -1.442695, %v1719_v23 }
 0x1c6   :  { %v2060_v28 = vpop.eup %2059  ;;  %2079 = vpow2.f32 %v1868_v10 }
 0x1c7   :  { %v2062_v34 = vpop.eup %2061  ;;  %v1651_v53 = vsel %vm4585_vm0, %v2060_v28, 0.0  ;;  %2081 = vpow2.f32 %v1869_v30 }
 0x1c8   :  { %v2064_v50 = vpop.eup %2063  ;;  %v1652_v40 = vsel %vm4593_vm1, %v2062_v34, 0.0  ;;  %1858 = vst [vmem:[%s4816_s2 + $0x40] sm:$0xff] %v1651_v53  ;;  %2083 = vpow2.f32 %v1870_v58 }
 0x1c9   :  { %v2066_v24 = vpop.eup %2065  ;;  %v1653_v43 = vsel %vm4601_vm2, %v2064_v50, 0.0  ;;  %1859 = vst [vmem:[%s4816_s2 + $0x48] sm:$0xff] %v1652_v40  ;;  %2085 = vpow2.f32 %v1871_v51 }
 0x1ca   :  { %v2068_v18 = vpop.eup %2067  ;;  %v1654_v12 = vsel %vm4609_vm3, %v2066_v24, 0.0  ;;  %1860 = vst [vmem:[%s4816_s2 + $0x50] sm:$0xff] %v1653_v43  ;;  %2087 = vpow2.f32 %v1872_v45 }
 0x1cb   :  { %v2070_v56 = vpop.eup %2069  ;;  %v1655_v2 = vsel %vm4616_vm4, %v2068_v18, 0.0  ;;  %1861 = vst [vmem:[%s4816_s2 + $0x58] sm:$0xff] %v1654_v12  ;;  %2089 = vpow2.f32 %v1873_v4 }
 0x1cc   :  { %v2072_v16 = vpop.eup %2071  ;;  %v1656_v1 = vsel %vm4622_vm5, %v2070_v56, 0.0  ;;  %1862 = vst [vmem:[%s4816_s2 + $0x60] sm:$0xff] %v1655_v2 }
 0x1cd   :  { %v2074_v33 = vpop.eup %2073  ;;  %v1657_v20 = vsel %vm4628_vm6, %v2072_v16, 0.0  ;;  %1863 = vst [vmem:[%s4816_s2 + $0x68] sm:$0xff] %v1656_v1 }
 0x1ce   :  { %v2076_v7 = vpop.eup %2075  ;;  %v1658_v9 = vsel %vm4634_vm7, %v2074_v33, 0.0  ;;  %1864 = vst [vmem:[%s4816_s2 + $0x70] sm:$0xff] %v1657_v20 }
 0x1cf   :  { %v2078_v17 = vpop.eup %2077  ;;  %1865 = vst [vmem:[%s4816_s2 + $0x78] sm:$0xff] %v1658_v9  ;;  %v1744_v14 = vadd.f32 1.0, %v2076_v7 }
 0x1d0   :  { %v2080_v3 = vpop.eup %2079  ;;  %v1745_v19 = vadd.f32 1.0, %v2078_v17 }
 0x1d1   :  { %v2082_v41 = vpop.eup %2081  ;;  %v1746_v32 = vadd.f32 1.0, %v2080_v3  ;;  %2091 = vrcp.f32 %v1744_v14 }
 0x1d2   :  { %v2084_v61 = vpop.eup %2083  ;;  %v1747_v39 = vadd.f32 1.0, %v2082_v41  ;;  %2093 = vrcp.f32 %v1745_v19 }
 0x1d3   :  { %v2086_v46 = vpop.eup %2085  ;;  %v1748_v11 = vadd.f32 1.0, %v2084_v61  ;;  %2095 = vrcp.f32 %v1746_v32 }
 0x1d4   :  { %v2088_v21 = vpop.eup %2087  ;;  %v1749_v31 = vadd.f32 1.0, %v2086_v46  ;;  %2097 = vrcp.f32 %v1747_v39 }
 0x1d5   :  { %v2090_v42 = vpop.eup %2089  ;;  %v1750_v44 = vadd.f32 1.0, %v2088_v21  ;;  %2099 = vrcp.f32 %v1748_v11 }
 0x1d6   :  { %v1751_v8 = vadd.f32 1.0, %v2090_v42  ;;  %2101 = vrcp.f32 %v1749_v31 }
 0x1d7   :  { %2103 = vrcp.f32 %v1750_v44 }
 0x1d8   :  { %2105 = vrcp.f32 %v1751_v8 }
 0x1db   :  { %v2092_v37 = vpop.eup %2091 }
 0x1dc   :  { %v2094_v29 = vpop.eup %2093  ;;  %v1768_v47 = vsel %vm4585_vm0, %v2092_v37, 0.0 }
 0x1dd   :  { %v2096_v22 = vpop.eup %2095  ;;  %v1769_v13 = vsel %vm4593_vm1, %v2094_v29, 0.0  ;;  %1874 = vst [vmem:[%s4816_s2 + $0x80] sm:$0xff] %v1768_v47 }
 0x1de   :  { %v2098_v27 = vpop.eup %2097  ;;  %v1770_v62 = vsel %vm4601_vm2, %v2096_v22, 0.0  ;;  %1875 = vst [vmem:[%s4816_s2 + $0x88] sm:$0xff] %v1769_v13 }
 0x1df   :  { %v2100_v59 = vpop.eup %2099  ;;  %v1771_v54 = vsel %vm4609_vm3, %v2098_v27, 0.0  ;;  %1876 = vst [vmem:[%s4816_s2 + $0x90] sm:$0xff] %v1770_v62 }
 0x1e0   :  { %v2102_v15 = vpop.eup %2101  ;;  %v1772_v38 = vsel %vm4616_vm4, %v2100_v59, 0.0  ;;  %1877 = vst [vmem:[%s4816_s2 + $0x98] sm:$0xff] %v1771_v54 }
 0x1e1   :  { %v2104_v36 = vpop.eup %2103  ;;  %v1773_v5 = vsel %vm4622_vm5, %v2102_v15, 0.0  ;;  %1878 = vst [vmem:[%s4816_s2 + $0xa0] sm:$0xff] %v1772_v38 }
 0x1e2   :  { %v2106_v52 = vpop.eup %2105  ;;  %v1774_v48 = vsel %vm4628_vm6, %v2104_v36, 0.0  ;;  %1879 = vst [vmem:[%s4816_s2 + $0xa8] sm:$0xff] %v1773_v5 }
 0x1e3   :  { %v1775_v49 = vsel %vm4634_vm7, %v2106_v52, 0.0  ;;  %1880 = vst [vmem:[%s4816_s2 + $0xb0] sm:$0xff] %v1774_v48 }
 0x1e4   :  { %1881 = vst [vmem:[%s4816_s2 + $0xb8] sm:$0xff] %v1775_v49 }
 0x1e5   :  { %1789 = vsyncpa [#allocation3], 1 }

</bundles_post_ra>
